<compile_context>
chip_gen: v7x
topology: tpu7x:2x2x1
jax: 0.10.0
libtpu: 0.0.40
codegen_flags: <defaults>
</compile_context>

<pallas_src>
import numpy as np
import jax
import jax.numpy as jnp
from jax import lax
from jax.experimental import pallas as pl
from jax.experimental.pallas import tpu as pltpu

# Row tile in layer-1 phase rows. 8 keeps kernel-B VMEM well under 48 MiB at 222x222.
TB_DEFAULT = 8
_VMEM_LIMIT = 48 * 1024 * 1024

# (output parity r, tap offset d) -> kernel index for K=3, stride=2, pad=1
_KID3 = {(0, 0): 1, (1, 0): 2, (1, 1): 0}

# Layer-2 (K=4, s=2, p=1) taps in phase space.  Final index = 4*base + q.
# _TAPS4[q] = [(input plane parity p1, delta in phase units, kernel index k), ...]
_TAPS4 = {
    0: [(1, -1, 3), (0, 0, 1)],
    1: [(0, 0, 2), (1, 0, 0)],
    2: [(0, 0, 3), (1, 0, 1)],
    3: [(1, 0, 2), (0, 1, 0)],
}


# ---------------------------------------------------------------------------
# Parameter preparation (one-time, outside the per-forward path)
# ---------------------------------------------------------------------------
def prepare_params(params):
    w1 = np.asarray(params["w1"], np.float32)              # (3,128,3,3)
    b1 = np.asarray(params["b1"], np.float32)              # (128,)
    w2 = np.asarray(params["w2"], np.float32)              # (128,32,4,4)
    b2 = np.asarray(params["b2"], np.float32)              # (32,)
    w3 = np.asarray(params["w3"], np.float32)[:, :, 0, 0]  # (32,8)
    b3 = np.asarray(params["b3"], np.float32)              # (8,)

    # ---- layer 1: (12, 512) packed tap weights; output groups g = r1*2 + c1
    wp = np.zeros((12, 512), np.float32)
    for g in range(4):
        r1, c1 = g // 2, g % 2
        for dr in range(2):
            for dc in range(2):
                if (r1, dr) in _KID3 and (c1, dc) in _KID3:
                    kh, kw = _KID3[(r1, dr)], _KID3[(c1, dc)]
                    for ci in range(3):
                        wp[(dr * 2 + dc) * 3 + ci, g * 128:(g + 1) * 128] = w1[ci, :, kh, kw]
    b1p = np.tile(b1, 4)[None, :]                           # (1, 512)

    # ---- layer 2: packed RHS blocks, derived from _TAPS4 (single source of truth)
    col_taps = {d: [(c1, q, k) for q in range(4) for (c1, dd, k) in _TAPS4[q] if dd == d]
                for d in (-1, 0, 1)}

    def row_taps(p1, d):                                    # [(q, kh)] ordered by q
        return [(q, k) for q in range(4) for (pp, dd, k) in _TAPS4[q] if pp == p1 and dd == d]

    def rhs_block(kh_by_q, dw, c1_list):
        out = np.zeros((128 * len(c1_list), 128 * len(kh_by_q)), np.float32)
        for bi, c1 in enumerate(c1_list):
            for qi, (_q, kh) in enumerate(kh_by_q):
                for (c1t, qc, kw) in col_taps[dw]:
                    if c1t == c1:
                        out[bi * 128:(bi + 1) * 128,
                            qi * 128 + qc * 32: qi * 128 + qc * 32 + 32] = w2[:, :, kh, kw]
        return out

    # central row windows: (r1=0, da=0) -> qr 0..2 ; (r1=1, da=0) -> qr 1..3
    central = [row_taps(0, 0), row_taps(1, 0)]
    # edge row windows: (r1=1, da=-1) -> qr 0 ; (r1=0, da=+1) -> qr 3
    edge = [row_taps(1, -1), row_taps(0, 1)]

    rbc = np.stack([rhs_block(central[0], 0, [0, 1]),
                    rhs_block(central[1], 0, [0, 1])])                        # (2,256,384)
    rbs = np.stack([np.stack([rhs_block(central[i], -1, [1]),
                              rhs_block(central[i], +1, [0])]) for i in range(2)])  # (2,2,128,384)
    rec = np.stack([rhs_block(edge[0], 0, [0, 1]),
                    rhs_block(edge[1], 0, [0, 1])])                           # (2,256,128)
    res = np.stack([np.stack([rhs_block(edge[i], -1, [1]),
                              rhs_block(edge[i], +1, [0])]) for i in range(2)])       # (2,2,128,128)
    b2p = np.tile(b2, 16)[None, :]                                            # (1,512)

    # ---- layer 3 (1x1) fused as block-diagonal (512, 128)
    w3bd = np.zeros((512, 128), np.float32)
    for p in range(16):
        w3bd[p * 32:(p + 1) * 32, p * 8:(p + 1) * 8] = w3
    b3p = np.tile(b3, 16)[None, :]                                            # (1,128)

    bf = jnp.bfloat16
    return {
        "wp1": jnp.asarray(wp, bf), "b1p": jnp.asarray(b1p, jnp.float32),
        "rbc": jnp.asarray(rbc, bf), "rbs": jnp.asarray(rbs, bf),
        "rec": jnp.asarray(rec, bf), "res": jnp.asarray(res, bf),
        "b2p": jnp.asarray(b2p, jnp.float32),
        "w3bd": jnp.asarray(w3bd, bf), "b3p": jnp.asarray(b3p, jnp.float32),
    }


# ---------------------------------------------------------------------------
# Wrapper-side prep: tiled im2col (tiny, 3-channel input) and boundary masks
# ---------------------------------------------------------------------------
def _build_im2col_tiles(x_nhwc, H, W, Wpad, TB, T):
    # im2col feature f = (dr*2+dc)*3 + ci  ->  x[a+dr, w+dc, ci]
    xp = jnp.pad(x_nhwc, ((0, 0), (0, 1), (0, 1), (0, 0)))
    cols = jnp.concatenate([xp[:, dr:dr + H, dc:dc + W, :]
                            for dr in (0, 1) for dc in (0, 1)], axis=-1)       # (N,H,W,12)
    cols = jnp.pad(cols.astype(jnp.bfloat16),
                   ((0, 0), (0, 0), (0, Wpad - W), (0, 0)))                    # pad width
    pad_bottom = T * TB + 1 - H
    colsr = jnp.pad(cols, ((0, 0), (1, pad_bottom), (0, 0), (0, 0)))           # row p <-> a=p-1
    R = TB + 2
    tiles = jnp.stack([colsr[:, t * TB: t * TB + R] for t in range(T)], axis=1)
    return tiles.reshape(x_nhwc.shape[0], T, R * Wpad, 12)


def _build_masks(H, W, Wpad, TB, T):
    # mask[t, i*Wpad + j, g] zeroes layer-1 phase entries that fall outside the true
    # (2H-1, 2W-1) layer-1 output (plus halo / width-pad positions).
    R = TB + 2
    a = jnp.arange(T)[:, None] * TB - 1 + jnp.arange(R)[None, :]               # (T,R)
    w = jnp.arange(Wpad)                                                       # (Wpad,)
    row_ok, row_last = (a >= 0) & (a < H), (a == H - 1)
    col_ok, col_last = (w < W), (w == W - 1)
    groups = []
    for g in range(4):
        r1, c1 = g // 2, g % 2
        rm = row_ok & (~row_last) if r1 == 1 else row_ok
        cm = col_ok & (~col_last) if c1 == 1 else col_ok
        groups.append(rm[:, :, None] & cm[None, None, :])
    m = jnp.stack(groups, axis=-1).astype(jnp.float32)                         # (T,R,Wpad,4)
    return m.reshape(T, R * Wpad, 4)


# ---------------------------------------------------------------------------
# Kernel A: ConvTranspose2d(3,128,3,s=2,p=1) + ReLU, phase-packed, row-tiled
# ---------------------------------------------------------------------------
def _make_layer1_kernel():
    def kernel(im_ref, mask_ref, w_ref, b_ref, o_ref):
        acc = jnp.dot(im_ref[0, 0], w_ref[...], preferred_element_type=jnp.float32)
        acc = jnp.maximum(acc + b_ref[...], 0.0)
        m = mask_ref[0]                                         # (M1,4) f32
        parts = [acc[:, g * 128:(g + 1) * 128] * m[:, g:g + 1] for g in range(4)]
        o_ref[0, 0] = jnp.concatenate(parts, axis=1).astype(jnp.bfloat16)
    return kernel


def _layer1_relu(imex, mask, prep, M1):
    N, T = imex.shape[0], imex.shape[1]
    return pl.pallas_call(
        _make_layer1_kernel(),
        out_shape=jax.ShapeDtypeStruct((N, T, M1, 512), jnp.bfloat16),
        grid=(N, T),
        in_specs=[
            pl.BlockSpec((1, 1, M1, 12), lambda n, t: (n, t, 0, 0)),
            pl.BlockSpec((1, M1, 4), lambda n, t: (t, 0, 0)),
            pl.BlockSpec((12, 512), lambda n, t: (0, 0)),
            pl.BlockSpec((1, 512), lambda n, t: (0, 0)),
        ],
        out_specs=pl.BlockSpec((1, 1, M1, 512), lambda n, t: (n, t, 0, 0)),
        compiler_params=pltpu.CompilerParams(
            dimension_semantics=("parallel", "parallel"),
            vmem_limit_bytes=_VMEM_LIMIT),
    )(imex, mask, prep["wp1"], prep["b1p"])


# ---------------------------------------------------------------------------
# Kernel B: ConvTranspose2d(128,32,4,s=2,p=1) + sigmoid + fused 1x1 (32->8)
# ---------------------------------------------------------------------------
def _make_layer23_kernel(TB, R, Wpad):
    Mo = TB * Wpad

    def kernel(y_ref, rbc_ref, rbs_ref, rec_ref, res_ref,
               b2_ref, w3_ref, b3_ref, o_ref):
        y = y_ref[0, 0].reshape(R, Wpad, 512)                                  # bf16
        zcol = jnp.zeros((R, 1, 512), jnp.bfloat16)
        ym = jnp.concatenate([zcol, y[:, :Wpad - 1, :]], axis=1)               # column w-1
        yp = jnp.concatenate([y[:, 1:, :], zcol], axis=1)                      # column w+1

        accs = [jnp.zeros((Mo, 128), jnp.float32) for _ in range(4)]           # per qr

        # central row windows (da = 0): r1=0 feeds qr 0..2, r1=1 feeds qr 1..3
        for wi, (r1, qr0) in enumerate(((0, 0), (1, 1))):
            yc = y[1:1 + TB, :, r1 * 256: r1 * 256 + 256].reshape(Mo, 256)
            ymc = ym[1:1 + TB, :, r1 * 256 + 128: r1 * 256 + 256].reshape(Mo, 128)
            ypc = yp[1:1 + TB, :, r1 * 256: r1 * 256 + 128].reshape(Mo, 128)
            part = jnp.dot(yc, rbc_ref[wi], preferred_element_type=jnp.float32)
            part += jnp.dot(ymc, rbs_ref[wi, 0], preferred_element_type=jnp.float32)
            part += jnp.dot(ypc, rbs_ref[wi, 1], preferred_element_type=jnp.float32)
            for j in range(3):
                accs[qr0 + j] = accs[qr0 + j] + part[:, j * 128:(j + 1) * 128]

        # edge row windows: (r1=1, da=-1) -> qr 0 ; (r1=0, da=+1) -> qr 3
        for wi, (r1, da, qr) in enumerate(((1, -1, 0), (0, 1, 3))):
            r0 = 1 + da
            yc = y[r0:r0 + TB, :, r1 * 256: r1 * 256 + 256].reshape(Mo, 256)
            ymc = ym[r0:r0 + TB, :, r1 * 256 + 128: r1 * 256 + 256].reshape(Mo, 128)
            ypc = yp[r0:r0 + TB, :, r1 * 256: r1 * 256 + 128].reshape(Mo, 128)
            part = jnp.dot(yc, rec_ref[wi], preferred_element_type=jnp.float32)
            part += jnp.dot(ymc, res_ref[wi, 0], preferred_element_type=jnp.float32)
            part += jnp.dot(ypc, res_ref[wi, 1], preferred_element_type=jnp.float32)
            accs[qr] = accs[qr] + part

        acc = jnp.concatenate(accs, axis=1)                                    # (Mo,512) f32
        z = jax.nn.sigmoid(acc + b2_ref[...]).astype(jnp.bfloat16)
        out = jnp.dot(z, w3_ref[...], preferred_element_type=jnp.float32) + b3_ref[...]
        o_ref[0, 0] = out                                                      # lane-dense (Mo,128)
    return kernel


def _layer23_fused(y, prep, TB, R, Wpad):
    N, T, M1, _ = y.shape
    Mo = TB * Wpad
    return pl.pallas_call(
        _make_layer23_kernel(TB, R, Wpad),
        out_shape=jax.ShapeDtypeStruct((N, T, Mo, 128), jnp.float32),
        grid=(N, T),
        in_specs=[
            pl.BlockSpec((1, 1, M1, 512), lambda n, t: (n, t, 0, 0)),
            pl.BlockSpec((2, 256, 384), lambda n, t: (0, 0, 0)),
            pl.BlockSpec((2, 2, 128, 384), lambda n, t: (0, 0, 0, 0)),
            pl.BlockSpec((2, 256, 128), lambda n, t: (0, 0, 0)),
            pl.BlockSpec((2, 2, 128, 128), lambda n, t: (0, 0, 0, 0)),
            pl.BlockSpec((1, 512), lambda n, t: (0, 0)),
            pl.BlockSpec((512, 128), lambda n, t: (0, 0)),
            pl.BlockSpec((1, 128), lambda n, t: (0, 0)),
        ],
        out_specs=pl.BlockSpec((1, 1, Mo, 128), lambda n, t: (n, t, 0, 0)),
        compiler_params=pltpu.CompilerParams(
            dimension_semantics=("parallel", "parallel"),
            vmem_limit_bytes=_VMEM_LIMIT),
    )(y, prep["rbc"], prep["rbs"], prep["rec"], prep["res"],
      prep["b2p"], prep["w3bd"], prep["b3p"])


# ---------------------------------------------------------------------------
# Forward pass (NCHW in / NCHW out, like the PyTorch module)
# ---------------------------------------------------------------------------
def model_forward(x_nchw, prep):
    N, _, H, W = x_nchw.shape
    TB = min(TB_DEFAULT, H)
    T = -(-H // TB)
    R = TB + 2
    Wpad = -(-W // 8) * 8
    M1 = R * Wpad

    x = jnp.transpose(x_nchw, (0, 2, 3, 1))                      # NHWC
    imex = _build_im2col_tiles(x, H, W, Wpad, TB, T)              # (N,T,M1,12) bf16
    mask = _build_masks(H, W, Wpad, TB, T)                        # (T,M1,4) f32

    y = _layer1_relu(imex, mask, prep, M1)                        # (N,T,M1,512) bf16
    o = _layer23_fused(y, prep, TB, R, Wpad)                      # (N,T,TB*Wpad,128) f32

    # de-interleave the 16 output phases (one XLA transpose of the final output)
    o = o.reshape(N, T * TB, Wpad, 4, 4, 8)[:, :H, :W]            # (N,a,w,qr,qc,co)
    o = jnp.transpose(o, (0, 5, 1, 3, 2, 4)).reshape(N, 8, 4 * H, 4 * W)
    return o[:, :, :4 * H - 2, :4 * W - 2]


# ---------------------------------------------------------------------------
# Independent XLA reference (f32) for sanity checking
# ---------------------------------------------------------------------------
def _ref_conv_transpose(x_nhwc, w_pt, b, stride, padding):
    K = w_pt.shape[2]
    w_hwio = jnp.transpose(w_pt[:, :, ::-1, ::-1], (2, 3, 0, 1))
    y = lax.conv_general_dilated(
        x_nhwc, w_hwio, window_strides=(1, 1),
        padding=[(K - 1 - padding, K - 1 - padding)] * 2,
        lhs_dilation=(stride, stride),
        dimension_numbers=("NHWC", "HWIO", "NHWC"))
    return y + b


def _ref_forward(x_nchw, params):
    x = jnp.transpose(x_nchw, (0, 2, 3, 1))
    v2 = jnp.maximum(_ref_conv_transpose(x, params["w1"], params["b1"], 2, 1), 0.0)
    v4 = jax.nn.sigmoid(_ref_conv_transpose(v2, params["w2"], params["b2"], 2, 1))
    v5 = _ref_conv_transpose(v4, params["w3"], params["b3"], 1, 0)
    return jnp.transpose(v5, (0, 3, 1, 2))


if __name__ == "__main__":
    key = jax.random.PRNGKey(0)
    ks = jax.random.split(key, 8)
    params = {
        "w1": jax.random.uniform(ks[0], (3, 128, 3, 3), jnp.float32, -0.2, 0.2),
        "b1": jax.random.uniform(ks[1], (128,), jnp.float32, -0.2, 0.2),
        "w2": jax.random.uniform(ks[2], (128, 32, 4, 4), jnp.float32, -0.05, 0.05),
        "b2": jax.random.uniform(ks[3], (32,), jnp.float32, -0.05, 0.05),
        "w3": jax.random.uniform(ks[4], (32, 8, 1, 1), jnp.float32, -0.2, 0.2),
        "b3": jax.random.uniform(ks[5], (8,), jnp.float32, -0.2, 0.2),
    }
    prep = prepare_params(params)                   # hoisted weight packing (once)
    fwd = jax.jit(model_forward)
    ref = jax.jit(_ref_forward)

    # Small input consistent with the module (nominal was (2,3,222,222)); NCHW like PyTorch.
    x1 = jax.random.normal(ks[6], (2, 3, 16, 16), jnp.float32)
    out = jax.block_until_ready(fwd(x1, prep))
    assert out.shape == (2, 8, 62, 62), out.shape
    r1 = jax.block_until_ready(ref(x1, params))
    err1 = float(jnp.max(jnp.abs(out - r1)))
    assert err1 < 1e-2, f"max abs err {err1}"       # bf16 MXU operands, f32 accumulation

    # Odd spatial shape: exercises row-tile halos, width padding and boundary masks.
    x2 = jax.random.normal(ks[7], (1, 3, 13, 11), jnp.float32)
    out2 = jax.block_until_ready(fwd(x2, prep))
    r2 = jax.block_until_ready(ref(x2, params))
    err2 = float(jnp.max(jnp.abs(out2 - r2)))
    assert out2.shape == (1, 8, 50, 42), out2.shape
    assert err2 < 1e-2, f"max abs err {err2}"

    print("KERNEL_OK")
</pallas_src>

<mosaic_0001>
module attributes {stable_mosaic.version = 11 : i64} {
  func.func @kernel(%arg0: i32, %arg1: i32, %arg2: memref<1x1x160x12xbf16, #tpu.memory_space<vmem>>, %arg3: memref<1x160x4xf32, #tpu.memory_space<vmem>>, %arg4: memref<12x512xbf16, #tpu.memory_space<vmem>>, %arg5: memref<1x512xf32, #tpu.memory_space<vmem>>, %arg6: memref<1x1x160x512xbf16, #tpu.memory_space<vmem>>) attributes {dimension_semantics = [#tpu.dimension_semantics<parallel>, #tpu.dimension_semantics<parallel>], iteration_bounds = array<i64: 2, 2>, scalar_prefetch = 0 : i64, scratch_operands = 0 : i64, tpu.core_type = #tpu.core_type<tc>, window_params = [{transform_indices = @transform_0, window_bounds = array<i64: 1, 1, 160, 12>}, {transform_indices = @transform_1, window_bounds = array<i64: 1, 160, 4>}, {pipeline_mode = #tpu.pipeline_mode<synchronous>, transform_indices = @transform_2, window_bounds = array<i64: 12, 512>}, {pipeline_mode = #tpu.pipeline_mode<synchronous>, transform_indices = @transform_3, window_bounds = array<i64: 1, 512>}, {transform_indices = @transform_4, window_bounds = array<i64: 1, 1, 160, 512>}]} {
    %c0 = arith.constant 0 : index
    %c0_0 = arith.constant 0 : index
    %c0_1 = arith.constant 0 : index
    %c0_2 = arith.constant 0 : index
    %0 = vector.load %arg2[%c0, %c0_0, %c0_1, %c0_2] : memref<1x1x160x12xbf16, #tpu.memory_space<vmem>>, vector<1x1x160x12xbf16>
    %1 = vector.shape_cast %0 : vector<1x1x160x12xbf16> to vector<160x12xbf16>
    %c0_3 = arith.constant 0 : index
    %c0_4 = arith.constant 0 : index
    %2 = vector.load %arg4[%c0_3, %c0_4] : memref<12x512xbf16, #tpu.memory_space<vmem>>, vector<12x512xbf16>
    %cst = arith.constant dense<0.000000e+00> : vector<160x512xf32>
    %3 = tpu.matmul %1, %2, %cst {dimension_numbers = #tpu.dot_dimension_numbers<[1], [0], [0], [1], [0, 0, 1, 1], [], []>} : vector<160x12xbf16>, vector<12x512xbf16>, vector<160x512xf32> -> vector<160x512xf32>
    %c0_5 = arith.constant 0 : index
    %c0_6 = arith.constant 0 : index
    %4 = vector.load %arg5[%c0_5, %c0_6] : memref<1x512xf32, #tpu.memory_space<vmem>>, vector<1x512xf32>
    %5 = vector.broadcast %4 : vector<1x512xf32> to vector<160x512xf32>
    %6 = arith.addf %3, %5 : vector<160x512xf32>
    %cst_7 = arith.constant 0.000000e+00 : f32
    %7 = vector.broadcast %cst_7 : f32 to vector<160x512xf32>
    %8 = arith.maximumf %6, %7 : vector<160x512xf32>
    %c0_8 = arith.constant 0 : index
    %c0_9 = arith.constant 0 : index
    %c0_10 = arith.constant 0 : index
    %9 = vector.load %arg3[%c0_8, %c0_9, %c0_10] : memref<1x160x4xf32, #tpu.memory_space<vmem>>, vector<1x160x4xf32>
    %10 = vector.shape_cast %9 : vector<1x160x4xf32> to vector<160x4xf32>
    %11 = vector.extract_strided_slice %8 {offsets = [0, 0], sizes = [160, 128], strides = [1, 1]} : vector<160x512xf32> to vector<160x128xf32>
    %12 = vector.extract_strided_slice %10 {offsets = [0, 0], sizes = [160, 1], strides = [1, 1]} : vector<160x4xf32> to vector<160x1xf32>
    %13 = vector.broadcast %12 : vector<160x1xf32> to vector<160x128xf32>
    %14 = arith.mulf %11, %13 : vector<160x128xf32>
    %15 = vector.extract_strided_slice %8 {offsets = [0, 128], sizes = [160, 128], strides = [1, 1]} : vector<160x512xf32> to vector<160x128xf32>
    %16 = vector.extract_strided_slice %10 {offsets = [0, 1], sizes = [160, 1], strides = [1, 1]} : vector<160x4xf32> to vector<160x1xf32>
    %17 = vector.broadcast %16 : vector<160x1xf32> to vector<160x128xf32>
    %18 = arith.mulf %15, %17 : vector<160x128xf32>
    %19 = vector.extract_strided_slice %8 {offsets = [0, 256], sizes = [160, 128], strides = [1, 1]} : vector<160x512xf32> to vector<160x128xf32>
    %20 = vector.extract_strided_slice %10 {offsets = [0, 2], sizes = [160, 1], strides = [1, 1]} : vector<160x4xf32> to vector<160x1xf32>
    %21 = vector.broadcast %20 : vector<160x1xf32> to vector<160x128xf32>
    %22 = arith.mulf %19, %21 : vector<160x128xf32>
    %23 = vector.extract_strided_slice %8 {offsets = [0, 384], sizes = [160, 128], strides = [1, 1]} : vector<160x512xf32> to vector<160x128xf32>
    %24 = vector.extract_strided_slice %10 {offsets = [0, 3], sizes = [160, 1], strides = [1, 1]} : vector<160x4xf32> to vector<160x1xf32>
    %25 = vector.broadcast %24 : vector<160x1xf32> to vector<160x128xf32>
    %26 = arith.mulf %23, %25 : vector<160x128xf32>
    %27 = tpu.concatenate %14, %18, %22, %26 in 1 : vector<160x128xf32>, vector<160x128xf32>, vector<160x128xf32>, vector<160x128xf32> -> vector<160x512xf32>
    %28 = arith.truncf %27 : vector<160x512xf32> to vector<160x512xbf16>
    %c0_11 = arith.constant 0 : index
    %c0_12 = arith.constant 0 : index
    %c0_13 = arith.constant 0 : index
    %c0_14 = arith.constant 0 : index
    %29 = vector.load %arg6[%c0_11, %c0_12, %c0_13, %c0_14] : memref<1x1x160x512xbf16, #tpu.memory_space<vmem>>, vector<1x1x160x512xbf16>
    %30 = vector.shape_cast %29 : vector<1x1x160x512xbf16> to vector<160x512xbf16>
    %31 = vector.shape_cast %28 : vector<160x512xbf16> to vector<1x1x160x512xbf16>
    tpu.vector_store %arg6[%c0_11, %c0_12, %c0_13, %c0_14], %31 {strides = array<i32>} : memref<1x1x160x512xbf16, #tpu.memory_space<vmem>>, vector<1x1x160x512xbf16>,
    return
  }
  func.func @transform_0(%arg0: i32, %arg1: i32) -> (i32, i32, i32, i32) {
    %c0_i32 = arith.constant 0 : i32
    %c0_i32_0 = arith.constant 0 : i32
    %c0_i32_1 = arith.constant 0 : i32
    return %arg0, %arg1, %c0_i32, %c0_i32_0 : i32, i32, i32, i32
  }
  func.func @transform_1(%arg0: i32, %arg1: i32) -> (i32, i32, i32) {
    %c0_i32 = arith.constant 0 : i32
    %c0_i32_0 = arith.constant 0 : i32
    %c0_i32_1 = arith.constant 0 : i32
    return %arg1, %c0_i32, %c0_i32_0 : i32, i32, i32
  }
  func.func @transform_2(%arg0: i32, %arg1: i32) -> (i32, i32) {
    %c0_i32 = arith.constant 0 : i32
    %c0_i32_0 = arith.constant 0 : i32
    %c0_i32_1 = arith.constant 0 : i32
    return %c0_i32, %c0_i32_0 : i32, i32
  }
  func.func @transform_3(%arg0: i32, %arg1: i32) -> (i32, i32) {
    %c0_i32 = arith.constant 0 : i32
    %c0_i32_0 = arith.constant 0 : i32
    %c0_i32_1 = arith.constant 0 : i32
    return %c0_i32, %c0_i32_0 : i32, i32
  }
  func.func @transform_4(%arg0: i32, %arg1: i32) -> (i32, i32, i32, i32) {
    %c0_i32 = arith.constant 0 : i32
    %c0_i32_0 = arith.constant 0 : i32
    %c0_i32_1 = arith.constant 0 : i32
    return %arg0, %arg1, %c0_i32, %c0_i32_0 : i32, i32, i32, i32
  }
}

module attributes {stable_mosaic.version = 11 : i64} {
  func.func @kernel(%arg0: i32, %arg1: i32, %arg2: memref<1x1x160x512xbf16, #tpu.memory_space<vmem>>, %arg3: memref<2x256x384xbf16, #tpu.memory_space<vmem>>, %arg4: memref<2x2x128x384xbf16, #tpu.memory_space<vmem>>, %arg5: memref<2x256x128xbf16, #tpu.memory_space<vmem>>, %arg6: memref<2x2x128x128xbf16, #tpu.memory_space<vmem>>, %arg7: memref<1x512xf32, #tpu.memory_space<vmem>>, %arg8: memref<512x128xbf16, #tpu.memory_space<vmem>>, %arg9: memref<1x128xf32, #tpu.memory_space<vmem>>, %arg10: memref<1x1x128x128xf32, #tpu.memory_space<vmem>>) attributes {dimension_semantics = [#tpu.dimension_semantics<parallel>, #tpu.dimension_semantics<parallel>], iteration_bounds = array<i64: 2, 2>, scalar_prefetch = 0 : i64, scratch_operands = 0 : i64, tpu.core_type = #tpu.core_type<tc>, window_params = [{transform_indices = @transform_0, window_bounds = array<i64: 1, 1, 160, 512>}, {pipeline_mode = #tpu.pipeline_mode<synchronous>, transform_indices = @transform_1, window_bounds = array<i64: 2, 256, 384>}, {pipeline_mode = #tpu.pipeline_mode<synchronous>, transform_indices = @transform_2, window_bounds = array<i64: 2, 2, 128, 384>}, {pipeline_mode = #tpu.pipeline_mode<synchronous>, transform_indices = @transform_3, window_bounds = array<i64: 2, 256, 128>}, {pipeline_mode = #tpu.pipeline_mode<synchronous>, transform_indices = @transform_4, window_bounds = array<i64: 2, 2, 128, 128>}, {pipeline_mode = #tpu.pipeline_mode<synchronous>, transform_indices = @transform_5, window_bounds = array<i64: 1, 512>}, {pipeline_mode = #tpu.pipeline_mode<synchronous>, transform_indices = @transform_6, window_bounds = array<i64: 512, 128>}, {pipeline_mode = #tpu.pipeline_mode<synchronous>, transform_indices = @transform_7, window_bounds = array<i64: 1, 128>}, {transform_indices = @transform_8, window_bounds = array<i64: 1, 1, 128, 128>}]} {
    %c0 = arith.constant 0 : index
    %c0_0 = arith.constant 0 : index
    %c0_1 = arith.constant 0 : index
    %c0_2 = arith.constant 0 : index
    %0 = vector.load %arg2[%c0, %c0_0, %c0_1, %c0_2] : memref<1x1x160x512xbf16, #tpu.memory_space<vmem>>, vector<1x1x160x512xbf16>
    %1 = vector.shape_cast %0 : vector<1x1x160x512xbf16> to vector<160x512xbf16>
    %2 = vector.shape_cast %1 : vector<160x512xbf16> to vector<10x16x512xbf16>
    %cst = arith.constant 0.000000e+00 : bf16
    %3 = vector.broadcast %cst : bf16 to vector<10x1x512xbf16>
    %4 = vector.extract_strided_slice %2 {offsets = [0, 0, 0], sizes = [10, 15, 512], strides = [1, 1, 1]} : vector<10x16x512xbf16> to vector<10x15x512xbf16>
    %5 = tpu.concatenate %3, %4 in 1 : vector<10x1x512xbf16>, vector<10x15x512xbf16> -> vector<10x16x512xbf16>
    %6 = vector.extract_strided_slice %2 {offsets = [0, 1, 0], sizes = [10, 15, 512], strides = [1, 1, 1]} : vector<10x16x512xbf16> to vector<10x15x512xbf16>
    %7 = tpu.concatenate %6, %3 in 1 : vector<10x15x512xbf16>, vector<10x1x512xbf16> -> vector<10x16x512xbf16>
    %cst_3 = arith.constant 0.000000e+00 : f32
    %8 = vector.broadcast %cst_3 : f32 to vector<128x128xf32>
    %cst_4 = arith.constant 0.000000e+00 : f32
    %9 = vector.broadcast %cst_4 : f32 to vector<128x128xf32>
    %cst_5 = arith.constant 0.000000e+00 : f32
    %10 = vector.broadcast %cst_5 : f32 to vector<128x128xf32>
    %cst_6 = arith.constant 0.000000e+00 : f32
    %11 = vector.broadcast %cst_6 : f32 to vector<128x128xf32>
    %12 = vector.extract_strided_slice %2 {offsets = [1, 0, 0], sizes = [8, 16, 256], strides = [1, 1, 1]} : vector<10x16x512xbf16> to vector<8x16x256xbf16>
    %13 = vector.shape_cast %12 : vector<8x16x256xbf16> to vector<128x256xbf16>
    %14 = vector.extract_strided_slice %5 {offsets = [1, 0, 128], sizes = [8, 16, 128], strides = [1, 1, 1]} : vector<10x16x512xbf16> to vector<8x16x128xbf16>
    %15 = vector.shape_cast %14 : vector<8x16x128xbf16> to vector<128x128xbf16>
    %16 = vector.extract_strided_slice %7 {offsets = [1, 0, 0], sizes = [8, 16, 128], strides = [1, 1, 1]} : vector<10x16x512xbf16> to vector<8x16x128xbf16>
    %17 = vector.shape_cast %16 : vector<8x16x128xbf16> to vector<128x128xbf16>
    %c0_7 = arith.constant 0 : index
    %c0_8 = arith.constant 0 : index
    %c0_9 = arith.constant 0 : index
    %18 = vector.load %arg3[%c0_7, %c0_8, %c0_9] : memref<2x256x384xbf16, #tpu.memory_space<vmem>>, vector<1x256x384xbf16>
    %19 = vector.shape_cast %18 : vector<1x256x384xbf16> to vector<256x384xbf16>
    %cst_10 = arith.constant dense<0.000000e+00> : vector<128x384xf32>
    %20 = tpu.matmul %13, %19, %cst_10 {dimension_numbers = #tpu.dot_dimension_numbers<[1], [0], [0], [1], [0, 0, 1, 1], [], []>} : vector<128x256xbf16>, vector<256x384xbf16>, vector<128x384xf32> -> vector<128x384xf32>
    %c0_11 = arith.constant 0 : index
    %c0_12 = arith.constant 0 : index
    %c0_13 = arith.constant 0 : index
    %c0_14 = arith.constant 0 : index
    %21 = vector.load %arg4[%c0_11, %c0_12, %c0_13, %c0_14] : memref<2x2x128x384xbf16, #tpu.memory_space<vmem>>, vector<1x1x128x384xbf16>
    %22 = vector.shape_cast %21 : vector<1x1x128x384xbf16> to vector<128x384xbf16>
    %cst_15 = arith.constant dense<0.000000e+00> : vector<128x384xf32>
    %23 = tpu.matmul %15, %22, %cst_15 {dimension_numbers = #tpu.dot_dimension_numbers<[1], [0], [0], [1], [0, 0, 1, 1], [], []>} : vector<128x128xbf16>, vector<128x384xbf16>, vector<128x384xf32> -> vector<128x384xf32>
    %24 = arith.addf %20, %23 : vector<128x384xf32>
    %c0_16 = arith.constant 0 : index
    %c1 = arith.constant 1 : index
    %c0_17 = arith.constant 0 : index
    %c0_18 = arith.constant 0 : index
    %25 = vector.load %arg4[%c0_16, %c1, %c0_17, %c0_18] : memref<2x2x128x384xbf16, #tpu.memory_space<vmem>>, vector<1x1x128x384xbf16>
    %26 = vector.shape_cast %25 : vector<1x1x128x384xbf16> to vector<128x384xbf16>
    %cst_19 = arith.constant dense<0.000000e+00> : vector<128x384xf32>
    %27 = tpu.matmul %17, %26, %cst_19 {dimension_numbers = #tpu.dot_dimension_numbers<[1], [0], [0], [1], [0, 0, 1, 1], [], []>} : vector<128x128xbf16>, vector<128x384xbf16>, vector<128x384xf32> -> vector<128x384xf32>
    %28 = arith.addf %24, %27 : vector<128x384xf32>
    %29 = vector.extract_strided_slice %28 {offsets = [0, 0], sizes = [128, 128], strides = [1, 1]} : vector<128x384xf32> to vector<128x128xf32>
    %30 = arith.addf %8, %29 : vector<128x128xf32>
    %31 = vector.extract_strided_slice %28 {offsets = [0, 128], sizes = [128, 128], strides = [1, 1]} : vector<128x384xf32> to vector<128x128xf32>
    %32 = arith.addf %9, %31 : vector<128x128xf32>
    %33 = vector.extract_strided_slice %28 {offsets = [0, 256], sizes = [128, 128], strides = [1, 1]} : vector<128x384xf32> to vector<128x128xf32>
    %34 = arith.addf %10, %33 : vector<128x128xf32>
    %35 = vector.extract_strided_slice %2 {offsets = [1, 0, 256], sizes = [8, 16, 256], strides = [1, 1, 1]} : vector<10x16x512xbf16> to vector<8x16x256xbf16>
    %36 = vector.shape_cast %35 : vector<8x16x256xbf16> to vector<128x256xbf16>
    %37 = vector.extract_strided_slice %5 {offsets = [1, 0, 384], sizes = [8, 16, 128], strides = [1, 1, 1]} : vector<10x16x512xbf16> to vector<8x16x128xbf16>
    %38 = vector.shape_cast %37 : vector<8x16x128xbf16> to vector<128x128xbf16>
    %39 = vector.extract_strided_slice %7 {offsets = [1, 0, 256], sizes = [8, 16, 128], strides = [1, 1, 1]} : vector<10x16x512xbf16> to vector<8x16x128xbf16>
    %40 = vector.shape_cast %39 : vector<8x16x128xbf16> to vector<128x128xbf16>
    %c1_20 = arith.constant 1 : index
    %c0_21 = arith.constant 0 : index
    %c0_22 = arith.constant 0 : index
    %41 = vector.load %arg3[%c1_20, %c0_21, %c0_22] : memref<2x256x384xbf16, #tpu.memory_space<vmem>>, vector<1x256x384xbf16>
    %42 = vector.shape_cast %41 : vector<1x256x384xbf16> to vector<256x384xbf16>
    %cst_23 = arith.constant dense<0.000000e+00> : vector<128x384xf32>
    %43 = tpu.matmul %36, %42, %cst_23 {dimension_numbers = #tpu.dot_dimension_numbers<[1], [0], [0], [1], [0, 0, 1, 1], [], []>} : vector<128x256xbf16>, vector<256x384xbf16>, vector<128x384xf32> -> vector<128x384xf32>
    %c1_24 = arith.constant 1 : index
    %c0_25 = arith.constant 0 : index
    %c0_26 = arith.constant 0 : index
    %c0_27 = arith.constant 0 : index
    %44 = vector.load %arg4[%c1_24, %c0_25, %c0_26, %c0_27] : memref<2x2x128x384xbf16, #tpu.memory_space<vmem>>, vector<1x1x128x384xbf16>
    %45 = vector.shape_cast %44 : vector<1x1x128x384xbf16> to vector<128x384xbf16>
    %cst_28 = arith.constant dense<0.000000e+00> : vector<128x384xf32>
    %46 = tpu.matmul %38, %45, %cst_28 {dimension_numbers = #tpu.dot_dimension_numbers<[1], [0], [0], [1], [0, 0, 1, 1], [], []>} : vector<128x128xbf16>, vector<128x384xbf16>, vector<128x384xf32> -> vector<128x384xf32>
    %47 = arith.addf %43, %46 : vector<128x384xf32>
    %c1_29 = arith.constant 1 : index
    %c1_30 = arith.constant 1 : index
    %c0_31 = arith.constant 0 : index
    %c0_32 = arith.constant 0 : index
    %48 = vector.load %arg4[%c1_29, %c1_30, %c0_31, %c0_32] : memref<2x2x128x384xbf16, #tpu.memory_space<vmem>>, vector<1x1x128x384xbf16>
    %49 = vector.shape_cast %48 : vector<1x1x128x384xbf16> to vector<128x384xbf16>
    %cst_33 = arith.constant dense<0.000000e+00> : vector<128x384xf32>
    %50 = tpu.matmul %40, %49, %cst_33 {dimension_numbers = #tpu.dot_dimension_numbers<[1], [0], [0], [1], [0, 0, 1, 1], [], []>} : vector<128x128xbf16>, vector<128x384xbf16>, vector<128x384xf32> -> vector<128x384xf32>
    %51 = arith.addf %47, %50 : vector<128x384xf32>
    %52 = vector.extract_strided_slice %51 {offsets = [0, 0], sizes = [128, 128], strides = [1, 1]} : vector<128x384xf32> to vector<128x128xf32>
    %53 = arith.addf %32, %52 : vector<128x128xf32>
    %54 = vector.extract_strided_slice %51 {offsets = [0, 128], sizes = [128, 128], strides = [1, 1]} : vector<128x384xf32> to vector<128x128xf32>
    %55 = arith.addf %34, %54 : vector<128x128xf32>
    %56 = vector.extract_strided_slice %51 {offsets = [0, 256], sizes = [128, 128], strides = [1, 1]} : vector<128x384xf32> to vector<128x128xf32>
    %57 = arith.addf %11, %56 : vector<128x128xf32>
    %58 = vector.extract_strided_slice %2 {offsets = [0, 0, 256], sizes = [8, 16, 256], strides = [1, 1, 1]} : vector<10x16x512xbf16> to vector<8x16x256xbf16>
    %59 = vector.shape_cast %58 : vector<8x16x256xbf16> to vector<128x256xbf16>
    %60 = vector.extract_strided_slice %5 {offsets = [0, 0, 384], sizes = [8, 16, 128], strides = [1, 1, 1]} : vector<10x16x512xbf16> to vector<8x16x128xbf16>
    %61 = vector.shape_cast %60 : vector<8x16x128xbf16> to vector<128x128xbf16>
    %62 = vector.extract_strided_slice %7 {offsets = [0, 0, 256], sizes = [8, 16, 128], strides = [1, 1, 1]} : vector<10x16x512xbf16> to vector<8x16x128xbf16>
    %63 = vector.shape_cast %62 : vector<8x16x128xbf16> to vector<128x128xbf16>
    %c0_34 = arith.constant 0 : index
    %c0_35 = arith.constant 0 : index
    %c0_36 = arith.constant 0 : index
    %64 = vector.load %arg5[%c0_34, %c0_35, %c0_36] : memref<2x256x128xbf16, #tpu.memory_space<vmem>>, vector<1x256x128xbf16>
    %65 = vector.shape_cast %64 : vector<1x256x128xbf16> to vector<256x128xbf16>
    %cst_37 = arith.constant dense<0.000000e+00> : vector<128x128xf32>
    %66 = tpu.matmul %59, %65, %cst_37 {dimension_numbers = #tpu.dot_dimension_numbers<[1], [0], [0], [1], [0, 0, 1, 1], [], []>} : vector<128x256xbf16>, vector<256x128xbf16>, vector<128x128xf32> -> vector<128x128xf32>
    %c0_38 = arith.constant 0 : index
    %c0_39 = arith.constant 0 : index
    %c0_40 = arith.constant 0 : index
    %c0_41 = arith.constant 0 : index
    %67 = vector.load %arg6[%c0_38, %c0_39, %c0_40, %c0_41] : memref<2x2x128x128xbf16, #tpu.memory_space<vmem>>, vector<1x1x128x128xbf16>
    %68 = vector.shape_cast %67 : vector<1x1x128x128xbf16> to vector<128x128xbf16>
    %cst_42 = arith.constant dense<0.000000e+00> : vector<128x128xf32>
    %69 = tpu.matmul %61, %68, %cst_42 {dimension_numbers = #tpu.dot_dimension_numbers<[1], [0], [0], [1], [0, 0, 1, 1], [], []>} : vector<128x128xbf16>, vector<128x128xbf16>, vector<128x128xf32> -> vector<128x128xf32>
    %70 = arith.addf %66, %69 : vector<128x128xf32>
    %c0_43 = arith.constant 0 : index
    %c1_44 = arith.constant 1 : index
    %c0_45 = arith.constant 0 : index
    %c0_46 = arith.constant 0 : index
    %71 = vector.load %arg6[%c0_43, %c1_44, %c0_45, %c0_46] : memref<2x2x128x128xbf16, #tpu.memory_space<vmem>>, vector<1x1x128x128xbf16>
    %72 = vector.shape_cast %71 : vector<1x1x128x128xbf16> to vector<128x128xbf16>
    %cst_47 = arith.constant dense<0.000000e+00> : vector<128x128xf32>
    %73 = tpu.matmul %63, %72, %cst_47 {dimension_numbers = #tpu.dot_dimension_numbers<[1], [0], [0], [1], [0, 0, 1, 1], [], []>} : vector<128x128xbf16>, vector<128x128xbf16>, vector<128x128xf32> -> vector<128x128xf32>
    %74 = arith.addf %70, %73 : vector<128x128xf32>
    %75 = arith.addf %30, %74 : vector<128x128xf32>
    %76 = vector.extract_strided_slice %2 {offsets = [2, 0, 0], sizes = [8, 16, 256], strides = [1, 1, 1]} : vector<10x16x512xbf16> to vector<8x16x256xbf16>
    %77 = vector.shape_cast %76 : vector<8x16x256xbf16> to vector<128x256xbf16>
    %78 = vector.extract_strided_slice %5 {offsets = [2, 0, 128], sizes = [8, 16, 128], strides = [1, 1, 1]} : vector<10x16x512xbf16> to vector<8x16x128xbf16>
    %79 = vector.shape_cast %78 : vector<8x16x128xbf16> to vector<128x128xbf16>
    %80 = vector.extract_strided_slice %7 {offsets = [2, 0, 0], sizes = [8, 16, 128], strides = [1, 1, 1]} : vector<10x16x512xbf16> to vector<8x16x128xbf16>
    %81 = vector.shape_cast %80 : vector<8x16x128xbf16> to vector<128x128xbf16>
    %c1_48 = arith.constant 1 : index
    %c0_49 = arith.constant 0 : index
    %c0_50 = arith.constant 0 : index
    %82 = vector.load %arg5[%c1_48, %c0_49, %c0_50] : memref<2x256x128xbf16, #tpu.memory_space<vmem>>, vector<1x256x128xbf16>
    %83 = vector.shape_cast %82 : vector<1x256x128xbf16> to vector<256x128xbf16>
    %cst_51 = arith.constant dense<0.000000e+00> : vector<128x128xf32>
    %84 = tpu.matmul %77, %83, %cst_51 {dimension_numbers = #tpu.dot_dimension_numbers<[1], [0], [0], [1], [0, 0, 1, 1], [], []>} : vector<128x256xbf16>, vector<256x128xbf16>, vector<128x128xf32> -> vector<128x128xf32>
    %c1_52 = arith.constant 1 : index
    %c0_53 = arith.constant 0 : index
    %c0_54 = arith.constant 0 : index
    %c0_55 = arith.constant 0 : index
    %85 = vector.load %arg6[%c1_52, %c0_53, %c0_54, %c0_55] : memref<2x2x128x128xbf16, #tpu.memory_space<vmem>>, vector<1x1x128x128xbf16>
    %86 = vector.shape_cast %85 : vector<1x1x128x128xbf16> to vector<128x128xbf16>
    %cst_56 = arith.constant dense<0.000000e+00> : vector<128x128xf32>
    %87 = tpu.matmul %79, %86, %cst_56 {dimension_numbers = #tpu.dot_dimension_numbers<[1], [0], [0], [1], [0, 0, 1, 1], [], []>} : vector<128x128xbf16>, vector<128x128xbf16>, vector<128x128xf32> -> vector<128x128xf32>
    %88 = arith.addf %84, %87 : vector<128x128xf32>
    %c1_57 = arith.constant 1 : index
    %c1_58 = arith.constant 1 : index
    %c0_59 = arith.constant 0 : index
    %c0_60 = arith.constant 0 : index
    %89 = vector.load %arg6[%c1_57, %c1_58, %c0_59, %c0_60] : memref<2x2x128x128xbf16, #tpu.memory_space<vmem>>, vector<1x1x128x128xbf16>
    %90 = vector.shape_cast %89 : vector<1x1x128x128xbf16> to vector<128x128xbf16>
    %cst_61 = arith.constant dense<0.000000e+00> : vector<128x128xf32>
    %91 = tpu.matmul %81, %90, %cst_61 {dimension_numbers = #tpu.dot_dimension_numbers<[1], [0], [0], [1], [0, 0, 1, 1], [], []>} : vector<128x128xbf16>, vector<128x128xbf16>, vector<128x128xf32> -> vector<128x128xf32>
    %92 = arith.addf %88, %91 : vector<128x128xf32>
    %93 = arith.addf %57, %92 : vector<128x128xf32>
    %94 = tpu.concatenate %75, %53, %55, %93 in 1 : vector<128x128xf32>, vector<128x128xf32>, vector<128x128xf32>, vector<128x128xf32> -> vector<128x512xf32>
    %c0_62 = arith.constant 0 : index
    %c0_63 = arith.constant 0 : index
    %95 = vector.load %arg7[%c0_62, %c0_63] : memref<1x512xf32, #tpu.memory_space<vmem>>, vector<1x512xf32>
    %96 = vector.broadcast %95 : vector<1x512xf32> to vector<128x512xf32>
    %97 = arith.addf %94, %96 : vector<128x512xf32>
    %98 = arith.negf %97 : vector<128x512xf32>
    %99 = math.exp %98 : vector<128x512xf32>
    %cst_64 = arith.constant 1.000000e+00 : f32
    %100 = vector.broadcast %cst_64 : f32 to vector<128x512xf32>
    %101 = arith.addf %100, %99 : vector<128x512xf32>
    %102 = arith.divf %100, %101 : vector<128x512xf32>
    %103 = arith.truncf %102 : vector<128x512xf32> to vector<128x512xbf16>
    %c0_65 = arith.constant 0 : index
    %c0_66 = arith.constant 0 : index
    %104 = vector.load %arg8[%c0_65, %c0_66] : memref<512x128xbf16, #tpu.memory_space<vmem>>, vector<512x128xbf16>
    %cst_67 = arith.constant dense<0.000000e+00> : vector<128x128xf32>
    %105 = tpu.matmul %103, %104, %cst_67 {dimension_numbers = #tpu.dot_dimension_numbers<[1], [0], [0], [1], [0, 0, 1, 1], [], []>} : vector<128x512xbf16>, vector<512x128xbf16>, vector<128x128xf32> -> vector<128x128xf32>
    %c0_68 = arith.constant 0 : index
    %c0_69 = arith.constant 0 : index
    %106 = vector.load %arg9[%c0_68, %c0_69] : memref<1x128xf32, #tpu.memory_space<vmem>>, vector<1x128xf32>
    %107 = vector.broadcast %106 : vector<1x128xf32> to vector<128x128xf32>
    %108 = arith.addf %105, %107 : vector<128x128xf32>
    %c0_70 = arith.constant 0 : index
    %c0_71 = arith.constant 0 : index
    %c0_72 = arith.constant 0 : index
    %c0_73 = arith.constant 0 : index
    %109 = vector.load %arg10[%c0_70, %c0_71, %c0_72, %c0_73] : memref<1x1x128x128xf32, #tpu.memory_space<vmem>>, vector<1x1x128x128xf32>
    %110 = vector.shape_cast %109 : vector<1x1x128x128xf32> to vector<128x128xf32>
    %111 = vector.shape_cast %108 : vector<128x128xf32> to vector<1x1x128x128xf32>
    tpu.vector_store %arg10[%c0_70, %c0_71, %c0_72, %c0_73], %111 {strides = array<i32>} : memref<1x1x128x128xf32, #tpu.memory_space<vmem>>, vector<1x1x128x128xf32>,
    return
  }
  func.func @transform_0(%arg0: i32, %arg1: i32) -> (i32, i32, i32, i32) {
    %c0_i32 = arith.constant 0 : i32
    %c0_i32_0 = arith.constant 0 : i32
    %c0_i32_1 = arith.constant 0 : i32
    return %arg0, %arg1, %c0_i32, %c0_i32_0 : i32, i32, i32, i32
  }
  func.func @transform_1(%arg0: i32, %arg1: i32) -> (i32, i32, i32) {
    %c0_i32 = arith.constant 0 : i32
    %c0_i32_0 = arith.constant 0 : i32
    %c0_i32_1 = arith.constant 0 : i32
    %c0_i32_2 = arith.constant 0 : i32
    return %c0_i32, %c0_i32_0, %c0_i32_1 : i32, i32, i32
  }
  func.func @transform_2(%arg0: i32, %arg1: i32) -> (i32, i32, i32, i32) {
    %c0_i32 = arith.constant 0 : i32
    %c0_i32_0 = arith.constant 0 : i32
    %c0_i32_1 = arith.constant 0 : i32
    %c0_i32_2 = arith.constant 0 : i32
    %c0_i32_3 = arith.constant 0 : i32
    return %c0_i32, %c0_i32_0, %c0_i32_1, %c0_i32_2 : i32, i32, i32, i32
  }
  func.func @transform_3(%arg0: i32, %arg1: i32) -> (i32, i32, i32) {
    %c0_i32 = arith.constant 0 : i32
    %c0_i32_0 = arith.constant 0 : i32
    %c0_i32_1 = arith.constant 0 : i32
    %c0_i32_2 = arith.constant 0 : i32
    return %c0_i32, %c0_i32_0, %c0_i32_1 : i32, i32, i32
  }
  func.func @transform_4(%arg0: i32, %arg1: i32) -> (i32, i32, i32, i32) {
    %c0_i32 = arith.constant 0 : i32
    %c0_i32_0 = arith.constant 0 : i32
    %c0_i32_1 = arith.constant 0 : i32
    %c0_i32_2 = arith.constant 0 : i32
    %c0_i32_3 = arith.constant 0 : i32
    return %c0_i32, %c0_i32_0, %c0_i32_1, %c0_i32_2 : i32, i32, i32, i32
  }
  func.func @transform_5(%arg0: i32, %arg1: i32) -> (i32, i32) {
    %c0_i32 = arith.constant 0 : i32
    %c0_i32_0 = arith.constant 0 : i32
    %c0_i32_1 = arith.constant 0 : i32
    return %c0_i32, %c0_i32_0 : i32, i32
  }
  func.func @transform_6(%arg0: i32, %arg1: i32) -> (i32, i32) {
    %c0_i32 = arith.constant 0 : i32
    %c0_i32_0 = arith.constant 0 : i32
    %c0_i32_1 = arith.constant 0 : i32
    return %c0_i32, %c0_i32_0 : i32, i32
  }
  func.func @transform_7(%arg0: i32, %arg1: i32) -> (i32, i32) {
    %c0_i32 = arith.constant 0 : i32
    %c0_i32_0 = arith.constant 0 : i32
    %c0_i32_1 = arith.constant 0 : i32
    return %c0_i32, %c0_i32_0 : i32, i32
  }
  func.func @transform_8(%arg0: i32, %arg1: i32) -> (i32, i32, i32, i32) {
    %c0_i32 = arith.constant 0 : i32
    %c0_i32_0 = arith.constant 0 : i32
    %c0_i32_1 = arith.constant 0 : i32
    return %arg0, %arg1, %c0_i32, %c0_i32_0 : i32, i32, i32, i32
  }
}

</mosaic_0001>

<bundles_post_ra>
// kernel: model_forward.2
= control target key start
LH: loop header
LB: loop body
LE: loop exit
PB: predicated region body
PF: predicated region fallthrough
CT: control target
= control target key end

     0   :  { %9 = vsyncpa [#allocation3], 0  ;;  %s2703_s0 = inlined_call_operand.vmem [shape: bf16[2,2,160,12], index: 0, kind: input, shape index: {}]   ;;  %s2704_s1 = inlined_call_operand.vmem [shape: f32[2,160,4], index: 1, kind: input, shape index: {}]   ;;  %s2705_s2 = inlined_call_operand.hbm [shape: bf16[12,512], index: 2, kind: input, shape index: {}]   ;;  %s2706_s3 = inlined_call_operand.hbm [shape: f32[1,512], index: 3, kind: input, shape index: {}]   ;;  %s2707_s4 = inlined_call_operand.vmem [shape: bf16[2,2,160,512], index: 4, kind: output, shape index: {}]  }
   0x1   :  { %10 = vsyncpa [#allocation5], 0  ;;  %s1998_s15 = smov 0   ;;  %s2000_s16 = smov 0  }
   0x2   :  { %s2002_s17 = smov 0   ;;  %s2004_s18 = smov 0  }
   0x3   :  { %s2006_s19 = smov 0  }
   0x4 LB: > { %s1635_s20 = sadd.s32 4294967295, %s1963_s19   ;;  %s25_s21 = sadd.s32 1, %s1955_s17  ;;  %s1963_s19 = sphi %s2006_s19, %s16_s19   ;;  %s1959_s18 = sphi %s2004_s18, %s2753_s18   ;;  %s1955_s17 = sphi %s2002_s17, %s2752_s17   ;;  %s1951_s16 = sphi %s2000_s16, %s2751_s16   ;;  %s1947_s15 = sphi %s1998_s15, %s2750_s15  }
   0x5   : > { %p26_p0 = scmp.ge.s32.totalorder %s25_s21, 2  ;;  %s28_s22 = sadd.s32 1, %s1959_s18 }
   0x6   : > { %p1637_p1 = scmp.ge.s32.totalorder %s1963_s19, 1  ;;  %p157_p2 = scmp.lt.s32.totalorder %s1963_s19, 5 }
   0x7   : > { %s2755_s21 = smov (%p26_p0, %s25_s21), 0  ;;  %s2757_s22 = smov (!%p26_p0, %s28_s22), %s1959_s18 }
   0x8   : > { %p2031_p3 = pnand %p1637_p1, %p157_p2  ;;  %p30_p4 = scmp.ge.s32.totalorder %s2757_s22, 2 }
   0x9   : > { %p2035_p5 = scmp.eq.s32.totalorder %s1635_s20, 0  ;;  %s1965_s25 = smov [#allocation2]  }
   0xa   : > { %s2711_s23 = scalar_select %p2031_p3, 1, 0 }
   0xb   : > { %s2712_s24 = scalar_select %p2035_p5, 1, 0 }
   0xc   : > { %p1778_p6 = pneg %p2031_p3  ;;  %s2759_s22 = smov (%p30_p4, %s2757_s22), 0 }
   0xd   : > { %s169_s26 = sshll.u32 %s1965_s25, 4  ;;  %s1861_s30 = scalar_lea.hbm %s2705_s2, 512  ;;  %s170_s26 = int_to_ptr.vmem [resolvable:$true] %s169_s26 }
   0xe   : > { %p2045_p7 = pnand %p2035_p5, %p1778_p6  ;;  %p1862_p8 = scmp.ne.s32.totalorder %s2705_s2, %s1861_s30 }
   0xf   : > { %p1868_p12 = scmp.lt.u32.totalorder %s1861_s30, %s2705_s2 }
  0x10   : > { %p1863_p9 = pneg %p2045_p7 }
  0x12   : > { %p1864_p10 = pnand %p1863_p9, %p1862_p8 }
  0x14   : > { %p1865_p11 = pneg %p1864_p10 }
  0x16   : > { %p1870_p13 = pnand %p1868_p12, %p1865_p11 }
  0x18   : > { %1873 = shalt.err (!%p1870_p13)
}
  0x19   : > { %s1874_s9 = scalar_lea.vmem %s170_s26, 512  ;;  %p1882_p4 = scmp.lt.s32.totalorder %s170_s26, %s170_s26 }
  0x1a   : > { %p1875_p0 = scmp.ne.s32.totalorder %s170_s26, %s1874_s9  ;;  %p1883_p6 = scmp.lt.s32.totalorder %s1874_s9, %s1874_s9 }
  0x1c   : > { %p1877_p1 = pnand %p1875_p0, %p1863_p9  ;;  %p1884_p5 = por %p1883_p6, %p1882_p4 }
  0x1e   : > { %p1878_p2 = pneg %p1877_p1 }
  0x20   : > { %p1885_p3 = pnand %p1884_p5, %p1878_p2 }
  0x22   : > { %1888 = shalt.err (!%p1885_p3)
}
  0x23   : > { %s1966_s10 = smov 256   ;;  %s1967_s11 = smov 16  }
  0x24   : > { %1781 = dma.hbm_to_vmem [thread:$0]  (!%p2045_p7), %s2705_s2, 512, %s170_s26, [#allocation3], %s1966_s10, %s1966_s10, %s1967_s11  }
  0x25   : > { %s1968_s14 = smov [#allocation4]   ;;  %s1889_s29 = scalar_lea.hbm %s2706_s3, 64 }
  0x26   : > { %s183_s20 = sshll.u32 %s1968_s14, 4  ;;  %p1890_p3 = scmp.ne.s32.totalorder %s2706_s3, %s1889_s29  ;;  %s184_s20 = int_to_ptr.vmem [resolvable:$true] %s183_s20 }
  0x27   : > { %p1896_p10 = scmp.lt.u32.totalorder %s1889_s29, %s2706_s3 }
  0x28   : > { %p1892_p5 = pnand %p1890_p3, %p1863_p9 }
  0x2a   : > { %p1893_p8 = pneg %p1892_p5 }
  0x2c   : > { %p1898_p11 = pnand %p1896_p10, %p1893_p8 }
  0x2e   : > { %1901 = shalt.err (!%p1898_p11)
}
  0x2f   : > { %s1902_s26 = scalar_lea.vmem %s184_s20, 64  ;;  %p1910_p1 = scmp.lt.s32.totalorder %s184_s20, %s184_s20 }
  0x30   : > { %p1903_p12 = scmp.ne.s32.totalorder %s184_s20, %s1902_s26  ;;  %p1911_p2 = scmp.lt.s32.totalorder %s1902_s26, %s1902_s26 }
  0x32   : > { %p1905_p13 = pnand %p1903_p12, %p1863_p9  ;;  %p1912_p4 = por %p1911_p2, %p1910_p1 }
  0x34   : > { %p1906_p0 = pneg %p1905_p13 }
  0x36   : > { %p1913_p6 = pnand %p1912_p4, %p1906_p0 }
  0x38   : > { %1916 = shalt.err (!%p1913_p6)
}
  0x39   : > { %1784 = dma.hbm_to_vmem [thread:$0]  (!%p2045_p7), %s2706_s3, 64, %s184_s20, [#allocation5]  }
  0x3a   : > { %p2714_p3 = scmp.ne.s32.totalorder %s2711_s23, 0 }
  0x3c   : > { %216 = sbr.rel (%p2714_p3) target bundleno = 384 (0x180), region = 36 }
  0x43   : > { %p2715_p5 = scmp.ne.s32.totalorder %s2712_s24, 0 }
  0x45   : > { %1938 = dma.done.wait (%p2715_p5), [#allocation3], 512  }
  0x46   : > { %1940 = vsyncadd (%p2715_p5), [#allocation3], 4294966784 }
  0x47   : > { %1942 = dma.done.wait (%p2715_p5), [#allocation5], 64  }
  0x48   : > { %1944 = vsyncadd (%p2715_p5), [#allocation5], 4294967232  ;;  %p261_p7 = scmp.lt.s32.totalorder %s1947_s15, 1  ;;  %p259_p9 = scmp.lt.s32.totalorder %s1951_s16, 1  ;;  %v1969_v0 = vmov 0   ;;  %vm426_vm0 = vcmask 1045504  }
  0x49   : > { %1838 = vset.pattern.permute.xlu1 %v1969_v0  ;;  %1837 = vset.pattern.permute.xlu0 %v1969_v0  ;;  %v1845_v3 = vld [vmem:[#allocation2 + $0x4] ss:$16 sps:$4 sm:$0x3f]   ;;  %v1847_v4 = vld [vmem:[#allocation2 + $0xc] ss:$16 sps:$4 sm:$0x3f]  }
  0x4a   : > { %s2761_s15 = smov (!%p261_p7, %s1947_s15), 1  ;;  %471 = vmatprep.mubr.bf16.mxu0 %v1969_v0  ;;  %604 = vmatprep.mubr.bf16.mxu1 %v1969_v0  ;;  %s2763_s16 = smov (!%p259_p9, %s1951_s16), 1  ;;  %v1849_v6 = vld [vmem:[#allocation2] ss:$16 sps:$4 sm:$0x3f]   ;;  %vm395_vm1 = vcmask 97280  }
  0x4b   : > { %s1767_s23 = smul.u32 160, %s2761_s15  ;;  %1661 = vmatprep.subr.msk.bf16.mxu0 %vm426_vm0, %v1845_v3  ;;  %v1850_v7 = vld [vmem:[#allocation2 + $0x8] ss:$16 sps:$4 sm:$0x3f]   ;;  %1672 = vmatprep.subr.msk.bf16.mxu1 %vm426_vm0, %v1847_v4  ;;  %v428_v9 = vsel %vm426_vm0, %v1849_v6, 0  ;;  %v1970_v32 = vmov 1  }
  0x4c   : > { %s1768_s24 = smul.u32 80, %s2761_s15  ;;  %v434_v10 = vsel %vm426_vm0, %v1850_v7, 0  ;;  %440 = vmatpush1.bf16.msra.mxu0 %v428_v9  ;;  %v1971_v38 = vmov 2   ;;  %v1972_v39 = vmov 3  }
  0x4d   : > { %s2118_s11 = scalar_lea.vmem %s2704_s1, %s1767_s23  ;;  %s1765_s12 = smul.u32 20, %s2761_s15  ;;  %573 = vmatpush1.bf16.msra.mxu1 %v434_v10 }
  0x4e   : > { %v2122_v1 = vld [vmem:[%s2118_s11 + $0x10] sm:$0xff]  ;;  %v2125_v2 = vld [vmem:[%s2118_s11] sm:$0xff]  ;;  %s1766_s13 = smul.u32 40, %s2763_s16  ;;  %v2131_v5 = vld [vmem:[%s2118_s11 + $0x18] sm:$0xff] }
  0x4f   : > { %817 = vperm.xlu1 %1838, %v2122_v1   ;;  %807 = vperm.xlu0 %1837, %v2125_v2   ;;  %v2136_v8 = vld [vmem:[%s2118_s11 + $0x8] sm:$0xff]  ;;  %s1769_s20 = smul.u32 160, %s2763_s16  ;;  %v2155_v13 = vld [vmem:[%s2118_s11 + $0x20] sm:$0xff]  ;;  %v2162_v14 = vld [vmem:[%s2118_s11 + $0x38] sm:$0xff] }
  0x50   : > { %s265_s14 = sadd.s32 %s1766_s13, %s1765_s12  ;;  %v2149_v11 = vld [vmem:[%s2118_s11 + $0x28] sm:$0xff]  ;;  %v2165_v15 = vld [vmem:[%s2118_s11 + $0x30] sm:$0xff]  ;;  %v2176_v18 = vld [vmem:[%s2118_s11 + $0x40] sm:$0xff] }
  0x51   : > { %s1644_s15 = sshll.u32 %s265_s14, 2  ;;  %s2151_s16 = sadd.s32 %s1769_s20, %s1768_s24  ;;  %v2173_v17 = vld [vmem:[%s2118_s11 + $0x48] sm:$0xff]  ;;  %v2183_v19 = vld [vmem:[%s2118_s11 + $0x58] sm:$0xff]  ;;  %v2186_v20 = vld [vmem:[%s2118_s11 + $0x50] sm:$0xff] }
  0x52   : > { %s2146_s29 = scalar_lea.vmem %s2703_s0, %s1644_s15  ;;  %v2194_v22 = vld [vmem:[%s2118_s11 + $0x68] sm:$0xff]  ;;  %v2197_v23 = vld [vmem:[%s2118_s11 + $0x60] sm:$0xff]  ;;  %v2204_v24 = vld [vmem:[%s2118_s11 + $0x78] sm:$0xff]  ;;  %s1646_s30 = sshll.u32 %s2151_s16, 2 }
  0x53   : > { %822 = vperm.xlu1 %1838, %v2131_v5   ;;  %812 = vperm.xlu0 %1837, %v2136_v8   ;;  %v1851_v12 = vld [vmem:[%s2146_s29] sm:$0xff]   ;;  %v1852_v16 = vld [vmem:[%s2146_s29 + $0x8] sm:$0xff]   ;;  %v1853_v21 = vld [vmem:[%s2146_s29 + $0x10] sm:$0xff]   ;;  %s2433_s7 = scalar_lea.vmem %s2707_s4, %s1646_s30 }
  0x54   : > { %1662 = vmatmul.mubr.msk.bf16.vlgmr.msra.gmra.mrb[0].mxu0 %vm395_vm1, %v1851_v12  ;;  %1673 = vmatmul.mubr.msk.bf16.vlgmr.msra.gmra.mrb[0].mxu1 %vm395_vm1, %v1851_v12  ;;  %v2207_v25 = vld [vmem:[%s2118_s11 + $0x70] sm:$0xff]  ;;  %v1854_v26 = vld [vmem:[%s2146_s29 + $0x18] sm:$0xff]   ;;  %v2215_v27 = vld [vmem:[%s2118_s11 + $0x88] sm:$0xff] }
  0x55   : > { %481 = vmatprep.mubr.bf16.mxu0 %v1969_v0  ;;  %614 = vmatprep.mubr.bf16.mxu1 %v1969_v0  ;;  %v2218_v28 = vld [vmem:[%s2118_s11 + $0x80] sm:$0xff]  ;;  %v2225_v29 = vld [vmem:[%s2118_s11 + $0x98] sm:$0xff]  ;;  %v2228_v30 = vld [vmem:[%s2118_s11 + $0x90] sm:$0xff] }
  0x56   : > { %v1855_v31 = vld [vmem:[%s2146_s29 + $0x20] sm:$0xff]   ;;  %v1856_v33 = vld [vmem:[%s2146_s29 + $0x28] sm:$0xff]   ;;  %v1857_v34 = vld [vmem:[%s2146_s29 + $0x30] sm:$0xff]  }
  0x57   : > { %832 = vperm.xlu1 %1838, %v2149_v11   ;;  %827 = vperm.xlu0 %1837, %v2155_v13   ;;  %v1858_v35 = vld [vmem:[%s2146_s29 + $0x38] sm:$0xff]   ;;  %v1859_v36 = vld [vmem:[%s2146_s29 + $0x40] sm:$0xff]   ;;  %v1860_v37 = vld [vmem:[%s2146_s29 + $0x48] sm:$0xff]  }
  0x5b   : > { %842 = vperm.xlu1 %1838, %v2162_v14   ;;  %837 = vperm.xlu0 %1837, %v2165_v15  }
  0x5c   : > { %1663 = vmatmul.mubr.msk.bf16.gmra.mrb[4].mxu0 %vm395_vm1, %v1852_v16  ;;  %1674 = vmatmul.mubr.msk.bf16.gmra.mrb[4].mxu1 %vm395_vm1, %v1852_v16 }
  0x5d   : > { %491 = vmatprep.mubr.bf16.mxu0 %v1969_v0  ;;  %624 = vmatprep.mubr.bf16.mxu1 %v1969_v0 }
  0x5f   : > { %852 = vperm.xlu1 %1838, %v2173_v17   ;;  %847 = vperm.xlu0 %1837, %v2176_v18  }
  0x63   : > { %862 = vperm.xlu1 %1838, %v2183_v19   ;;  %857 = vperm.xlu0 %1837, %v2186_v20  }
  0x64   : > { %1664 = vmatmul.mubr.msk.bf16.gmra.mrb[8].mxu0 %vm395_vm1, %v1853_v21  ;;  %1675 = vmatmul.mubr.msk.bf16.gmra.mrb[8].mxu1 %vm395_vm1, %v1853_v21  ;;  %v307_v21 = vld [vmem:[#allocation4] sm:$0xf] }
  0x65   : > { %501 = vmatprep.mubr.bf16.mxu0 %v1969_v0  ;;  %634 = vmatprep.mubr.bf16.mxu1 %v1969_v0 }
  0x67   : > { %872 = vperm.xlu1 %1838, %v2194_v22   ;;  %867 = vperm.xlu0 %1837, %v2197_v23  }
  0x6b   : > { %882 = vperm.xlu1 %1838, %v2204_v24   ;;  %877 = vperm.xlu0 %1837, %v2207_v25  }
  0x6c   : > { %1665 = vmatmul.mubr.msk.bf16.gmra.mrb[12].mxu0 %vm395_vm1, %v1854_v26  ;;  %1676 = vmatmul.mubr.msk.bf16.gmra.mrb[12].mxu1 %vm395_vm1, %v1854_v26 }
  0x6d   : > { %511 = vmatprep.mubr.bf16.mxu0 %v1969_v0  ;;  %644 = vmatprep.mubr.bf16.mxu1 %v1969_v0 }
  0x6f   : > { %892 = vperm.xlu1 %1838, %v2215_v27   ;;  %887 = vperm.xlu0 %1837, %v2218_v28  }
  0x73   : > { %902 = vperm.xlu1 %1838, %v2225_v29   ;;  %897 = vperm.xlu0 %1837, %v2228_v30  }
  0x74   : > { %1666 = vmatmul.mubr.msk.bf16.gmra.mrb[16].mxu0 %vm395_vm1, %v1855_v31  ;;  %1677 = vmatmul.mubr.msk.bf16.gmra.mrb[16].mxu1 %vm395_vm1, %v1855_v31 }
  0x75   : > { %521 = vmatprep.mubr.bf16.mxu0 %v1969_v0  ;;  %654 = vmatprep.mubr.bf16.mxu1 %v1969_v0 }
  0x77   : > { %1840 = vset.pattern.permute.xlu1 %v1970_v32  ;;  %1839 = vset.pattern.permute.xlu0 %v1970_v32 }
  0x78   : > { %930 = vperm.xlu1 %1840, %v2136_v8   ;;  %926 = vperm.xlu0 %1839, %v2125_v2  }
  0x7c   : > { %934 = vperm.xlu1 %1840, %v2122_v1   ;;  %938 = vperm.xlu0 %1839, %v2131_v5  }
  0x7d   : > { %1667 = vmatmul.mubr.msk.bf16.gmra.mrb[20].mxu0 %vm395_vm1, %v1856_v33  ;;  %1678 = vmatmul.mubr.msk.bf16.gmra.mrb[20].mxu1 %vm395_vm1, %v1856_v33 }
  0x7e   : > { %531 = vmatprep.mubr.bf16.mxu0 %v1969_v0  ;;  %664 = vmatprep.mubr.bf16.mxu1 %v1969_v0 }
  0x80   : > { %942 = vperm.xlu1 %1840, %v2155_v13   ;;  %946 = vperm.xlu0 %1839, %v2149_v11  }
  0x84   : > { %950 = vperm.xlu1 %1840, %v2165_v15   ;;  %954 = vperm.xlu0 %1839, %v2162_v14  }
  0x85   : > { %1668 = vmatmul.mubr.msk.bf16.gmra.mrb[24].mxu0 %vm395_vm1, %v1857_v34  ;;  %1679 = vmatmul.mubr.msk.bf16.gmra.mrb[24].mxu1 %vm395_vm1, %v1857_v34 }
  0x86   : > { %541 = vmatprep.mubr.bf16.mxu0 %v1969_v0  ;;  %674 = vmatprep.mubr.bf16.mxu1 %v1969_v0 }
  0x88   : > { %958 = vperm.xlu1 %1840, %v2176_v18   ;;  %962 = vperm.xlu0 %1839, %v2173_v17  }
  0x8c   : > { %966 = vperm.xlu1 %1840, %v2186_v20   ;;  %970 = vperm.xlu0 %1839, %v2183_v19  }
  0x8d   : > { %1669 = vmatmul.mubr.msk.bf16.gmra.mrb[28].mxu0 %vm395_vm1, %v1858_v35  ;;  %1680 = vmatmul.mubr.msk.bf16.gmra.mrb[28].mxu1 %vm395_vm1, %v1858_v35 }
  0x8e   : > { %551 = vmatprep.mubr.bf16.mxu0 %v1969_v0  ;;  %684 = vmatprep.mubr.bf16.mxu1 %v1969_v0 }
  0x90   : > { %974 = vperm.xlu1 %1840, %v2197_v23   ;;  %978 = vperm.xlu0 %1839, %v2194_v22  }
  0x94   : > { %982 = vperm.xlu1 %1840, %v2207_v25   ;;  %986 = vperm.xlu0 %1839, %v2204_v24  }
  0x95   : > { %1670 = vmatmul.mubr.msk.bf16.gmra.mrb[32].mxu0 %vm395_vm1, %v1859_v36  ;;  %1681 = vmatmul.mubr.msk.bf16.gmra.mrb[32].mxu1 %vm395_vm1, %v1859_v36 }
  0x96   : > { %561 = vmatprep.mubr.bf16.mxu0 %v1969_v0  ;;  %694 = vmatprep.mubr.bf16.mxu1 %v1969_v0 }
  0x98   : > { %990 = vperm.xlu1 %1840, %v2218_v28   ;;  %994 = vperm.xlu0 %1839, %v2215_v27  }
  0x9c   : > { %998 = vperm.xlu1 %1840, %v2228_v30   ;;  %1002 = vperm.xlu0 %1839, %v2225_v29  }
  0x9d   : > { %1671 = vmatmul.mubr.msk.bf16.gmra.mrb[36].mxu0 %vm395_vm1, %v1860_v37  ;;  %1682 = vmatmul.mubr.msk.bf16.gmra.mrb[36].mxu1 %vm395_vm1, %v1860_v37 }
  0xa0   : > { %1841 = vset.pattern.permute.xlu1 %v1971_v38  ;;  %1842 = vset.pattern.permute.xlu0 %v1971_v38 }
  0xa1   : > { %1026 = vperm.xlu1 %1841, %v2125_v2   ;;  %1030 = vperm.xlu0 %1842, %v2136_v8  }
  0xa5   : > { %1034 = vperm.xlu1 %1841, %v2122_v1   ;;  %1042 = vperm.xlu0 %1842, %v2155_v13  }
  0xa9   : > { %1038 = vperm.xlu1 %1841, %v2131_v5   ;;  %1050 = vperm.xlu0 %1842, %v2165_v15  }
  0xad   : > { %1046 = vperm.xlu1 %1841, %v2149_v11   ;;  %1058 = vperm.xlu0 %1842, %v2176_v18  }
  0xb1   : > { %1054 = vperm.xlu1 %1841, %v2162_v14   ;;  %1066 = vperm.xlu0 %1842, %v2186_v20  }
  0xb5   : > { %1062 = vperm.xlu1 %1841, %v2173_v17   ;;  %1074 = vperm.xlu0 %1842, %v2197_v23  }
  0xb9   : > { %1070 = vperm.xlu1 %1841, %v2183_v19   ;;  %1082 = vperm.xlu0 %1842, %v2207_v25  }
  0xbd   : > { %1078 = vperm.xlu1 %1841, %v2194_v22   ;;  %1090 = vperm.xlu0 %1842, %v2218_v28  }
  0xc1   : > { %1086 = vperm.xlu1 %1841, %v2204_v24   ;;  %1098 = vperm.xlu0 %1842, %v2228_v30  }
  0xc5   : > { %1094 = vperm.xlu1 %1841, %v2215_v27   ;;  %1843 = vset.pattern.permute.xlu0 %v1972_v39 }
  0xc6   : > { %1126 = vperm.xlu0 %1843, %v2125_v2  }
  0xc9   : > { %1102 = vperm.xlu1 %1841, %v2225_v29  }
  0xca   : > { %1138 = vperm.xlu0 %1843, %v2131_v5  }
  0xcd   : > { %1844 = vset.pattern.permute.xlu1 %v1972_v39 }
  0xce   : > { %v2304_v40 = vpop.permute.xlu1 %817  ;;  %v2306_v41 = vpop.permute.xlu0 %807  ;;  %1130 = vperm.xlu1 %1844, %v2136_v8   ;;  %1146 = vperm.xlu0 %1843, %v2149_v11  }
  0xd2   : > { %v2310_v42 = vpop.permute.xlu1 %822  ;;  %v2312_v43 = vpop.permute.xlu0 %812  ;;  %1134 = vperm.xlu1 %1844, %v2122_v1   ;;  %1154 = vperm.xlu0 %1843, %v2162_v14   ;;  %v309_v14 = vlaneseq }
  0xd6   : > { %v2316_v44 = vpop.permute.xlu1 %832  ;;  %1142 = vperm.xlu1 %1844, %v2155_v13   ;;  %1162 = vperm.xlu0 %1843, %v2173_v17   ;;  %v2320_v45 = vpop.permute.xlu0 %827  ;;  %v2398_v17 = vshrl.u32 %v309_v14, 7 }
  0xda   : > { %v2322_v46 = vpop.permute.xlu1 %842  ;;  %1150 = vperm.xlu1 %1844, %v2165_v15   ;;  %1170 = vperm.xlu0 %1843, %v2183_v19   ;;  %v2326_v47 = vpop.permute.xlu0 %837 }
  0xde   : > { %v2328_v48 = vpop.permute.xlu1 %852  ;;  %1158 = vperm.xlu1 %1844, %v2176_v18   ;;  %1178 = vperm.xlu0 %1843, %v2194_v22   ;;  %v2332_v49 = vpop.permute.xlu0 %847  ;;  %v315_v22 = vsub.s32 1, %v2398_v17 }
  0xe0   : > { %v2412_v26 = vrot.slane %v307_v21, %v315_v22 }
  0xe2   : > { %v2334_v50 = vpop.permute.xlu1 %862  ;;  %1166 = vperm.xlu1 %1844, %v2186_v20   ;;  %1186 = vperm.xlu0 %1843, %v2204_v24   ;;  %v2338_v51 = vpop.permute.xlu0 %857  ;;  %v311_v20 = vsub.s32 0, %v2398_v17 }
  0xe6   : > { %v2340_v52 = vpop.permute.xlu1 %872  ;;  %1174 = vperm.xlu1 %1844, %v2197_v23   ;;  %1194 = vperm.xlu0 %1843, %v2215_v27   ;;  %v2344_v53 = vpop.permute.xlu0 %867 }
  0xea   : > { %v2346_v54 = vpop.permute.xlu1 %882  ;;  %1182 = vperm.xlu1 %1844, %v2207_v25   ;;  %1202 = vperm.xlu0 %1843, %v2225_v29   ;;  %v2350_v55 = vpop.permute.xlu0 %877  ;;  %v2410_v25 = vrot.slane %v307_v21, %v311_v20 }
  0xeb   : > { %2716 = vst [vmem:[#allocation8_spill] sm:$0xff] %v2346_v54  ;;  %2717 = vst [vmem:[#allocation9_spill] sm:$0xff] %v2350_v55 }
  0xee   : > { %v2352_v56 = vpop.permute.xlu1 %892  ;;  %1190 = vperm.xlu1 %1844, %v2218_v28   ;;  %v2355_v57 = vpop.permute.xlu0 %887 }
  0xef   : > { %2718 = vst [vmem:[#allocation10_spill] sm:$0xff] %v2352_v56  ;;  %2719 = vst [vmem:[#allocation11_spill] sm:$0xff] %v2355_v57 }
  0xf2   : > { %v2357_v58 = vpop.permute.xlu1 %902  ;;  %1198 = vperm.xlu1 %1844, %v2228_v30   ;;  %v2360_v59 = vpop.permute.xlu0 %897 }
  0xf3   : > { %2720 = vst [vmem:[#allocation12_spill] sm:$0xff] %v2357_v58  ;;  %2721 = vst [vmem:[#allocation13_spill] sm:$0xff] %v2360_v59 }
  0xf7   : > { %v931_v60 = vpop.permute.xlu1 %930  ;;  %v927_v61 = vpop.permute.xlu0 %926 }
  0xfb   : > { %v2362_v62 = vpop.permute.xlu1 %934  ;;  %v2364_v63 = vpop.permute.xlu0 %938 }
  0xff   : > { %v2366_v0 = vpop.permute.xlu1 %942  ;;  %v2368_v1 = vpop.permute.xlu0 %946 }
 0x103   : > { %v2370_v2 = vpop.permute.xlu1 %950  ;;  %v2372_v3 = vpop.permute.xlu0 %954 }
 0x107   : > { %v2374_v4 = vpop.permute.xlu1 %958  ;;  %v2376_v5 = vpop.permute.xlu0 %962 }
 0x10b   : > { %v2378_v6 = vpop.permute.xlu1 %966  ;;  %v2380_v7 = vpop.permute.xlu0 %970 }
 0x10f   : > { %v2382_v8 = vpop.permute.xlu1 %974  ;;  %v2384_v9 = vpop.permute.xlu0 %978 }
 0x110   : > { %2722 = vst [vmem:[#allocation14_spill] sm:$0xff] %v2384_v9 }
 0x113   : > { %v2386_v10 = vpop.permute.xlu1 %982  ;;  %v2388_v11 = vpop.permute.xlu0 %986 }
 0x114   : > { %2723 = vst [vmem:[#allocation15_spill] sm:$0xff] %v2386_v10  ;;  %2724 = vst [vmem:[#allocation16_spill] sm:$0xff] %v2388_v11 }
 0x117   : > { %v2390_v12 = vpop.permute.xlu1 %990  ;;  %v2392_v13 = vpop.permute.xlu0 %994 }
 0x118   : > { %2725 = vst [vmem:[#allocation17_spill] sm:$0xff] %v2390_v12  ;;  %2726 = vst [vmem:[#allocation18_spill] sm:$0xff] %v2392_v13  ;;  %v323_v12 = vsub.s32 3, %v2398_v17 }
 0x11a   : > { %v2455_v54 = vrot.slane %v307_v21, %v323_v12 }
 0x11b   : > { %v2394_v15 = vpop.permute.xlu1 %998  ;;  %v2396_v16 = vpop.permute.xlu0 %1002 }
 0x11c   : > { %2727 = vst [vmem:[#allocation19_spill] sm:$0xff] %v2394_v15  ;;  %2728 = vst [vmem:[#allocation20_spill] sm:$0xff] %v2396_v16 }
 0x120   : > { %v2400_v18 = vpop.permute.xlu1 %1026  ;;  %v2402_v19 = vpop.permute.xlu0 %1030 }
 0x124   : > { %v2406_v23 = vpop.permute.xlu1 %1034  ;;  %v2408_v24 = vpop.permute.xlu0 %1042 }
 0x127   : > { %v473_v29 = vpop.f32.mrb[0].mxu0  ;;  %v606_v30 = vpop.f32.mrb[0].mxu1 }
 0x128   : > { %v2414_v27 = vpop.permute.xlu1 %1038  ;;  %v2416_v28 = vpop.permute.xlu0 %1050  ;;  %v474_v31 = vadd.f32 %v473_v29, %v2410_v25 }
 0x129   : > { %v475_v32 = vpop.f32.mrb[1].mxu0  ;;  %v608_v33 = vpop.f32.mrb[1].mxu1 }
 0x12a   : > { %v476_v34 = vadd.f32 %v475_v32, %v2412_v26  ;;  %v477_v35 = vpop.f32.mrb[2].mxu0  ;;  %v610_v36 = vpop.f32.mrb[2].mxu1  ;;  %v705_v37 = vmax.f32 %v474_v31, 0.0 }
 0x12b   : > { %v478_v38 = vadd.f32 %v477_v35, %v2410_v25  ;;  %v479_v39 = vpop.f32.mrb[3].mxu0  ;;  %v2421_v14 = vpop.f32.mrb[3].mxu1 }
 0x12c   : > { %v706_v20 = vmax.f32 %v476_v34, 0.0  ;;  %v480_v22 = vadd.f32 %v479_v39, %v2412_v26  ;;  %v2425_v16 = vpop.permute.xlu1 %1046  ;;  %v2427_v58 = vpop.permute.xlu0 %1058  ;;  %v905_v29 = vmul.f32 %v2306_v41, %v705_v37  ;;  %v319_v34 = vsub.s32 2, %v2398_v17 }
 0x12d   : > { %v709_v15 = vmax.f32 %v478_v38, 0.0 }
 0x12e   : > { %v1005_v32 = vmul.f32 %v927_v61, %v706_v20  ;;  %v710_v59 = vmax.f32 %v480_v22, 0.0 }
 0x12f   : > { %v906_v31 = vmul.f32 %v2312_v43, %v709_v15  ;;  %v483_v41 = vpop.f32.mrb[4].mxu0  ;;  %v616_v61 = vpop.f32.mrb[4].mxu1 }
 0x130   : > { %v1725_v35 = vpack.c.bf16 %v1005_v32, %v905_v29  ;;  %v1006_v39 = vmul.f32 %v931_v60, %v710_v59  ;;  %v2437_v13 = vpop.permute.xlu1 %1054  ;;  %v2439_v56 = vpop.permute.xlu0 %1066  ;;  %v484_v38 = vadd.f32 %v483_v41, %v2410_v25  ;;  %v2445_v32 = vrot.slane %v307_v21, %v319_v34 }
 0x131   : > { %v485_v20 = vpop.f32.mrb[5].mxu0  ;;  %v618_v22 = vpop.f32.mrb[5].mxu1 }
 0x132   : > { %1465 = vst [vmem:[%s2433_s7] sm:$0xff] %v1725_v35  ;;  %v1727_v37 = vpack.c.bf16 %v1006_v39, %v906_v31  ;;  %v486_v43 = vadd.f32 %v485_v20, %v2412_v26  ;;  %v487_v15 = vpop.f32.mrb[6].mxu0  ;;  %v620_v29 = vpop.f32.mrb[6].mxu1  ;;  %v713_v59 = vmax.f32 %v484_v38, 0.0  ;;  %v607_v38 = vadd.f32 %v606_v30, %v2445_v32 }
 0x133   : > { %v488_v60 = vadd.f32 %v487_v15, %v2410_v25  ;;  %v489_v57 = vpop.f32.mrb[7].mxu0  ;;  %v622_v11 = vpop.f32.mrb[7].mxu1  ;;  %v611_v12 = vadd.f32 %v610_v36, %v2445_v32  ;;  %v2468_v30 = vadd.f32 %v608_v33, %v2455_v54  ;;  %v617_v36 = vadd.f32 %v616_v61, %v2445_v32 }
 0x134   : > { %1467 = vst [vmem:[%s2433_s7 + $0x10] sm:$0xff] %v1727_v37  ;;  %v714_v35 = vmax.f32 %v486_v43, 0.0  ;;  %v490_v31 = vadd.f32 %v489_v57, %v2412_v26  ;;  %v2450_v39 = vpop.permute.xlu1 %1062  ;;  %v2452_v41 = vpop.permute.xlu0 %1074  ;;  %v907_v17 = vmul.f32 %v2304_v40, %v713_v59 }
 0x135   : > { %2729 = vst [vmem:[#allocation21_spill] sm:$0xff] %v2452_v41  ;;  %v717_v20 = vmax.f32 %v488_v60, 0.0 }
 0x136   : > { %v1007_v34 = vmul.f32 %v2362_v62, %v714_v35  ;;  %v718_v37 = vmax.f32 %v490_v31, 0.0  ;;  %v707_v31 = vmax.f32 %v607_v38, 0.0  ;;  %v711_v38 = vmax.f32 %v611_v12, 0.0 }
 0x137   : > { %v908_v15 = vmul.f32 %v2310_v42, %v717_v20  ;;  %v493_v43 = vpop.f32.mrb[8].mxu0  ;;  %v626_v10 = vpop.f32.mrb[8].mxu1 }
 0x138   : > { %v1729_v57 = vpack.c.bf16 %v1007_v34, %v907_v17  ;;  %v1008_v55 = vmul.f32 %v2364_v63, %v718_v37  ;;  %v2461_v9 = vpop.permute.xlu1 %1070  ;;  %v2463_v41 = vpop.permute.xlu0 %1082  ;;  %v494_v40 = vadd.f32 %v493_v43, %v2410_v25  ;;  %v2474_v17 = vadd.f32 %v2421_v14, %v2455_v54 }
 0x139   : > { %v495_v62 = vpop.f32.mrb[9].mxu0  ;;  %v628_v21 = vpop.f32.mrb[9].mxu1  ;;  %v621_v14 = vadd.f32 %v620_v29, %v2445_v32 }
 0x13a   : > { %1469 = vst [vmem:[%s2433_s7 + $0x20] sm:$0xff] %v1729_v57  ;;  %v1731_v42 = vpack.c.bf16 %v1008_v55, %v908_v15  ;;  %v721_v59 = vmax.f32 %v494_v40, 0.0  ;;  %v496_v60 = vadd.f32 %v495_v62, %v2412_v26  ;;  %v497_v63 = vpop.f32.mrb[10].mxu0  ;;  %v630_v35 = vpop.f32.mrb[10].mxu1  ;;  %v627_v40 = vadd.f32 %v626_v10, %v2445_v32 }
 0x13b   : > { %v498_v20 = vadd.f32 %v497_v63, %v2410_v25  ;;  %v499_v34 = vpop.f32.mrb[11].mxu0  ;;  %v632_v37 = vpop.f32.mrb[11].mxu1  ;;  %v708_v62 = vmax.f32 %v2468_v30, 0.0  ;;  %v2489_v63 = vadd.f32 %v618_v22, %v2455_v54 }
 0x13c   : > { %1471 = vst [vmem:[%s2433_s7 + $0x30] sm:$0xff] %v1731_v42  ;;  %v909_v33 = vmul.f32 %v2320_v45, %v721_v59  ;;  %v722_v55 = vmax.f32 %v496_v60, 0.0  ;;  %v500_v15 = vadd.f32 %v499_v34, %v2412_v26  ;;  %v2481_v43 = vpop.permute.xlu1 %1078  ;;  %v2483_v57 = vpop.permute.xlu0 %1090  ;;  %v2493_v59 = vmul.f32 %v2400_v18, %v707_v31 }
 0x13d   : > { %2730 = vst [vmem:[#allocation22_spill] sm:$0xff] %v2483_v57  ;;  %v725_v61 = vmax.f32 %v498_v20, 0.0  ;;  %v715_v34 = vmax.f32 %v617_v36, 0.0  ;;  %v623_v20 = vadd.f32 %v622_v11, %v2455_v54  ;;  %v2505_v31 = vmul.f32 %v2402_v19, %v711_v38 }
 0x13e   : > { %v1009_v45 = vmul.f32 %v2366_v0, %v722_v55  ;;  %v726_v42 = vmax.f32 %v500_v15, 0.0  ;;  %v719_v36 = vmax.f32 %v621_v14, 0.0  ;;  %v723_v55 = vmax.f32 %v627_v40, 0.0 }
 0x13f   : > { %v910_v12 = vmul.f32 %v2316_v44, %v725_v61  ;;  %v503_v29 = vpop.f32.mrb[12].mxu0  ;;  %v636_v10 = vpop.f32.mrb[12].mxu1  ;;  %v631_v44 = vadd.f32 %v630_v35, %v2445_v32  ;;  %v2515_v19 = vadd.f32 %v628_v21, %v2455_v54  ;;  %v720_v11 = vmax.f32 %v623_v20, 0.0 }
 0x140   : > { %v1733_v30 = vpack.c.bf16 %v1009_v45, %v909_v33  ;;  %v1010_v22 = vmul.f32 %v2368_v1, %v726_v42  ;;  %v2499_v57 = vpop.permute.xlu1 %1086  ;;  %v2501_v0 = vpop.permute.xlu0 %1098  ;;  %v504_v18 = vadd.f32 %v503_v29, %v2410_v25  ;;  %v2512_v29 = vmul.f32 %v2406_v23, %v715_v34 }
 0x141   : > { %2731 = vst [vmem:[#allocation23_spill] sm:$0xff] %v2501_v0  ;;  %v505_v15 = vpop.f32.mrb[13].mxu0  ;;  %v638_v61 = vpop.f32.mrb[13].mxu1  ;;  %v637_v35 = vadd.f32 %v636_v10, %v2445_v32  ;;  %v1108_v34 = vmul.f32 %v2414_v27, %v719_v36  ;;  %v2526_v21 = vmul.f32 %v2408_v24, %v723_v55  ;;  %v727_v10 = vmax.f32 %v631_v44, 0.0 }
 0x142   : > { %1473 = vst [vmem:[%s2433_s7 + $0x40] sm:$0xff] %v1733_v30  ;;  %v1735_v1 = vpack.c.bf16 %v1010_v22, %v910_v12  ;;  %v729_v33 = vmax.f32 %v504_v18, 0.0  ;;  %v506_v45 = vadd.f32 %v505_v15, %v2412_v26  ;;  %v507_v42 = vpop.f32.mrb[14].mxu0  ;;  %v640_v60 = vpop.f32.mrb[14].mxu1 }
 0x143   : > { %v508_v38 = vadd.f32 %v507_v42, %v2410_v25  ;;  %v509_v14 = vpop.f32.mrb[15].mxu0  ;;  %v642_v40 = vpop.f32.mrb[15].mxu1  ;;  %v633_v42 = vadd.f32 %v632_v37, %v2455_v54 }
 0x144   : > { %1475 = vst [vmem:[%s2433_s7 + $0x50] sm:$0xff] %v1735_v1  ;;  %v911_v12 = vmul.f32 %v2326_v47, %v729_v33  ;;  %v730_v30 = vmax.f32 %v506_v45, 0.0  ;;  %v510_v22 = vadd.f32 %v509_v14, %v2412_v26  ;;  %v2522_v18 = vpop.permute.xlu1 %1094  ;;  %v724_v47 = vmax.f32 %v2515_v19, 0.0 }
 0x145   : > { %v1127_v23 = vpop.permute.xlu0 %1126  ;;  %v733_v15 = vmax.f32 %v508_v38, 0.0  ;;  %v731_v33 = vmax.f32 %v637_v35, 0.0  ;;  %v2532_v45 = vadd.f32 %v638_v61, %v2455_v54  ;;  %v1110_v35 = vmul.f32 %v2425_v16, %v727_v10 }
 0x146   : > { %v1011_v20 = vmul.f32 %v2370_v2, %v730_v30  ;;  %v734_v1 = vmax.f32 %v510_v22, 0.0  ;;  %v1205_v0 = vmul.f32 %v1127_v23, %v708_v62  ;;  %v641_v61 = vadd.f32 %v640_v60, %v2445_v32 }
 0x147   : > { %v912_v14 = vmul.f32 %v2322_v46, %v733_v15  ;;  %v513_v27 = vpop.f32.mrb[16].mxu0  ;;  %v646_v24 = vpop.f32.mrb[16].mxu1  ;;  %v2547_v16 = vmul.f32 %v2416_v28, %v731_v33  ;;  %v643_v60 = vadd.f32 %v642_v40, %v2455_v54 }
 0x148   : > { %v1737_v36 = vpack.c.bf16 %v1011_v20, %v911_v12  ;;  %v1012_v55 = vmul.f32 %v2372_v3, %v734_v1  ;;  %v1726_v37 = vpack.c.bf16 %v1205_v0, %v2493_v59  ;;  %v2537_v2 = vpop.permute.xlu1 %1102  ;;  %v514_v62 = vadd.f32 %v513_v27, %v2410_v25  ;;  %v515_v30 = vpop.f32.mrb[17].mxu0 }
 0x149   : > { %v1139_v44 = vpop.permute.xlu0 %1138  ;;  %v647_v46 = vadd.f32 %v646_v24, %v2445_v32  ;;  %v648_v22 = vpop.f32.mrb[17].mxu1  ;;  %v728_v12 = vmax.f32 %v633_v42, 0.0  ;;  %v516_v0 = vadd.f32 %v515_v30, %v2412_v26  ;;  %v732_v42 = vmax.f32 %v2532_v45, 0.0 }
 0x14a   : > { %v1208_v38 = vmul.f32 %v1139_v44, %v720_v11  ;;  %1477 = vst [vmem:[%s2433_s7 + $0x60] sm:$0xff] %v1737_v36  ;;  %v1739_v3 = vpack.c.bf16 %v1012_v55, %v912_v14  ;;  %1466 = vst [vmem:[%s2433_s7 + $0x8] sm:$0xff] %v1726_v37  ;;  %v737_v59 = vmax.f32 %v514_v62, 0.0  ;;  %v517_v23 = vpop.f32.mrb[18].mxu0  ;;  %v650_v15 = vpop.f32.mrb[18].mxu1  ;;  %v735_v37 = vmax.f32 %v641_v61, 0.0 }
 0x14b   : > { %v518_v11 = vadd.f32 %v517_v23, %v2410_v25  ;;  %v519_v20 = vpop.f32.mrb[19].mxu0  ;;  %v652_v1 = vpop.f32.mrb[19].mxu1  ;;  %v738_v27 = vmax.f32 %v516_v0, 0.0  ;;  %v739_v28 = vmax.f32 %v647_v46, 0.0  ;;  %v2557_v40 = vadd.f32 %v648_v22, %v2455_v54 }
 0x14c   : > { %v1732_v10 = vpack.c.bf16 %v1208_v38, %v1108_v34  ;;  %1479 = vst [vmem:[%s2433_s7 + $0x70] sm:$0xff] %v1739_v3  ;;  %v913_v14 = vmul.f32 %v2332_v49, %v737_v59  ;;  %v520_v24 = vadd.f32 %v519_v20, %v2412_v26  ;;  %v2732_v44 = vmax.f32 %v2474_v17, 0.0 }
 0x14d   : > { %v1131_v36 = vpop.permute.xlu1 %1130  ;;  %v1147_v55 = vpop.permute.xlu0 %1146  ;;  %v741_v34 = vmax.f32 %v518_v11, 0.0  ;;  %v1013_v33 = vmul.f32 %v2374_v4, %v738_v27  ;;  %v736_v49 = vmax.f32 %v643_v60, 0.0  ;;  %v651_v59 = vadd.f32 %v650_v15, %v2445_v32 }
 0x14e   : > { %1472 = vst [vmem:[%s2433_s7 + $0x38] sm:$0xff] %v1732_v10  ;;  %v742_v62 = vmax.f32 %v520_v24, 0.0  ;;  %v1206_v38 = vmul.f32 %v1131_v36, %v2732_v44  ;;  %v1210_v30 = vmul.f32 %v1147_v55, %v728_v12  ;;  %v653_v61 = vadd.f32 %v652_v1, %v2455_v54 }
 0x14f   : > { %v914_v3 = vmul.f32 %v2328_v48, %v741_v34  ;;  %v1741_v22 = vpack.c.bf16 %v1013_v33, %v913_v14  ;;  %v1112_v60 = vmul.f32 %v2437_v13, %v735_v37  ;;  %v2733_v15 = vmax.f32 %v2489_v63, 0.0 }
 0x150   : > { %v523_v46 = vpop.f32.mrb[20].mxu0  ;;  %v656_v0 = vpop.f32.mrb[20].mxu1  ;;  %v1014_v23 = vmul.f32 %v2376_v5, %v742_v62  ;;  %v1728_v4 = vpack.c.bf16 %v1206_v38, %v2505_v31  ;;  %v1736_v17 = vpack.c.bf16 %v1210_v30, %v1110_v35  ;;  %v2572_v14 = vmul.f32 %v2427_v58, %v739_v28 }
 0x151   : > { %v1135_v10 = vpop.permute.xlu1 %1134  ;;  %v1155_v12 = vpop.permute.xlu0 %1154  ;;  %v524_v48 = vadd.f32 %v523_v46, %v2410_v25  ;;  %1481 = vst [vmem:[%s2433_s7 + $0x80] sm:$0xff] %v1741_v22  ;;  %v740_v5 = vmax.f32 %v2557_v40, 0.0  ;;  %v743_v63 = vmax.f32 %v651_v59, 0.0  ;;  %v744_v28 = vmax.f32 %v653_v61, 0.0 }
 0x152   : > { %v1207_v11 = vmul.f32 %v1135_v10, %v2733_v15  ;;  %v1212_v20 = vmul.f32 %v1155_v12, %v736_v49  ;;  %v525_v1 = vpop.f32.mrb[21].mxu0  ;;  %v658_v27 = vpop.f32.mrb[21].mxu1  ;;  %v1743_v31 = vpack.c.bf16 %v1014_v23, %v914_v3  ;;  %1468 = vst [vmem:[%s2433_s7 + $0x18] sm:$0xff] %v1728_v4  ;;  %1476 = vst [vmem:[%s2433_s7 + $0x58] sm:$0xff] %v1736_v17 }
 0x153   : > { %v526_v13 = vadd.f32 %v525_v1, %v2412_v26  ;;  %v527_v35 = vpop.f32.mrb[22].mxu0  ;;  %v660_v24 = vpop.f32.mrb[22].mxu1  ;;  %v745_v36 = vmax.f32 %v524_v48, 0.0  ;;  %v657_v3 = vadd.f32 %v656_v0, %v2445_v32  ;;  %v1114_v4 = vmul.f32 %v2450_v39, %v743_v63 }
 0x154   : > { %v1730_v55 = vpack.c.bf16 %v1207_v11, %v2512_v29  ;;  %v1740_v37 = vpack.c.bf16 %v1212_v20, %v1112_v60  ;;  %v529_v34 = vpop.f32.mrb[23].mxu0  ;;  %v662_v58 = vpop.f32.mrb[23].mxu1  ;;  %1483 = vst [vmem:[%s2433_s7 + $0x90] sm:$0xff] %v1743_v31  ;;  %v528_v62 = vadd.f32 %v527_v35, %v2410_v25  ;;  %v661_v44 = vadd.f32 %v660_v24, %v2445_v32 }
 0x155   : > { %v746_v33 = vmax.f32 %v526_v13, 0.0  ;;  %v1143_v38 = vpop.permute.xlu1 %1142  ;;  %v1163_v30 = vpop.permute.xlu0 %1162  ;;  %v915_v49 = vmul.f32 %v2338_v51, %v745_v36  ;;  %v530_v29 = vadd.f32 %v529_v34, %v2412_v26  ;;  %v663_v59 = vadd.f32 %v662_v58, %v2455_v54 }
 0x156   : > { %1470 = vst [vmem:[%s2433_s7 + $0x28] sm:$0xff] %v1730_v55  ;;  %1480 = vst [vmem:[%s2433_s7 + $0x78] sm:$0xff] %v1740_v37  ;;  %v749_v61 = vmax.f32 %v528_v62, 0.0  ;;  %v751_v22 = vmax.f32 %v661_v44, 0.0  ;;  %v1209_v23 = vmul.f32 %v1143_v38, %v724_v47  ;;  %v2594_v17 = vadd.f32 %v658_v27, %v2455_v54 }
 0x157   : > { %v1015_v46 = vmul.f32 %v2378_v6, %v746_v33  ;;  %v750_v51 = vmax.f32 %v530_v29, 0.0  ;;  %v1214_v0 = vmul.f32 %v1163_v30, %v744_v28  ;;  %v752_v6 = vmax.f32 %v663_v59, 0.0 }
 0x158   : > { %v533_v10 = vpop.f32.mrb[24].mxu0  ;;  %v666_v12 = vpop.f32.mrb[24].mxu1  ;;  %v916_v48 = vmul.f32 %v2334_v50, %v749_v61  ;;  %v1734_v15 = vpack.c.bf16 %v1209_v23, %v2526_v21  ;;  %v747_v47 = vmax.f32 %v657_v3, 0.0  ;;  %v1116_v13 = vmul.f32 %v2461_v9, %v751_v22 }
 0x159   : > { %v1745_v60 = vpack.c.bf16 %v1015_v46, %v915_v49  ;;  %v1151_v11 = vpop.permute.xlu1 %1150  ;;  %v1171_v19 = vpop.permute.xlu0 %1170  ;;  %v1016_v39 = vmul.f32 %v2380_v7, %v750_v51  ;;  %v1744_v20 = vpack.c.bf16 %v1214_v0, %v1114_v4  ;;  %v534_v1 = vadd.f32 %v533_v10, %v2410_v25 }
 0x15a   : > { %v535_v27 = vpop.f32.mrb[25].mxu0  ;;  %v668_v31 = vpop.f32.mrb[25].mxu1  ;;  %1474 = vst [vmem:[%s2433_s7 + $0x48] sm:$0xff] %v1734_v15  ;;  %v1211_v50 = vmul.f32 %v1151_v11, %v732_v42  ;;  %v1216_v35 = vmul.f32 %v1171_v19, %v752_v6  ;;  %v667_v55 = vadd.f32 %v666_v12, %v2445_v32  ;;  %v748_v45 = vmax.f32 %v2594_v17, 0.0 }
 0x15b   : > { %1485 = vst [vmem:[%s2433_s7 + $0xa0] sm:$0xff] %v1745_v60  ;;  %v536_v21 = vadd.f32 %v535_v27, %v2412_v26  ;;  %v537_v24 = vpop.f32.mrb[26].mxu0  ;;  %v670_v63 = vpop.f32.mrb[26].mxu1  ;;  %v1747_v36 = vpack.c.bf16 %v1016_v39, %v916_v48  ;;  %1484 = vst [vmem:[%s2433_s7 + $0x98] sm:$0xff] %v1744_v20  ;;  %v753_v7 = vmax.f32 %v534_v1, 0.0  ;;  %v1115_v62 = vmul.f32 %v2439_v56, %v747_v47 }
 0x15c   : > { %v538_v37 = vadd.f32 %v537_v24, %v2410_v25  ;;  %v539_v9 = vpop.f32.mrb[27].mxu0  ;;  %v672_v34 = vpop.f32.mrb[27].mxu1  ;;  %v1738_v42 = vpack.c.bf16 %v1211_v50, %v2547_v16  ;;  %v1748_v58 = vpack.c.bf16 %v1216_v35, %v1116_v13  ;;  %v671_v30 = vadd.f32 %v670_v63, %v2445_v32  ;;  %v2735_v63 = vld [vmem:[#allocation21_spill] sm:$0xff] }
 0x15d   : > { %v754_v28 = vmax.f32 %v536_v21, 0.0  ;;  %v1159_v33 = vpop.permute.xlu1 %1158  ;;  %1487 = vst [vmem:[%s2433_s7 + $0xb0] sm:$0xff] %v1747_v36  ;;  %v917_v44 = vmul.f32 %v2344_v53, %v753_v7  ;;  %v540_v3 = vadd.f32 %v539_v9, %v2412_v26  ;;  %v673_v29 = vadd.f32 %v672_v34, %v2455_v54  ;;  %v1179_v59 = vpop.permute.xlu0 %1178  ;;  %v2736_v7 = vld [vmem:[#allocation9_spill] sm:$0xff]  ;;  %v2737_v34 = vld [vmem:[#allocation15_spill] sm:$0xff] }
 0x15e   : > { %v757_v38 = vmax.f32 %v538_v37, 0.0  ;;  %1478 = vst [vmem:[%s2433_s7 + $0x68] sm:$0xff] %v1738_v42  ;;  %1488 = vst [vmem:[%s2433_s7 + $0xb8] sm:$0xff] %v1748_v58  ;;  %v1213_v16 = vmul.f32 %v1159_v33, %v740_v5  ;;  %v755_v46 = vmax.f32 %v667_v55, 0.0  ;;  %v669_v56 = vadd.f32 %v668_v31, %v2455_v54 }
 0x15f   : > { %v1017_v49 = vmul.f32 %v2382_v8, %v754_v28  ;;  %v759_v61 = vmax.f32 %v671_v30, 0.0  ;;  %v758_v8 = vmax.f32 %v540_v3, 0.0  ;;  %v760_v17 = vmax.f32 %v673_v29, 0.0 }
 0x160   : > { %v918_v53 = vmul.f32 %v2340_v52, %v757_v38  ;;  %v543_v22 = vpop.f32.mrb[28].mxu0  ;;  %v676_v23 = vpop.f32.mrb[28].mxu1  ;;  %v1742_v51 = vpack.c.bf16 %v1213_v16, %v2572_v14  ;;  %v2734_v52 = vld [vmem:[#allocation14_spill] sm:$0xff]  ;;  %v756_v13 = vmax.f32 %v669_v56, 0.0  ;;  %v1117_v36 = vmul.f32 %v2735_v63, %v755_v46 }
 0x161   : > { %v1749_v4 = vpack.c.bf16 %v1017_v49, %v917_v44  ;;  %v1167_v0 = vpop.permute.xlu1 %1166  ;;  %v1118_v40 = vmul.f32 %v2481_v43, %v759_v61  ;;  %v544_v5 = vadd.f32 %v543_v22, %v2410_v25  ;;  %v677_v10 = vadd.f32 %v676_v23, %v2445_v32  ;;  %v545_v60 = vpop.f32.mrb[29].mxu0  ;;  %v2738_v44 = vld [vmem:[#allocation8_spill] sm:$0xff] }
 0x162   : > { %v1215_v12 = vmul.f32 %v1167_v0, %v748_v45  ;;  %v678_v48 = vpop.f32.mrb[29].mxu1  ;;  %v1018_v6 = vmul.f32 %v2734_v52, %v758_v8  ;;  %1482 = vst [vmem:[%s2433_s7 + $0x88] sm:$0xff] %v1742_v51  ;;  %v1218_v15 = vmul.f32 %v1179_v59, %v760_v17  ;;  %v546_v11 = vadd.f32 %v545_v60, %v2412_v26  ;;  %v547_v14 = vpop.f32.mrb[30].mxu0  ;;  %v2739_v17 = vld [vmem:[#allocation16_spill] sm:$0xff] }
 0x163   : > { %1489 = vst [vmem:[%s2433_s7 + $0xc0] sm:$0xff] %v1749_v4  ;;  %v679_v19 = vadd.f32 %v678_v48, %v2455_v54  ;;  %v680_v47 = vpop.f32.mrb[30].mxu1  ;;  %v761_v43 = vmax.f32 %v544_v5, 0.0  ;;  %v763_v39 = vmax.f32 %v677_v10, 0.0  ;;  %v548_v1 = vadd.f32 %v547_v14, %v2410_v25  ;;  %v549_v27 = vpop.f32.mrb[31].mxu0 }
 0x164   : > { %v1746_v20 = vpack.c.bf16 %v1215_v12, %v1115_v62  ;;  %v682_v31 = vpop.f32.mrb[31].mxu1  ;;  %v1751_v50 = vpack.c.bf16 %v1018_v6, %v918_v53  ;;  %v1752_v35 = vpack.c.bf16 %v1218_v15, %v1118_v40  ;;  %v762_v21 = vmax.f32 %v546_v11, 0.0  ;;  %v1187_v29 = vpop.permute.xlu0 %1186 }
 0x165   : > { %v1175_v24 = vpop.permute.xlu1 %1174  ;;  %v919_v55 = vmul.f32 %v2736_v7, %v761_v43  ;;  %v765_v37 = vmax.f32 %v548_v1, 0.0  ;;  %v681_v9 = vadd.f32 %v680_v47, %v2445_v32  ;;  %v550_v42 = vadd.f32 %v549_v27, %v2412_v26  ;;  %v2741_v1 = vld [vmem:[#allocation22_spill] sm:$0xff] }
 0x166   : > { %1486 = vst [vmem:[%s2433_s7 + $0xa8] sm:$0xff] %v1746_v20  ;;  %1491 = vst [vmem:[%s2433_s7 + $0xd0] sm:$0xff] %v1751_v50  ;;  %v1019_v45 = vmul.f32 %v2737_v34, %v762_v21  ;;  %v683_v58 = vadd.f32 %v682_v31, %v2455_v54  ;;  %v1217_v28 = vmul.f32 %v1175_v24, %v756_v13  ;;  %v764_v62 = vmax.f32 %v679_v19, 0.0  ;;  %v2742_v50 = vld [vmem:[#allocation17_spill] sm:$0xff] }
 0x167   : > { %1492 = vst [vmem:[%s2433_s7 + $0xd8] sm:$0xff] %v1752_v35  ;;  %v1119_v33 = vmul.f32 %v2463_v41, %v763_v39  ;;  %v920_v38 = vmul.f32 %v2738_v44, %v765_v37  ;;  %v767_v30 = vmax.f32 %v681_v9, 0.0  ;;  %v766_v59 = vmax.f32 %v550_v42, 0.0  ;;  %v2740_v39 = vld [vmem:[#allocation11_spill] sm:$0xff] }
 0x168   : > { %v553_v49 = vpop.f32.mrb[32].mxu0  ;;  %v686_v3 = vpop.f32.mrb[32].mxu1  ;;  %v1753_v16 = vpack.c.bf16 %v1019_v45, %v919_v55  ;;  %v768_v46 = vmax.f32 %v683_v58, 0.0  ;;  %v1750_v56 = vpack.c.bf16 %v1217_v28, %v1117_v36  ;;  %v2743_v36 = vld [vmem:[#allocation10_spill] sm:$0xff] }
 0x169   : > { %v1183_v53 = vpop.permute.xlu1 %1182  ;;  %v1120_v61 = vmul.f32 %v2499_v57, %v767_v30  ;;  %v554_v22 = vadd.f32 %v553_v49, %v2410_v25  ;;  %v687_v41 = vadd.f32 %v686_v3, %v2445_v32  ;;  %v555_v4 = vpop.f32.mrb[33].mxu0  ;;  %v1020_v51 = vmul.f32 %v2739_v17, %v766_v59 }
 0x16a   : > { %v1219_v23 = vmul.f32 %v1183_v53, %v764_v62  ;;  %v688_v8 = vpop.f32.mrb[33].mxu1  ;;  %1493 = vst [vmem:[%s2433_s7 + $0xe0] sm:$0xff] %v1753_v16  ;;  %v1220_v0 = vmul.f32 %v1187_v29, %v768_v46  ;;  %1490 = vst [vmem:[%s2433_s7 + $0xc8] sm:$0xff] %v1750_v56  ;;  %v556_v40 = vadd.f32 %v555_v4, %v2412_v26  ;;  %v557_v10 = vpop.f32.mrb[34].mxu0  ;;  %v2744_v29 = vld [vmem:[#allocation18_spill] sm:$0xff] }
 0x16b   : > { %v689_v5 = vadd.f32 %v688_v8, %v2455_v54  ;;  %v690_v12 = vpop.f32.mrb[34].mxu1  ;;  %v769_v57 = vmax.f32 %v554_v22, 0.0  ;;  %v771_v60 = vmax.f32 %v687_v41, 0.0  ;;  %v558_v52 = vadd.f32 %v557_v10, %v2410_v25  ;;  %v559_v6 = vpop.f32.mrb[35].mxu0  ;;  %v2746_v10 = vld [vmem:[#allocation23_spill] sm:$0xff] }
 0x16c   : > { %v1754_v48 = vpack.c.bf16 %v1219_v23, %v1119_v33  ;;  %v692_v15 = vpop.f32.mrb[35].mxu1  ;;  %v1755_v11 = vpack.c.bf16 %v1020_v51, %v920_v38  ;;  %v1756_v19 = vpack.c.bf16 %v1220_v0, %v1120_v61  ;;  %v770_v14 = vmax.f32 %v556_v40, 0.0  ;;  %v1195_v34 = vpop.permute.xlu0 %1194  ;;  %v2745_v40 = vld [vmem:[#allocation13_spill] sm:$0xff] }
 0x16d   : > { %v772_v47 = vmax.f32 %v689_v5, 0.0  ;;  %v1191_v43 = vpop.permute.xlu1 %1190  ;;  %v921_v20 = vmul.f32 %v2740_v39, %v769_v57  ;;  %v1121_v27 = vmul.f32 %v2741_v1, %v771_v60  ;;  %v773_v31 = vmax.f32 %v558_v52, 0.0  ;;  %v2747_v57 = vld [vmem:[#allocation19_spill] sm:$0xff]  ;;  %v2749_v1 = vld [vmem:[#allocation20_spill] sm:$0xff] }
 0x16e   : > { %1494 = vst [vmem:[%s2433_s7 + $0xe8] sm:$0xff] %v1754_v48  ;;  %v691_v13 = vadd.f32 %v690_v12, %v2445_v32  ;;  %1495 = vst [vmem:[%s2433_s7 + $0xf0] sm:$0xff] %v1755_v11  ;;  %v1021_v35 = vmul.f32 %v2742_v50, %v770_v14  ;;  %v560_v21 = vadd.f32 %v559_v6, %v2412_v26  ;;  %v2748_v11 = vld [vmem:[#allocation12_spill] sm:$0xff] }
 0x16f   : > { %1496 = vst [vmem:[%s2433_s7 + $0xf8] sm:$0xff] %v1756_v19  ;;  %v693_v24 = vadd.f32 %v692_v15, %v2455_v54  ;;  %v1221_v63 = vmul.f32 %v1191_v43, %v772_v47  ;;  %v922_v7 = vmul.f32 %v2743_v36, %v773_v31 }
 0x170   : > { %v775_v55 = vmax.f32 %v691_v13, 0.0  ;;  %v563_v37 = vpop.f32.mrb[36].mxu0  ;;  %v696_v9 = vpop.f32.mrb[36].mxu1  ;;  %v1757_v45 = vpack.c.bf16 %v1021_v35, %v921_v20  ;;  %v774_v42 = vmax.f32 %v560_v21, 0.0 }
 0x171   : > { %v776_v58 = vmax.f32 %v693_v24, 0.0  ;;  %v1758_v28 = vpack.c.bf16 %v1221_v63, %v1121_v27  ;;  %v565_v33 = vpop.f32.mrb[37].mxu0  ;;  %v564_v44 = vadd.f32 %v563_v37, %v2410_v25  ;;  %v697_v38 = vadd.f32 %v696_v9, %v2445_v32  ;;  %v698_v49 = vpop.f32.mrb[37].mxu1 }
 0x172   : > { %v1122_v62 = vmul.f32 %v2522_v18, %v775_v55  ;;  %v566_v30 = vadd.f32 %v565_v33, %v2412_v26  ;;  %v567_v3 = vpop.f32.mrb[38].mxu0  ;;  %1497 = vst [vmem:[%s2433_s7 + $0x100] sm:$0xff] %v1757_v45  ;;  %v1022_v16 = vmul.f32 %v2744_v29, %v774_v42  ;;  %v699_v46 = vadd.f32 %v698_v49, %v2455_v54  ;;  %v700_v53 = vpop.f32.mrb[38].mxu1 }
 0x173   : > { %v1222_v59 = vmul.f32 %v1195_v34, %v776_v58  ;;  %1498 = vst [vmem:[%s2433_s7 + $0x108] sm:$0xff] %v1758_v28  ;;  %v568_v56 = vadd.f32 %v567_v3, %v2410_v25  ;;  %v569_v18 = vpop.f32.mrb[39].mxu0  ;;  %v777_v61 = vmax.f32 %v564_v44, 0.0  ;;  %v779_v22 = vmax.f32 %v697_v38, 0.0  ;;  %v702_v4 = vpop.f32.mrb[39].mxu1 }
 0x174   : > { %v778_v41 = vmax.f32 %v566_v30, 0.0  ;;  %v701_v23 = vadd.f32 %v700_v53, %v2445_v32  ;;  %v1759_v8 = vpack.c.bf16 %v1022_v16, %v922_v7  ;;  %v780_v51 = vmax.f32 %v699_v46, 0.0  ;;  %v1199_v25 = vpop.permute.xlu1 %1198  ;;  %v1203_v20 = vpop.permute.xlu0 %1202 }
 0x175   : > { %v1760_v17 = vpack.c.bf16 %v1222_v59, %v1122_v62  ;;  %v781_v0 = vmax.f32 %v568_v56, 0.0  ;;  %v923_v5 = vmul.f32 %v2745_v40, %v777_v61  ;;  %v1123_v12 = vmul.f32 %v2746_v10, %v779_v22 }
 0x176   : > { %v1023_v60 = vmul.f32 %v2747_v57, %v778_v41  ;;  %v783_v48 = vmax.f32 %v701_v23, 0.0  ;;  %1499 = vst [vmem:[%s2433_s7 + $0x110] sm:$0xff] %v1759_v8  ;;  %v1223_v52 = vmul.f32 %v1199_v25, %v780_v51  ;;  %v570_v32 = vadd.f32 %v569_v18, %v2412_v26 }
 0x177   : > { %1500 = vst [vmem:[%s2433_s7 + $0x118] sm:$0xff] %v1760_v17  ;;  %v703_v6 = vadd.f32 %v702_v4, %v2455_v54  ;;  %v924_v19 = vmul.f32 %v2748_v11, %v781_v0 }
 0x178   : > { %v1761_v15 = vpack.c.bf16 %v1023_v60, %v923_v5  ;;  %v1762_v14 = vpack.c.bf16 %v1223_v52, %v1123_v12  ;;  %v1124_v47 = vmul.f32 %v2537_v2, %v783_v48  ;;  %v782_v43 = vmax.f32 %v570_v32, 0.0 }
 0x179   : > { %v784_v39 = vmax.f32 %v703_v6, 0.0 }
 0x17a   : > { %1501 = vst [vmem:[%s2433_s7 + $0x120] sm:$0xff] %v1761_v15  ;;  %1502 = vst [vmem:[%s2433_s7 + $0x128] sm:$0xff] %v1762_v14  ;;  %v1024_v27 = vmul.f32 %v2749_v1, %v782_v43 }
 0x17b   : > { %v1224_v31 = vmul.f32 %v1203_v20, %v784_v39 }
 0x17c   : > { %v1763_v13 = vpack.c.bf16 %v1024_v27, %v924_v19 }
 0x17d   : > { %v1764_v50 = vpack.c.bf16 %v1224_v31, %v1124_v47 }
 0x17e   : > { %1503 = vst [vmem:[%s2433_s7 + $0x130] sm:$0xff] %v1763_v13 }
 0x17f   : > { %1504 = vst [vmem:[%s2433_s7 + $0x138] sm:$0xff] %v1764_v50 }
 0x180 PF: > { %s16_s19 = sadd.s32 1, %s1963_s19   ;;  %s2750_s15 = smov %s1955_s17 }
 0x181   : > { %p13_p8 = scmp.ge.s32.totalorder %s16_s19, 6   ;;  %s2751_s16 = smov %s1959_s18 }
 0x182   : > { %s2752_s17 = smov %s2755_s21  ;;  %s2753_s18 = smov %s2759_s22 }
 0x183   :  { %15 = sbr.rel (!%p13_p8) target bundleno = 4 (0x4), region = 78 }
 0x18a   :  { %1534 = vsyncpa [#allocation3], 1 }
 0x18b   :  { %1536 = vsyncpa [#allocation3 + $0x1], 1 }
 0x18c   :  { %1537 = vsyncpa [#allocation5], 1 }

// kernel: model_forward.3
= control target key start
LH: loop header
LB: loop body
LE: loop exit
PB: predicated region body
PF: predicated region fallthrough
CT: control target
= control target key end

     0   :  { %s9990_s0 = inlined_call_operand.vmem [shape: bf16[2,2,160,512], index: 0, kind: input, shape index: {}]   ;;  %s9991_s1 = inlined_call_operand.hbm [shape: bf16[2,256,384], index: 1, kind: input, shape index: {}]   ;;  %s9992_s2 = inlined_call_operand.hbm [shape: bf16[2,2,128,384], index: 2, kind: input, shape index: {}]   ;;  %s9993_s3 = inlined_call_operand.hbm [shape: bf16[2,256,128], index: 3, kind: input, shape index: {}]   ;;  %s9994_s4 = inlined_call_operand.hbm [shape: bf16[2,2,128,128], index: 4, kind: input, shape index: {}]   ;;  %s9995_s5 = inlined_call_operand.hbm [shape: f32[1,512], index: 5, kind: input, shape index: {}]   ;;  %s9996_s6 = inlined_call_operand.hbm [shape: bf16[512,128], index: 6, kind: input, shape index: {}]   ;;  %s9997_s7 = inlined_call_operand.hbm [shape: f32[1,128], index: 7, kind: input, shape index: {}]   ;;  %s9998_s8 = inlined_call_operand.vmem [shape: f32[2,2,128,128], index: 8, kind: output, shape index: {}]  }
   0x1   :  { %10024 = sst [smem:[#allocation43_spill]] %s9991_s1 }
   0x2   :  { %10025 = sst [smem:[#allocation44_spill]] %s9992_s2 }
   0x3   :  { %13 = vsyncpa [#allocation3], 0 }
   0x4   :  { %14 = vsyncpa [#allocation5], 0 }
   0x5   :  { %15 = vsyncpa [#allocation8], 0 }
   0x6   :  { %16 = vsyncpa [#allocation11], 0  ;;  %s8590_s27 = smov 0   ;;  %s8592_s28 = smov 0  }
   0x7   :  { %s8594_s29 = smov 0   ;;  %s8596_s30 = smov 0  }
   0x8   :  { %s8598_s9 = smov 0  }
   0x9 LB: > { %10026 = sst [smem:[#allocation17_spill]] %s8531_s9  ;;  %s6025_s10 = sadd.s32 4294967295, %s8531_s9   ;;  %s8531_s9 = sphi %s8598_s9, %s22_s9   ;;  %s8527_s30 = sphi %s8596_s30, %s10123_s30   ;;  %s8523_s29 = sphi %s8594_s29, %s10122_s29   ;;  %s8519_s28 = sphi %s8592_s28, %s10121_s28   ;;  %s8515_s27 = sphi %s8590_s27, %s10120_s27  }
   0xa   : > { %p6027_p0 = scmp.ge.s32.totalorder %s8531_s9, 1  ;;  %p242_p1 = scmp.lt.s32.totalorder %s8531_s9, 5 }
   0xb   : > { %p8618_p2 = scmp.eq.s32.totalorder %s6025_s10, 0  ;;  %s8533_s13 = smov [#allocation4]  }
   0xc   : > { %p8622_p3 = pnand %p6027_p0, %p242_p1  ;;  %s267_s14 = sshll.u32 %s8533_s13, 4  ;;  %s8626_s14 = int_to_ptr.vmem [resolvable:$true] %s267_s14 }
   0xd   : > { %s10027_s11 = scalar_select %p8618_p2, 1, 0 }
   0xe   : > { %s10028_s12 = scalar_select %p8622_p3, 1, 0 }
   0xf   : > { %p7509_p4 = pneg %p8622_p3  ;;  %s8534_s16 = smov [#allocation7]  }
  0x10   : > { %s293_s17 = sshll.u32 %s8534_s16, 4  ;;  %s8535_s18 = smov [#allocation10]   ;;  %s8636_s17 = int_to_ptr.vmem [resolvable:$true] %s293_s17 }
  0x11   : > { %p8632_p5 = pnand %p8618_p2, %p7509_p4  ;;  %s317_s19 = sshll.u32 %s8535_s18, 4  ;;  %s8638_s19 = int_to_ptr.vmem [resolvable:$true] %s317_s19 }
  0x12   : > { %s10030_s2 = sld [smem:[#allocation44_spill]] }
  0x13   : > { %p8648_p7 = pneg %p8632_p5 }
  0x18   : > { %s8281_s22 = scalar_lea.hbm %s10030_s2, 12288 }
  0x19   : > { %p8282_p6 = scmp.ne.s32.totalorder %s10030_s2, %s8281_s22  ;;  %p8288_p10 = scmp.lt.u32.totalorder %s8281_s22, %s10030_s2 }
  0x1b   : > { %p8284_p8 = pnand %p8648_p7, %p8282_p6 }
  0x1d   : > { %p8285_p9 = pneg %p8284_p8 }
  0x1f   : > { %p8290_p11 = pnand %p8288_p10, %p8285_p9 }
  0x21   : > { %8293 = shalt.err (!%p8290_p11)
}
  0x22   : > { %s8294_s13 = scalar_lea.vmem %s8626_s14, 12288  ;;  %p8302_p1 = scmp.lt.s32.totalorder %s8626_s14, %s8626_s14 }
  0x23   : > { %p8295_p12 = scmp.ne.s32.totalorder %s8626_s14, %s8294_s13  ;;  %p8303_p4 = scmp.lt.s32.totalorder %s8294_s13, %s8294_s13 }
  0x25   : > { %p8297_p13 = pnand %p8295_p12, %p8648_p7  ;;  %p8304_p6 = por %p8303_p4, %p8302_p1 }
  0x27   : > { %p8298_p0 = pneg %p8297_p13 }
  0x29   : > { %p8305_p8 = pnand %p8304_p6, %p8298_p0 }
  0x2b   : > { %8308 = shalt.err (!%p8305_p8)
}
  0x2c   : > { %s10000_s16 = smov 192   ;;  %s8537_s18 = smov 12  }
  0x2d   : > { %7515 = dma.hbm_to_vmem [thread:$0]  (!%p8632_p5), %s10030_s2, 12288, %s8626_s14, [#allocation5], %s10000_s16, %s10000_s16, %s8537_s18  }
  0x2e   : > { %s8309_s24 = scalar_lea.hbm %s9994_s4, 4096 }
  0x2f   : > { %p8310_p9 = scmp.ne.s32.totalorder %s9994_s4, %s8309_s24  ;;  %p8316_p12 = scmp.lt.u32.totalorder %s8309_s24, %s9994_s4 }
  0x31   : > { %p8312_p10 = pnand %p8310_p9, %p8648_p7 }
  0x33   : > { %p8313_p11 = pneg %p8312_p10 }
  0x35   : > { %p8318_p13 = pnand %p8316_p12, %p8313_p11 }
  0x37   : > { %8321 = shalt.err (!%p8318_p13)
}
  0x38   : > { %s8322_s14 = scalar_lea.vmem %s8636_s17, 4096  ;;  %p8330_p6 = scmp.lt.s32.totalorder %s8636_s17, %s8636_s17 }
  0x39   : > { %p8323_p0 = scmp.ne.s32.totalorder %s8636_s17, %s8322_s14  ;;  %p8331_p8 = scmp.lt.s32.totalorder %s8322_s14, %s8322_s14 }
  0x3b   : > { %p8325_p1 = pnand %p8323_p0, %p8648_p7  ;;  %p8332_p9 = por %p8331_p8, %p8330_p6 }
  0x3d   : > { %p8326_p4 = pneg %p8325_p1 }
  0x3f   : > { %p8333_p10 = pnand %p8332_p9, %p8326_p4 }
  0x41   : > { %8336 = shalt.err (!%p8333_p10)
}
  0x42   : > { %s10001_s20 = smov 64   ;;  %s10005_s9 = smov 4  }
  0x43   : > { %7521 = dma.hbm_to_vmem [thread:$0]  (!%p8632_p5), %s9994_s4, 4096, %s8636_s17, [#allocation8], %s10001_s20, %s10001_s20, %s10005_s9  }
  0x44   : > { %s8337_s26 = scalar_lea.hbm %s9996_s6, 4096 }
  0x45   : > { %p8338_p11 = scmp.ne.s32.totalorder %s9996_s6, %s8337_s26  ;;  %p8344_p0 = scmp.lt.u32.totalorder %s8337_s26, %s9996_s6 }
  0x47   : > { %p8340_p12 = pnand %p8338_p11, %p8648_p7 }
  0x49   : > { %p8341_p13 = pneg %p8340_p12 }
  0x4b   : > { %p8346_p1 = pnand %p8344_p0, %p8341_p13 }
  0x4d   : > { %8349 = shalt.err (!%p8346_p1)
}
  0x4e   : > { %s8350_s17 = scalar_lea.vmem %s8638_s19, 4096  ;;  %p8358_p9 = scmp.lt.s32.totalorder %s8638_s19, %s8638_s19 }
  0x4f   : > { %p8351_p4 = scmp.ne.s32.totalorder %s8638_s19, %s8350_s17  ;;  %p8359_p10 = scmp.lt.s32.totalorder %s8350_s17, %s8350_s17 }
  0x51   : > { %p8353_p6 = pnand %p8351_p4, %p8648_p7  ;;  %p8360_p11 = por %p8359_p10, %p8358_p9 }
  0x53   : > { %p8354_p8 = pneg %p8353_p6 }
  0x55   : > { %p8361_p12 = pnand %p8360_p11, %p8354_p8 }
  0x57   : > { %8364 = shalt.err (!%p8361_p12)
}
  0x58   : > { %7527 = dma.hbm_to_vmem [thread:$0]  (!%p8632_p5), %s9996_s6, 4096, %s8638_s19, [#allocation11], %s10001_s20, %s10001_s20, %s10005_s9  }
  0x59   : > { %s31_s22 = sadd.s32 1, %s8523_s29  ;;  %s34_s23 = sadd.s32 1, %s8527_s30 }
  0x5a   : > { %p32_p13 = scmp.ge.s32.totalorder %s31_s22, 2  ;;  %s8540_s24 = smov [#allocation2]  }
  0x5b   : > { %s254_s26 = sshll.u32 %s8540_s24, 4  ;;  %s8541_s10 = smov [#allocation6]   ;;  %s255_s26 = int_to_ptr.vmem [resolvable:$true] %s254_s26 }
  0x5c   : > { %s10125_s22 = smov (%p32_p13, %s31_s22), 0  ;;  %s10127_s23 = smov (!%p32_p13, %s34_s23), %s8527_s30 }
  0x5d   : > { %s280_s13 = sshll.u32 %s8541_s10, 4  ;;  %s10032_s1 = sld [smem:[#allocation43_spill]]  ;;  %s8729_s13 = int_to_ptr.vmem [resolvable:$true] %s280_s13 }
  0x63   : > { %s8365_s16 = scalar_lea.hbm %s10032_s1, 12288 }
  0x64   : > { %p8366_p1 = scmp.ne.s32.totalorder %s10032_s1, %s8365_s16  ;;  %p8372_p8 = scmp.lt.u32.totalorder %s8365_s16, %s10032_s1 }
  0x66   : > { %p8368_p4 = pnand %p8366_p1, %p8648_p7 }
  0x68   : > { %p8369_p6 = pneg %p8368_p4 }
  0x6a   : > { %p8374_p9 = pnand %p8372_p8, %p8369_p6 }
  0x6c   : > { %8377 = shalt.err (!%p8374_p9)
}
  0x6d   : > { %s8378_s10 = scalar_lea.vmem %s255_s26, 12288  ;;  %p8386_p13 = scmp.lt.s32.totalorder %s255_s26, %s255_s26 }
  0x6e   : > { %p8379_p10 = scmp.ne.s32.totalorder %s255_s26, %s8378_s10  ;;  %p8387_p0 = scmp.lt.s32.totalorder %s8378_s10, %s8378_s10 }
  0x70   : > { %p8381_p11 = pnand %p8379_p10, %p8648_p7  ;;  %p8388_p2 = por %p8387_p0, %p8386_p13 }
  0x72   : > { %p8382_p12 = pneg %p8381_p11 }
  0x74   : > { %p8389_p3 = pnand %p8388_p2, %p8382_p12 }
  0x76   : > { %8392 = shalt.err (!%p8389_p3)
}
  0x77   : > { %s10033_s14 = smov 192   ;;  %p10034_p1 = scmp.ge.s32.totalorder %s10127_s23, 2 }
  0x78   : > { %7512 = dma.hbm_to_vmem [thread:$0]  (!%p8632_p5), %s10032_s1, 12288, %s255_s26, [#allocation3], %s10033_s14, %s10033_s14, %s8537_s18  }
  0x79   : > { %s10129_s23 = smov (%p10034_p1, %s10127_s23), 0  ;;  %s8393_s19 = scalar_lea.hbm %s9993_s3, 4096 }
  0x7a   : > { %p8394_p2 = scmp.ne.s32.totalorder %s9993_s3, %s8393_s19  ;;  %p8400_p4 = scmp.lt.u32.totalorder %s8393_s19, %s9993_s3 }
  0x7c   : > { %p8396_p3 = pnand %p8394_p2, %p8648_p7 }
  0x7e   : > { %p8397_p0 = pneg %p8396_p3 }
  0x80   : > { %p8402_p6 = pnand %p8400_p4, %p8397_p0 }
  0x82   : > { %8405 = shalt.err (!%p8402_p6)
}
  0x83   : > { %s8406_s18 = scalar_lea.vmem %s8729_s13, 4096  ;;  %p8414_p11 = scmp.lt.s32.totalorder %s8729_s13, %s8729_s13 }
  0x84   : > { %p8407_p8 = scmp.ne.s32.totalorder %s8729_s13, %s8406_s18  ;;  %p8415_p12 = scmp.lt.s32.totalorder %s8406_s18, %s8406_s18 }
  0x86   : > { %p8409_p9 = pnand %p8407_p8, %p8648_p7  ;;  %p8416_p13 = por %p8415_p12, %p8414_p11 }
  0x88   : > { %p8410_p10 = pneg %p8409_p9 }
  0x8a   : > { %p8417_p1 = pnand %p8416_p13, %p8410_p10 }
  0x8c   : > { %8420 = shalt.err (!%p8417_p1)
}
  0x8d   : > { %s10035_s2 = smov 4   ;;  %s10036_s9 = smov 64  }
  0x8e   : > { %7518 = dma.hbm_to_vmem [thread:$0]  (!%p8632_p5), %s9993_s3, 4096, %s8729_s13, [#allocation5], %s10036_s9, %s10036_s9, %s10035_s2  }
  0x8f   : > { %s8542_s20 = smov [#allocation9]   ;;  %s8543_s16 = smov [#allocation12]  }
  0x90   : > { %s307_s17 = sshll.u32 %s8542_s20, 4  ;;  %s331_s21 = sshll.u32 %s8543_s16, 4  ;;  %s308_s17 = int_to_ptr.vmem [resolvable:$true] %s307_s17  ;;  %s8781_s21 = int_to_ptr.vmem [resolvable:$true] %s331_s21 }
  0x91   : > { %s8421_s10 = scalar_lea.hbm %s9995_s5, 64 }
  0x92   : > { %p8422_p2 = scmp.ne.s32.totalorder %s9995_s5, %s8421_s10  ;;  %p8428_p4 = scmp.lt.u32.totalorder %s8421_s10, %s9995_s5 }
  0x94   : > { %p8424_p3 = pnand %p8422_p2, %p8648_p7 }
  0x96   : > { %p8425_p0 = pneg %p8424_p3 }
  0x98   : > { %p8430_p6 = pnand %p8428_p4, %p8425_p0 }
  0x9a   : > { %8433 = shalt.err (!%p8430_p6)
}
  0x9b   : > { %s8434_s2 = scalar_lea.vmem %s308_s17, 64  ;;  %p8442_p11 = scmp.lt.s32.totalorder %s308_s17, %s308_s17 }
  0x9c   : > { %p8435_p8 = scmp.ne.s32.totalorder %s308_s17, %s8434_s2  ;;  %p8443_p12 = scmp.lt.s32.totalorder %s8434_s2, %s8434_s2 }
  0x9e   : > { %p8437_p9 = pnand %p8435_p8, %p8648_p7  ;;  %p8444_p13 = por %p8443_p12, %p8442_p11 }
  0xa0   : > { %p8438_p10 = pneg %p8437_p9 }
  0xa2   : > { %p8445_p1 = pnand %p8444_p13, %p8438_p10 }
  0xa4   : > { %8448 = shalt.err (!%p8445_p1)
}
  0xa5   : > { %7524 = dma.hbm_to_vmem [thread:$0]  (!%p8632_p5), %s9995_s5, 64, %s308_s17, [#allocation8]  }
  0xa6   : > { %s8449_s16 = scalar_lea.hbm %s9997_s7, 16 }
  0xa7   : > { %p8450_p2 = scmp.ne.s32.totalorder %s9997_s7, %s8449_s16  ;;  %p8456_p4 = scmp.lt.u32.totalorder %s8449_s16, %s9997_s7 }
  0xa9   : > { %p8452_p3 = pnand %p8450_p2, %p8648_p7 }
  0xab   : > { %p8453_p0 = pneg %p8452_p3 }
  0xad   : > { %p8458_p6 = pnand %p8456_p4, %p8453_p0 }
  0xaf   : > { %8461 = shalt.err (!%p8458_p6)
}
  0xb0   : > { %s8462_s17 = scalar_lea.vmem %s8781_s21, 16  ;;  %s8469_s26 = scalar_lea.vmem %s8781_s21, 32 }
  0xb1   : > { %p8463_p8 = scmp.ne.s32.totalorder %s8781_s21, %s8462_s17  ;;  %p8470_p11 = scmp.lt.s32.totalorder %s8781_s21, %s8781_s21 }
  0xb2   : > { %p8471_p12 = scmp.lt.s32.totalorder %s8469_s26, %s8462_s17 }
  0xb3   : > { %p8465_p9 = pnand %p8463_p8, %p8648_p7 }
  0xb4   : > { %p8472_p13 = por %p8471_p12, %p8470_p11 }
  0xb5   : > { %p8466_p10 = pneg %p8465_p9 }
  0xb7   : > { %p8473_p1 = pnand %p8472_p13, %p8466_p10 }
  0xb9   : > { %8476 = shalt.err (!%p8473_p1)
}
  0xba   : > { %7530 = dma.hbm_to_vmem [thread:$0]  (!%p8632_p5), %s9997_s7, 16, %s8781_s21, [#allocation11]  }
  0xbb   : > { %p10037_p2 = scmp.ne.s32.totalorder %s10028_s12, 0 }
  0xbd   : > { %356 = sbr.rel (%p10037_p2) target bundleno = 1180 (0x49c), region = 52 }
  0xc4   : > { %p10038_p7 = scmp.ne.s32.totalorder %s10027_s11, 0 }
  0xc6   : > { %8498 = dma.done.wait (%p10038_p7), [#allocation3], 12288  }
  0xc7   : > { %8500 = vsyncadd (%p10038_p7), [#allocation3], 4294955008 }
  0xc8   : > { %8502 = dma.done.wait (%p10038_p7), [#allocation5], 16384  }
  0xc9   : > { %8504 = vsyncadd (%p10038_p7), [#allocation5], 4294950912 }
  0xca   : > { %8506 = dma.done.wait (%p10038_p7), [#allocation8], 4160  }
  0xcb   : > { %8508 = vsyncadd (%p10038_p7), [#allocation8], 4294963136 }
  0xcc   : > { %8510 = dma.done.wait (%p10038_p7), [#allocation11], 4112  }
  0xcd   : > { %8512 = vsyncadd (%p10038_p7), [#allocation11], 4294963184  ;;  %v10007_v0 = vmov 0   ;;  %p422_p5 = scmp.lt.s32.totalorder %s8519_s28, 1  ;;  %p424_p3 = scmp.lt.s32.totalorder %s8515_s27, 1  ;;  %vm711_vm0 = vcmask 1040384  }
  0xce   : > { %1207 = vmatprep.mubr.bf16.mxu0 %v10007_v0  ;;  %v7597_v1 = vld [vmem:[#allocation4 + $0x4] ss:$12 sps:$4 sm:$0xff]   ;;  %v7599_v2 = vld [vmem:[#allocation4 + $0x8] ss:$12 sps:$4 sm:$0xff]   ;;  %v7600_v3 = vld [vmem:[#allocation4] ss:$12 sps:$4 sm:$0xff]  }
  0xcf   : > { %s10131_s28 = smov (!%p422_p5, %s8519_s28), 1  ;;  %s10133_s27 = smov (!%p424_p3, %s8515_s27), 1  ;;  %1175 = vmatprep.subr.bf16.mxu0 %v7597_v1  ;;  %6951 = vmatprep.subr.bf16.mxu1 %v7599_v2  ;;  %v7601_v4 = vld [vmem:[#allocation4 + $0x1c] ss:$12 sps:$4 sm:$0xff]   ;;  %v7603_v5 = vld [vmem:[#allocation4 + $0x20] ss:$12 sps:$4 sm:$0xff]  }
  0xd0   : > { %1176 = vmatpush1.bf16.msra.mxu0 %v7600_v3  ;;  %6952 = vmatpush3.bf16.msra.mxu1 %v7599_v2  ;;  %v7604_v6 = vld [vmem:[#allocation4 + $0x18] ss:$12 sps:$4 sm:$0xff]   ;;  %s7480_s11 = smul.u32 160, %s10131_s28  ;;  %v7605_v7 = vld [vmem:[#allocation4 + $0x34] ss:$12 sps:$4 sm:$0xff]   ;;  %vm930_vm3 = vcmask 1047552  }
  0xd1   : > { %1177 = vmatprep.subr.bf16.mxu0 %v7601_v4  ;;  %s7479_s12 = smul.u32 80, %s10133_s27  ;;  %6953 = vmatprep.subr.bf16.mxu1 %v7603_v5  ;;  %v7607_v8 = vld [vmem:[#allocation4 + $0x38] ss:$12 sps:$4 sm:$0xff]   ;;  %v7608_v9 = vld [vmem:[#allocation4 + $0x30] ss:$12 sps:$4 sm:$0xff]   ;;  %s6045_s14 = sshll.u32 %s10133_s27, 4 }
  0xd2   : > { %v7609_v10 = vld [vmem:[#allocation4 + $0x4c] ss:$12 sps:$4 sm:$0xff]   ;;  %v7611_v11 = vld [vmem:[#allocation4 + $0x50] ss:$12 sps:$4 sm:$0xff]   ;;  %v7612_v12 = vld [vmem:[#allocation4 + $0x48] ss:$12 sps:$4 sm:$0xff]  }
  0xd3   : > { %s428_s15 = sadd.s32 %s7480_s11, %s7479_s12  ;;  %v7613_v13 = vld [vmem:[#allocation4 + $0x64] ss:$12 sps:$4 sm:$0xff]   ;;  %v7615_v14 = vld [vmem:[#allocation4 + $0x68] ss:$12 sps:$4 sm:$0xff]   ;;  %v7616_v15 = vld [vmem:[#allocation4 + $0x60] ss:$12 sps:$4 sm:$0xff]  }
  0xd4   : > { %1178 = vmatpush1.bf16.msra.mxu0 %v7604_v6  ;;  %6954 = vmatpush3.bf16.msra.mxu1 %v7603_v5  ;;  %s6044_s25 = sshll.u32 %s428_s15, 2  ;;  %v7617_v16 = vld [vmem:[#allocation4 + $0x7c] ss:$12 sps:$4 sm:$0xff]   ;;  %v7619_v17 = vld [vmem:[#allocation4 + $0x80] ss:$12 sps:$4 sm:$0xff]   ;;  %s6046_s20 = sshll.u32 %s10131_s28, 5 }
  0xd5   : > { %1179 = vmatprep.subr.bf16.mxu0 %v7605_v7  ;;  %6955 = vmatprep.subr.bf16.mxu1 %v7607_v8  ;;  %s8857_s9 = scalar_lea.vmem %s9990_s0, %s6044_s25  ;;  %v7620_v18 = vld [vmem:[#allocation4 + $0x78] ss:$12 sps:$4 sm:$0xff]   ;;  %v7621_v19 = vld [vmem:[#allocation4 + $0x94] ss:$12 sps:$4 sm:$0xff]   ;;  %vm712_vm1 = vsmask.f32 256  ;;  %s437_s16 = sadd.s32 %s6046_s20, %s6045_s14 }
  0xd6   : > { %v8860_v20 = vld [vmem:[%s8857_s9 + $0x24] ss:$16 sps:$4 sm:$0xff]   ;;  %v7624_v25 = vld [vmem:[#allocation4 + $0x90] ss:$12 sps:$4 sm:$0xff]   ;;  %vm8868_vm2 = vmand %vm711_vm0, %vm712_vm1  ;;  %vm931_vm4 = vsmask.f32 7424 }
  0xd7   : > { %v8863_v21 = vld [vmem:[%s8857_s9 + $0x44] ss:$16 sps:$4 sm:$0xff]   ;;  %v575_v23 = vshrl.u32 %v8860_v20, 16  ;;  %v578_v24 = vshll.u32 %v8860_v20, 16  ;;  %v7625_v31 = vld [vmem:[#allocation4 + $0xac] ss:$12 sps:$4 sm:$0xff]   ;;  %vm9000_vm5 = vmand %vm930_vm3, %vm931_vm4 }
  0xd8   : > { %1180 = vmatpush1.bf16.msra.mxu0 %v7608_v9  ;;  %6956 = vmatpush3.bf16.msra.mxu1 %v7607_v8  ;;  %v7623_v22 = vld [vmem:[#allocation4 + $0x98] ss:$12 sps:$4 sm:$0xff]   ;;  %v589_v26 = vshrl.u32 %v8863_v21, 16  ;;  %v592_v29 = vshll.u32 %v8863_v21, 16  ;;  %v7627_v32 = vld [vmem:[#allocation4 + $0xb0] ss:$12 sps:$4 sm:$0xff]  }
  0xd9   : > { %1181 = vmatprep.subr.bf16.mxu0 %v7609_v10  ;;  %6957 = vmatprep.subr.bf16.mxu1 %v7611_v11  ;;  %v577_v27 = vrot.slane %v575_v23, 7  ;;  %v7628_v34 = vld [vmem:[#allocation4 + $0xa8] ss:$12 sps:$4 sm:$0xff]   ;;  %v7635_v36 = vld [vmem:[#allocation2 + $0x4] ss:$12 sps:$4 sm:$0xff]   ;;  %s6047_s19 = sshll.u32 %s437_s16, 3 }
  0xda   : > { %v591_v30 = vrot.slane %v589_v26, 7  ;;  %v7636_v38 = vld [vmem:[#allocation2 + $0xc8] ss:$12 sps:$4 sm:$0xff]   ;;  %v7633_v41 = vld [vmem:[#allocation2] ss:$12 sps:$4 sm:$0xff]   ;;  %s9930_s27 = scalar_lea.vmem %s9998_s8, %s6047_s19 }
  0xdb   : > { %v580_v33 = vor.u32 %v578_v24, %v577_v27  ;;  %v8876_v39 = vld [vmem:[%s8857_s9 + $0x64] ss:$16 sps:$4 sm:$0xff]   ;;  %v7640_v45 = vld [vmem:[#allocation2 + $0x1c] ss:$12 sps:$4 sm:$0xff]   ;;  %v7641_v46 = vld [vmem:[#allocation2 + $0xe0] ss:$12 sps:$4 sm:$0xff]  }
  0xdc   : > { %1182 = vmatpush1.bf16.msra.mxu0 %v7612_v12  ;;  %6958 = vmatpush3.bf16.msra.mxu1 %v7611_v11  ;;  %v594_v37 = vor.u32 %v592_v29, %v591_v30  ;;  %v8879_v40 = vld [vmem:[%s8857_s9 + $0x84] ss:$16 sps:$4 sm:$0xff]   ;;  %v603_v43 = vshrl.u32 %v8876_v39, 16  ;;  %v606_v44 = vshll.u32 %v8876_v39, 16  ;;  %v7642_v53 = vld [vmem:[#allocation2 + $0x20] ss:$12 sps:$4 sm:$0xff]  }
  0xdd   : > { %1183 = vmatprep.subr.bf16.mxu0 %v7613_v13  ;;  %6959 = vmatprep.subr.bf16.mxu1 %v7615_v14  ;;  %v715_v35 = vsel %vm8868_vm2, 0, %v580_v33  ;;  %v7637_v42 = vld [vmem:[#allocation2 + $0x8] ss:$12 sps:$4 sm:$0xff]   ;;  %v617_v47 = vshrl.u32 %v8879_v40, 16  ;;  %v620_v50 = vshll.u32 %v8879_v40, 16 }
  0xde   : > { %6967 = vmatprep.mubr.bf16.mxu1 %v715_v35  ;;  %v8886_v48 = vsel %vm8868_vm2, 0, %v594_v37  ;;  %v605_v49 = vrot.slane %v603_v43, 7  ;;  %v7638_v52 = vld [vmem:[#allocation2 + $0x18] ss:$12 sps:$4 sm:$0xff]   ;;  %v7649_v55 = vld [vmem:[#allocation2 + $0x34] ss:$12 sps:$4 sm:$0xff]  }
  0xdf   : > { %v619_v51 = vrot.slane %v617_v47, 7  ;;  %v7650_v58 = vld [vmem:[#allocation2 + $0xf8] ss:$12 sps:$4 sm:$0xff]   ;;  %v7647_v60 = vld [vmem:[#allocation2 + $0x30] ss:$12 sps:$4 sm:$0xff]  }
  0xe0   : > { %1184 = vmatpush1.bf16.msra.mxu0 %v7616_v15  ;;  %6960 = vmatpush3.bf16.msra.mxu1 %v7615_v14  ;;  %v608_v54 = vor.u32 %v606_v44, %v605_v49  ;;  %v8895_v59 = vld [vmem:[%s8857_s9 + $0xa4] ss:$16 sps:$4 sm:$0xff]   ;;  %v7654_v63 = vld [vmem:[#allocation2 + $0x4c] ss:$12 sps:$4 sm:$0xff]   ;;  %v7655_v6 = vld [vmem:[#allocation2 + $0x110] ss:$12 sps:$4 sm:$0xff]  }
  0xe1   : > { %1185 = vmatprep.subr.bf16.mxu0 %v7617_v16  ;;  %6961 = vmatprep.subr.bf16.mxu1 %v7619_v17  ;;  %v622_v57 = vor.u32 %v620_v50, %v619_v51  ;;  %v7651_v61 = vld [vmem:[#allocation2 + $0x38] ss:$12 sps:$4 sm:$0xff]   ;;  %v631_v1 = vshrl.u32 %v8895_v59, 16  ;;  %v634_v2 = vshll.u32 %v8895_v59, 16  ;;  %v7652_v9 = vld [vmem:[#allocation2 + $0x48] ss:$12 sps:$4 sm:$0xff]  }
  0xe2   : > { %v8892_v56 = vsel %vm8868_vm2, 0, %v608_v54  ;;  %v8900_v62 = vld [vmem:[%s8857_s9 + $0xc4] ss:$16 sps:$4 sm:$0xff]   ;;  %v7656_v10 = vld [vmem:[#allocation2 + $0x50] ss:$12 sps:$4 sm:$0xff]  }
  0xe3   : > { %v8906_v3 = vsel %vm8868_vm2, 0, %v622_v57  ;;  %v645_v4 = vshrl.u32 %v8900_v62, 16  ;;  %v648_v5 = vshll.u32 %v8900_v62, 16  ;;  %v633_v7 = vrot.slane %v631_v1, 7  ;;  %v7663_v12 = vld [vmem:[#allocation2 + $0x64] ss:$12 sps:$4 sm:$0xff]  }
  0xe4   : > { %1186 = vmatpush1.bf16.msra.mxu0 %v7620_v18  ;;  %6962 = vmatpush3.bf16.msra.mxu1 %v7619_v17  ;;  %v7664_v14 = vld [vmem:[#allocation2 + $0x128] ss:$12 sps:$4 sm:$0xff]   ;;  %v7661_v16 = vld [vmem:[#allocation2 + $0x60] ss:$12 sps:$4 sm:$0xff]   ;;  %v7678_v37 = vld [vmem:[#allocation2 + $0x158] ss:$12 sps:$4 sm:$0xff]  }
  0xe5   : > { %1187 = vmatprep.subr.bf16.mxu0 %v7621_v19  ;;  %6963 = vmatprep.subr.bf16.mxu1 %v7623_v22  ;;  %v647_v8 = vrot.slane %v645_v4, 7  ;;  %v636_v11 = vor.u32 %v634_v2, %v633_v7  ;;  %v7665_v17 = vld [vmem:[#allocation2 + $0x68] ss:$12 sps:$4 sm:$0xff]   ;;  %v7669_v26 = vld [vmem:[#allocation2 + $0x140] ss:$12 sps:$4 sm:$0xff]  }
  0xe6   : > { %v8919_v18 = vld [vmem:[%s8857_s9 + $0xe4] ss:$16 sps:$4 sm:$0xff]   ;;  %v7668_v19 = vld [vmem:[#allocation2 + $0x7c] ss:$12 sps:$4 sm:$0xff]   ;;  %v7670_v33 = vld [vmem:[#allocation2 + $0x80] ss:$12 sps:$4 sm:$0xff]  }
  0xe7   : > { %v650_v13 = vor.u32 %v648_v5, %v647_v8  ;;  %v8914_v15 = vsel %vm8868_vm2, 0, %v636_v11  ;;  %v659_v24 = vshrl.u32 %v8919_v18, 16  ;;  %v7679_v43 = vld [vmem:[#allocation2 + $0x98] ss:$12 sps:$4 sm:$0xff]   ;;  %v7684_v47 = vld [vmem:[#allocation2 + $0xb0] ss:$12 sps:$4 sm:$0xff]  }
  0xe8   : > { %1188 = vmatpush1.bf16.msra.mxu0 %v7624_v25  ;;  %6964 = vmatpush3.bf16.msra.mxu1 %v7623_v22  ;;  %v8922_v22 = vld [vmem:[%s8857_s9 + $0x104] ss:$16 sps:$4 sm:$0xff]   ;;  %v662_v25 = vshll.u32 %v8919_v18, 16  ;;  %v7682_v44 = vld [vmem:[#allocation2 + $0xac] ss:$12 sps:$4 sm:$0xff]  }
  0xe9   : > { %1189 = vmatprep.subr.bf16.mxu0 %v7625_v31  ;;  %6965 = vmatprep.subr.bf16.mxu1 %v7627_v32  ;;  %v8926_v23 = vsel %vm8868_vm2, 0, %v650_v13  ;;  %v673_v27 = vshrl.u32 %v8922_v22, 16  ;;  %v676_v29 = vshll.u32 %v8922_v22, 16  ;;  %v661_v30 = vrot.slane %v659_v24, 7  ;;  %v7687_v49 = vld [vmem:[#allocation2 + $0xc4] ss:$12 sps:$4 sm:$0xff]  }
  0xea   : > { %v8949_v50 = vld [vmem:[%s8857_s9 + $0x20] ss:$16 sps:$4 sm:$0xff]   ;;  %v7689_v54 = vld [vmem:[#allocation2 + $0xd8] ss:$12 sps:$4 sm:$0xff]   ;;  %v7696_v1 = vld [vmem:[#allocation2 + $0x108] ss:$12 sps:$4 sm:$0xff]  }
  0xeb   : > { %v675_v31 = vrot.slane %v673_v27, 7  ;;  %v7685_v51 = vld [vmem:[#allocation2 + $0xc0] ss:$12 sps:$4 sm:$0xff]   ;;  %v7701_v2 = vld [vmem:[#allocation2 + $0x124] ss:$12 sps:$4 sm:$0xff]  }
  0xec   : > { %1190 = vmatpush1.bf16.msra.mxu0 %v7628_v34  ;;  %6966 = vmatpush3.bf16.msra.mxu1 %v7627_v32  ;;  %v7666_v32 = vld [vmem:[#allocation2 + $0x78] ss:$12 sps:$4 sm:$0xff]   ;;  %v664_v34 = vor.u32 %v662_v25, %v661_v30  ;;  %v7718_v57 = vld [vmem:[#allocation4 + $0xe0] ss:$12 sps:$4 sm:$0xff]   ;;  %v7724_v7 = vld [vmem:[#allocation4 + $0x110] ss:$12 sps:$4 sm:$0xff]  }
  0xed   : > { %1657 = vmatprep.subr.bf16.mxu0 %v7635_v36  ;;  %6455 = vmatprep.subr.bf16.mxu1 %v7636_v38  ;;  %v678_v36 = vor.u32 %v676_v29, %v675_v31  ;;  %v8963_v4 = vld [vmem:[%s8857_s9 + $0x60] ss:$16 sps:$4 sm:$0xff]   ;;  %v7703_v8 = vld [vmem:[#allocation2 + $0x138] ss:$12 sps:$4 sm:$0xff]   ;;  %v7722_v25 = vld [vmem:[#allocation4 + $0xdc] ss:$12 sps:$4 sm:$0xff]  }
  0xee   : > { %v8937_v38 = vsel %vm8868_vm2, 0, %v664_v34  ;;  %v7699_v5 = vld [vmem:[#allocation2 + $0x120] ss:$12 sps:$4 sm:$0xff]   ;;  %v7736_v27 = vld [vmem:[#allocation4 + $0x170] ss:$12 sps:$4 sm:$0xff]  }
  0xef   : > { %1208 = vmatmul.mubr.bf16.vlgmr.msra.gmra.mrb[0].mxu0 %v715_v35  ;;  %6968 = vmatmul.mubr.bf16.vlgmr.msra.gmra.mrb[0].mxu1 %v8886_v48  ;;  %v7677_v35 = vld [vmem:[#allocation2 + $0x94] ss:$12 sps:$4 sm:$0xff]   ;;  %v7712_v13 = vld [vmem:[#allocation2 + $0x16c] ss:$12 sps:$4 sm:$0xff]   ;;  %v7726_v31 = vld [vmem:[#allocation4 + $0xf0] ss:$12 sps:$4 sm:$0xff]  }
  0xf0   : > { %1658 = vmatpush1.bf16.msra.mxu0 %v7633_v41  ;;  %6456 = vmatpush3.bf16.msra.mxu1 %v7637_v42  ;;  %v8942_v41 = vsel %vm8868_vm2, 0, %v678_v36  ;;  %v7675_v42 = vld [vmem:[#allocation2 + $0x90] ss:$12 sps:$4 sm:$0xff]   ;;  %v7715_v24 = vld [vmem:[#allocation4 + $0xc0] ss:$12 sps:$4 sm:$0xff]  }
  0xf1   : > { %1659 = vmatprep.subr.bf16.mxu0 %v7640_v45  ;;  %6457 = vmatprep.subr.bf16.mxu1 %v7641_v46  ;;  %v7683_v45 = vld [vmem:[#allocation2 + $0x170] ss:$12 sps:$4 sm:$0xff]   ;;  %v7680_v46 = vld [vmem:[#allocation2 + $0xa8] ss:$12 sps:$4 sm:$0xff]  }
  0xf2   : > { %1217 = vmatprep.mubr.bf16.mxu0 %v10007_v0  ;;  %6971 = vmatprep.mubr.bf16.mxu1 %v8892_v56  ;;  %v8970_v11 = vld [vmem:[%s8857_s9 + $0x80] ss:$16 sps:$4 sm:$0xff]   ;;  %v7732_v34 = vld [vmem:[#allocation4 + $0x108] ss:$12 sps:$4 sm:$0xff]  }
  0xf3   : > { %v7728_v29 = vld [vmem:[#allocation4 + $0xf4] ss:$12 sps:$4 sm:$0xff]  }
  0xf4   : > { %1660 = vmatpush1.bf16.msra.mxu0 %v7638_v52  ;;  %6458 = vmatpush3.bf16.msra.mxu1 %v7642_v53  ;;  %v7691_v52 = vld [vmem:[#allocation2 + $0xdc] ss:$12 sps:$4 sm:$0xff]   ;;  %v8984_v30 = vld [vmem:[%s8857_s9 + $0xc0] ss:$16 sps:$4 sm:$0xff]   ;;  %v8276_v28 = vld [vmem:[%s8857_s9 + $0xe4] ss:$16 sps:$4 sm:$0xff]  }
  0xf5   : > { %1661 = vmatprep.subr.bf16.mxu0 %v7649_v55  ;;  %6459 = vmatprep.subr.bf16.mxu1 %v7650_v58  ;;  %v7713_v53 = vld [vmem:[#allocation4 + $0xc8] ss:$12 sps:$4 sm:$0xff]   ;;  %v8956_v58 = vld [vmem:[%s8857_s9 + $0x40] ss:$16 sps:$4 sm:$0xff]  }
  0xf6   : > { %v7694_v55 = vld [vmem:[#allocation2 + $0xf4] ss:$12 sps:$4 sm:$0xff]  }
  0xf7   : > { %1218 = vmatmul.mubr.bf16.gmra.mrb[4].mxu0 %v8886_v48  ;;  %6972 = vmatmul.mubr.bf16.gmra.mrb[4].mxu1 %v8906_v3  ;;  %v8992_v36 = vld [vmem:[%s8857_s9 + $0xe0] ss:$16 sps:$4 sm:$0xff]  }
  0xf8   : > { %1662 = vmatpush1.bf16.msra.mxu0 %v7647_v60  ;;  %6460 = vmatpush3.bf16.msra.mxu1 %v7651_v61  ;;  %v7692_v60 = vld [vmem:[#allocation2 + $0xf0] ss:$12 sps:$4 sm:$0xff]   ;;  %v7698_v61 = vld [vmem:[#allocation2 + $0x10c] ss:$12 sps:$4 sm:$0xff]  }
  0xf9   : > { %1663 = vmatprep.subr.bf16.mxu0 %v7654_v63  ;;  %6461 = vmatprep.subr.bf16.mxu1 %v7655_v6  ;;  %v7723_v63 = vld [vmem:[#allocation4 + $0xf8] ss:$12 sps:$4 sm:$0xff]   ;;  %v7705_v6 = vld [vmem:[#allocation2 + $0x13c] ss:$12 sps:$4 sm:$0xff]  }
  0xfa   : > { %1227 = vmatprep.mubr.bf16.mxu0 %v10007_v0  ;;  %6975 = vmatprep.mubr.bf16.mxu1 %v8914_v15 }
  0xfc   : > { %1664 = vmatpush1.bf16.msra.mxu0 %v7652_v9  ;;  %6462 = vmatpush3.bf16.msra.mxu1 %v7656_v10  ;;  %v7729_v9 = vld [vmem:[#allocation4 + $0x128] ss:$12 sps:$4 sm:$0xff]  }
  0xfd   : > { %1665 = vmatprep.subr.bf16.mxu0 %v7663_v12  ;;  %6463 = vmatprep.subr.bf16.mxu1 %v7664_v14  ;;  %v7708_v10 = vld [vmem:[#allocation2 + $0x154] ss:$12 sps:$4 sm:$0xff]   ;;  %v7706_v12 = vld [vmem:[#allocation2 + $0x150] ss:$12 sps:$4 sm:$0xff]  }
  0xfe   : > { %v7730_v14 = vld [vmem:[#allocation4 + $0x140] ss:$12 sps:$4 sm:$0xff]  }
  0xff   : > { %1228 = vmatmul.mubr.bf16.gmra.mrb[8].mxu0 %v8892_v56  ;;  %6976 = vmatmul.mubr.bf16.gmra.mrb[8].mxu1 %v8926_v23 }
 0x100   : > { %1666 = vmatpush1.bf16.msra.mxu0 %v7661_v16  ;;  %6464 = vmatpush3.bf16.msra.mxu1 %v7665_v17  ;;  %v7710_v16 = vld [vmem:[#allocation2 + $0x168] ss:$12 sps:$4 sm:$0xff]   ;;  %v7717_v17 = vld [vmem:[#allocation4 + $0xc4] ss:$12 sps:$4 sm:$0xff]  }
 0x101   : > { %1667 = vmatprep.subr.bf16.mxu0 %v7668_v19  ;;  %6465 = vmatprep.subr.bf16.mxu1 %v7669_v26  ;;  %v8977_v19 = vld [vmem:[%s8857_s9 + $0xa0] ss:$16 sps:$4 sm:$0xff]   ;;  %v7735_v26 = vld [vmem:[#allocation4 + $0x158] ss:$12 sps:$4 sm:$0xff]  }
 0x102   : > { %1237 = vmatprep.mubr.bf16.mxu0 %v10007_v0  ;;  %6979 = vmatprep.mubr.bf16.mxu1 %v8937_v38 }
 0x104   : > { %1668 = vmatpush1.bf16.msra.mxu0 %v7666_v32  ;;  %6466 = vmatpush3.bf16.msra.mxu1 %v7670_v33  ;;  %v7734_v32 = vld [vmem:[#allocation4 + $0x10c] ss:$12 sps:$4 sm:$0xff]   ;;  %v7742_v33 = vld [vmem:[#allocation4 + $0x184] ss:$12 sps:$4 sm:$0xff]  }
 0x105   : > { %1669 = vmatprep.subr.bf16.mxu0 %v7677_v35  ;;  %6467 = vmatprep.subr.bf16.mxu1 %v7678_v37  ;;  %v7739_v35 = vld [vmem:[#allocation4 + $0x124] ss:$12 sps:$4 sm:$0xff]   ;;  %v794_v37 = vshrl.u32 %v8949_v50, 16 }
 0x107   : > { %1238 = vmatmul.mubr.bf16.gmra.mrb[12].mxu0 %v8906_v3  ;;  %6980 = vmatmul.mubr.bf16.gmra.mrb[12].mxu1 %v8942_v41 }
 0x108   : > { %1670 = vmatpush1.bf16.msra.mxu0 %v7675_v42  ;;  %6468 = vmatpush3.bf16.msra.mxu1 %v7679_v43  ;;  %v7748_v43 = vld [vmem:[#allocation4 + $0x13c] ss:$12 sps:$4 sm:$0xff]  }
 0x109   : > { %1671 = vmatprep.subr.bf16.mxu0 %v7682_v44  ;;  %6469 = vmatprep.subr.bf16.mxu1 %v7683_v45  ;;  %v810_v44 = vshll.u32 %v8956_v58, 16 }
 0x10a   : > { %1247 = vmatprep.mubr.bf16.mxu0 %v10007_v0  ;;  %1802 = vmatprep.mubr.bf16.mxu1 %v8860_v20 }
 0x10c   : > { %1672 = vmatpush1.bf16.msra.mxu0 %v7680_v46  ;;  %6470 = vmatpush3.bf16.msra.mxu1 %v7684_v47  ;;  %v824_v47 = vshll.u32 %v8963_v4, 16 }
 0x10d   : > { %1673 = vmatprep.subr.bf16.mxu0 %v7687_v49  ;;  %6983 = vmatprep.subr.bf16.mxu1 %v7713_v53  ;;  %v7746_v49 = vld [vmem:[#allocation4 + $0x138] ss:$12 sps:$4 sm:$0xff]  }
 0x10f   : > { %1248 = vmatmul.mubr.bf16.gmra.mrb[16].mxu0 %v8914_v15  ;;  %1803 = vmatmul.mubr.bf16.vlgmr.msra.gmra.mrb[16].mxu1 %v8949_v50 }
 0x110   : > { %1674 = vmatpush1.bf16.msra.mxu0 %v7685_v51  ;;  %1257 = vmatprep.mubr.bf16.mxu0 %v10007_v0  ;;  %v9006_v51 = vld [vmem:[%s8857_s9 + $0x100] ss:$16 sps:$4 sm:$0xff]  }
 0x111   : > { %1675 = vmatprep.subr.bf16.mxu0 %v7691_v52  ;;  %1810 = vmatprep.mubr.bf16.mxu1 %v8863_v21  ;;  %v808_v52 = vshrl.u32 %v8956_v58, 16 }
 0x112   : > { %6984 = vmatpush3.bf16.msra.mxu1 %v7713_v53  ;;  %v812_v53 = vrot.slane %v810_v44, 1 }
 0x113   : > { %6985 = vmatprep.subr.bf16.mxu1 %v7718_v57 }
 0x114   : > { %1676 = vmatpush1.bf16.msra.mxu0 %v7689_v54  ;;  %v7755_v54 = vld [vmem:[#allocation4 + $0x150] ss:$12 sps:$4 sm:$0xff]  }
 0x115   : > { %1677 = vmatprep.subr.bf16.mxu0 %v7694_v55  ;;  %v822_v55 = vshrl.u32 %v8963_v4, 16 }
 0x116   : > { %6986 = vmatpush3.bf16.msra.mxu1 %v7718_v57  ;;  %v826_v57 = vrot.slane %v824_v47, 1 }
 0x117   : > { %1258 = vmatmul.mubr.bf16.gmra.mrb[20].mxu0 %v8926_v23  ;;  %1811 = vmatmul.mubr.bf16.gmra.mrb[20].mxu1 %v8956_v58 }
 0x118   : > { %1678 = vmatpush1.bf16.msra.mxu0 %v7692_v60  ;;  %1267 = vmatprep.mubr.bf16.mxu0 %v10007_v0  ;;  %v7766_v60 = vld [vmem:[#allocation4 + $0x16c] ss:$12 sps:$4 sm:$0xff]  }
 0x119   : > { %1679 = vmatprep.subr.bf16.mxu0 %v7698_v61  ;;  %1818 = vmatprep.mubr.bf16.mxu1 %v8876_v39  ;;  %v813_v61 = vor.u32 %v812_v53, %v808_v52  ;;  %v7769_v52 = vld [vmem:[#allocation4 + $0x214] ss:$12 sps:$4 sm:$0xff]   ;;  %v7767_v53 = vld [vmem:[#allocation4 + $0x210] ss:$12 sps:$4 sm:$0xff]  }
 0x11a   : > { %6987 = vmatprep.subr.bf16.mxu1 %v7723_v63 }
 0x11b   : > { %6988 = vmatpush3.bf16.msra.mxu1 %v7723_v63  ;;  %v838_v63 = vshll.u32 %v8970_v11, 16 }
 0x11c   : > { %1680 = vmatpush1.bf16.msra.mxu0 %v7696_v1  ;;  %6989 = vmatprep.subr.bf16.mxu1 %v7724_v7  ;;  %v827_v1 = vor.u32 %v826_v57, %v822_v55  ;;  %v9077_v55 = vld [vmem:[%s8857_s9 + $0x4c] ss:$16 sps:$4 sm:$0xff]  }
 0x11d   : > { %1681 = vmatprep.subr.bf16.mxu0 %v7701_v2  ;;  %v852_v2 = vshll.u32 %v8977_v19, 16  ;;  %v7772_v57 = vld [vmem:[#allocation4 + $0x22c] ss:$12 sps:$4 sm:$0xff]  }
 0x11f   : > { %1268 = vmatmul.mubr.bf16.gmra.mrb[24].mxu0 %v8937_v38  ;;  %1819 = vmatmul.mubr.bf16.gmra.mrb[24].mxu1 %v8963_v4 }
 0x120   : > { %1682 = vmatpush1.bf16.msra.mxu0 %v7699_v5  ;;  %1277 = vmatprep.mubr.bf16.mxu0 %v10007_v0  ;;  %v9024_v5 = vsel %vm9000_vm5, %v813_v61, 0  ;;  %v596_v61 = vshrl.u32 %v9077_v55, 16 }
 0x121   : > { %1683 = vmatprep.subr.bf16.mxu0 %v7705_v6  ;;  %1826 = vmatprep.mubr.bf16.mxu1 %v8879_v40  ;;  %v836_v6 = vshrl.u32 %v8970_v11, 16 }
 0x122   : > { %6990 = vmatpush3.bf16.msra.mxu1 %v7724_v7  ;;  %v840_v7 = vrot.slane %v838_v63, 1  ;;  %v7778_v63 = vld [vmem:[#allocation2 + $0x184] ss:$12 sps:$4 sm:$0xff]  }
 0x123   : > { %6991 = vmatprep.subr.bf16.mxu1 %v7729_v9 }
 0x124   : > { %1684 = vmatpush1.bf16.msra.mxu0 %v7703_v8  ;;  %v7740_v8 = vld [vmem:[#allocation4 + $0x180] ss:$12 sps:$4 sm:$0xff]  }
 0x125   : > { %1685 = vmatprep.subr.bf16.mxu0 %v7708_v10  ;;  %v850_v10 = vshrl.u32 %v8977_v19, 16 }
 0x126   : > { %6992 = vmatpush3.bf16.msra.mxu1 %v7729_v9  ;;  %v7745_v9 = vld [vmem:[#allocation4 + $0x19c] ss:$12 sps:$4 sm:$0xff]  }
 0x127   : > { %1278 = vmatmul.mubr.bf16.gmra.mrb[28].mxu0 %v8942_v41  ;;  %1827 = vmatmul.mubr.bf16.gmra.mrb[28].mxu1 %v8970_v11 }
 0x128   : > { %1686 = vmatpush1.bf16.msra.mxu0 %v7706_v12  ;;  %1689 = vmatprep.mubr.bf16.mxu0 %v8860_v20  ;;  %v7720_v20 = vld [vmem:[#allocation4 + $0xd8] ss:$12 sps:$4 sm:$0xff]   ;;  %v854_v12 = vrot.slane %v852_v2, 1  ;;  %v599_v2 = vshll.u32 %v9077_v55, 16 }
 0x129   : > { %1687 = vmatprep.subr.bf16.mxu0 %v7712_v13  ;;  %1834 = vmatprep.mubr.bf16.mxu1 %v8895_v59  ;;  %v866_v13 = vshll.u32 %v8984_v30, 16 }
 0x12a   : > { %6993 = vmatprep.subr.bf16.mxu1 %v7730_v14 }
 0x12b   : > { %6994 = vmatpush3.bf16.msra.mxu1 %v7730_v14  ;;  %v841_v14 = vor.u32 %v840_v7, %v836_v6  ;;  %v598_v6 = vrot.slane %v596_v61, 7  ;;  %v7781_v7 = vld [vmem:[#allocation2 + $0x19c] ss:$12 sps:$4 sm:$0xff]  }
 0x12c   : > { %1688 = vmatpush1.bf16.msra.mxu0 %v7710_v16  ;;  %6995 = vmatprep.subr.bf16.mxu1 %v7735_v26  ;;  %v7751_v16 = vld [vmem:[#allocation4 + $0x1b4] ss:$12 sps:$4 sm:$0xff]  }
 0x12d   : > { %2028 = vmatprep.subr.bf16.mxu0 %v7717_v17  ;;  %v855_v17 = vor.u32 %v854_v12, %v850_v10  ;;  %v9096_v12 = vld [vmem:[%s8857_s9 + $0x8c] ss:$16 sps:$4 sm:$0xff]  }
 0x12f   : > { %1690 = vmatmul.mubr.bf16.vlgmr.msra.gmra.mrb[0].mxu0 %v8949_v50  ;;  %1835 = vmatmul.mubr.bf16.gmra.mrb[32].mxu1 %v8977_v19 }
 0x130   : > { %2029 = vmatpush1.bf16.msra.mxu0 %v7715_v24  ;;  %1699 = vmatprep.mubr.bf16.mxu0 %v8863_v21  ;;  %v796_v21 = vshll.u32 %v8949_v50, 16  ;;  %v7757_v50 = vld [vmem:[#allocation4 + $0x154] ss:$12 sps:$4 sm:$0xff]   ;;  %v864_v24 = vshrl.u32 %v8984_v30, 16 }
 0x131   : > { %1842 = vmatprep.mubr.bf16.mxu1 %v8900_v62  ;;  %2030 = vmatprep.subr.bf16.mxu0 %v7722_v25  ;;  %v868_v25 = vrot.slane %v866_v13, 1  ;;  %v601_v13 = vor.u32 %v599_v2, %v598_v6  ;;  %v7829_v2 = vld [vmem:[#allocation4 + $0x218] ss:$12 sps:$4 sm:$0xff]   ;;  %v9138_v6 = vld [vmem:[%s8857_s9 + $0xec] ss:$16 sps:$4 sm:$0xff]  }
 0x132   : > { %6996 = vmatpush3.bf16.msra.mxu1 %v7735_v26  ;;  %v798_v42 = vrot.slane %v796_v21, 1  ;;  %v880_v26 = vshll.u32 %v8992_v36, 16 }
 0x133   : > { %6997 = vmatprep.subr.bf16.mxu1 %v7736_v27 }
 0x134   : > { %2031 = vmatpush1.bf16.msra.mxu0 %v7720_v20  ;;  %v799_v46 = vor.u32 %v798_v42, %v794_v37  ;;  %v7749_v20 = vld [vmem:[#allocation4 + $0x1b0] ss:$12 sps:$4 sm:$0xff]   ;;  %v882_v21 = vrot.slane %v880_v26, 1  ;;  %v7788_v26 = vld [vmem:[#allocation2 + $0x1c8] ss:$12 sps:$4 sm:$0xff]  }
 0x135   : > { %2032 = vmatprep.subr.bf16.mxu0 %v7728_v29  ;;  %v878_v29 = vshrl.u32 %v8992_v36, 16 }
 0x136   : > { %6998 = vmatpush3.bf16.msra.mxu1 %v7736_v27  ;;  %v894_v27 = vshll.u32 %v9006_v51, 16 }
 0x137   : > { %1700 = vmatmul.mubr.bf16.gmra.mrb[4].mxu0 %v8956_v58  ;;  %1843 = vmatmul.mubr.bf16.gmra.mrb[36].mxu1 %v8984_v30  ;;  %v7764_v58 = vld [vmem:[#allocation4 + $0x168] ss:$12 sps:$4 sm:$0xff]  }
 0x138   : > { %1709 = vmatprep.mubr.bf16.mxu0 %v8876_v39  ;;  %1850 = vmatprep.mubr.bf16.mxu1 %v8919_v18  ;;  %v7737_v39 = vld [vmem:[#allocation4 + $0x120] ss:$12 sps:$4 sm:$0xff]   ;;  %v896_v37 = vrot.slane %v894_v27, 1  ;;  %v627_v27 = vshll.u32 %v9096_v12, 16 }
 0x139   : > { %2033 = vmatpush1.bf16.msra.mxu0 %v7726_v31  ;;  %2560 = vmatprep.subr.bf16.mxu1 %v7742_v33  ;;  %v7752_v31 = vld [vmem:[#allocation4 + $0x1c8] ss:$12 sps:$4 sm:$0xff]   ;;  %v869_v33 = vor.u32 %v868_v25, %v864_v24  ;;  %v624_v24 = vshrl.u32 %v9096_v12, 16  ;;  %v7790_v25 = vld [vmem:[#allocation2 + $0x1cc] ss:$12 sps:$4 sm:$0xff]  }
 0x13a   : > { %2034 = vmatprep.subr.bf16.mxu0 %v7734_v32  ;;  %v9048_v32 = vsel %vm9000_vm5, %v855_v17, 0 }
 0x13b   : > { %10044 = vst [vmem:[#allocation19_spill] sm:$0xff] %v9048_v32  ;;  %v9057_v42 = vsel %vm9000_vm5, %v869_v33, 0  ;;  %v7796_v33 = vld [vmem:[#allocation2 + $0x1e4] ss:$12 sps:$4 sm:$0xff]  }
 0x13c   : > { %10045 = vst [vmem:[#allocation20_spill] sm:$0xff] %v9057_v42 }
 0x13d   : > { %2035 = vmatpush1.bf16.msra.mxu0 %v7732_v34  ;;  %v7760_v34 = vld [vmem:[#allocation4 + $0x1e4] ss:$12 sps:$4 sm:$0xff]  }
 0x13e   : > { %2036 = vmatprep.subr.bf16.mxu0 %v7739_v35  ;;  %v892_v35 = vshrl.u32 %v9006_v51, 16 }
 0x13f   : > { %1710 = vmatmul.mubr.bf16.gmra.mrb[8].mxu0 %v8963_v4  ;;  %1851 = vmatmul.mubr.bf16.gmra.mrb[40].mxu1 %v8992_v36  ;;  %v9020_v4 = vld [vmem:[#allocation4 + $0x188] ss:$12 sps:$4 sm:$0xff]  }
 0x140   : > { %1719 = vmatprep.mubr.bf16.mxu0 %v8879_v40  ;;  %1858 = vmatprep.mubr.bf16.mxu1 %v8922_v22  ;;  %v9011_v40 = vsel %vm9000_vm5, %v799_v46, 0  ;;  %v897_v44 = vor.u32 %v896_v37, %v892_v35  ;;  %v7763_v46 = vld [vmem:[#allocation4 + $0x1fc] ss:$12 sps:$4 sm:$0xff]  }
 0x141   : > { %2037 = vmatpush1.bf16.msra.mxu0 %v7737_v39  ;;  %v883_v39 = vor.u32 %v882_v21, %v878_v29  ;;  %v626_v29 = vrot.slane %v624_v24, 7  ;;  %v7799_v35 = vld [vmem:[#allocation2 + $0x1fc] ss:$12 sps:$4 sm:$0xff]   ;;  %v669_v24 = vshll.u32 %v9138_v6, 16 }
 0x142   : > { %2038 = vmatprep.subr.bf16.mxu0 %v7748_v43  ;;  %v9060_v43 = vld [vmem:[%s8857_s9 + $0x2c] ss:$16 sps:$4 sm:$0xff]  }
 0x143   : > { %v9064_v47 = vsel %vm9000_vm5, %v883_v39, 0  ;;  %v629_v37 = vor.u32 %v627_v27, %v626_v29  ;;  %v9156_v27 = vld [vmem:[%s8857_s9 + $0x10c] ss:$16 sps:$4 sm:$0xff]  }
 0x144   : > { %10046 = vst [vmem:[#allocation21_spill] sm:$0xff] %v9064_v47 }
 0x145   : > { %2039 = vmatpush1.bf16.msra.mxu0 %v7746_v49  ;;  %v582_v49 = vshrl.u32 %v9060_v43, 16 }
 0x146   : > { %2040 = vmatprep.subr.bf16.mxu0 %v7757_v50  ;;  %v9072_v50 = vsel %vm9000_vm5, %v897_v44, 0  ;;  %v7797_v44 = vld [vmem:[#allocation2 + $0x1f8] ss:$12 sps:$4 sm:$0xff]  }
 0x147   : > { %1720 = vmatmul.mubr.bf16.gmra.mrb[12].mxu0 %v8970_v11  ;;  %1859 = vmatmul.mubr.bf16.gmra.mrb[44].mxu1 %v9006_v51  ;;  %v7743_v11 = vld [vmem:[#allocation4 + $0x198] ss:$12 sps:$4 sm:$0xff]   ;;  %10047 = vst [vmem:[#allocation22_spill] sm:$0xff] %v9072_v50 }
 0x148   : > { %1729 = vmatprep.mubr.bf16.mxu0 %v8895_v59  ;;  %6999 = vmatprep.mubr.bf16.mxu1 %v9011_v40  ;;  %v9029_v59 = vsel %vm9000_vm5, %v827_v1, 0  ;;  %v7776_v1 = vld [vmem:[#allocation2 + $0x180] ss:$12 sps:$4 sm:$0xff]  }
 0x149   : > { %2041 = vmatpush1.bf16.msra.mxu0 %v7755_v54  ;;  %v584_v54 = vrot.slane %v582_v49, 7 }
 0x14a   : > { %2042 = vmatprep.subr.bf16.mxu0 %v7766_v60 }
 0x14d   : > { %2043 = vmatpush1.bf16.msra.mxu0 %v7764_v58  ;;  %v9085_v58 = vld [vmem:[%s8857_s9 + $0x6c] ss:$16 sps:$4 sm:$0xff]  }
 0x14e   : > { %7015 = vmatprep.subr.bf16.mxu0 %v9020_v4  ;;  %v610_v10 = vshrl.u32 %v9085_v58, 16  ;;  %v613_v17 = vshll.u32 %v9085_v58, 16 }
 0x14f   : > { %1730 = vmatmul.mubr.bf16.gmra.mrb[16].mxu0 %v8977_v19  ;;  %7000 = vmatmul.mubr.bf16.vlgmr.msra.gmra.mrb[0].mxu1 %v9024_v5  ;;  %v9042_v19 = vsel %vm9000_vm5, %v841_v14, 0  ;;  %v7793_v14 = vld [vmem:[#allocation4 + $0x1b8] ss:$12 sps:$4 sm:$0xff]  }
 0x150   : > { %2561 = vmatpush1.bf16.msra.mxu1 %v7740_v8  ;;  %1739 = vmatprep.mubr.bf16.mxu0 %v8900_v62  ;;  %10043 = vst [vmem:[#allocation18_spill] sm:$0xff] %v9042_v19  ;;  %v7754_v62 = vld [vmem:[#allocation4 + $0x1cc] ss:$12 sps:$4 sm:$0xff]  }
 0x151   : > { %2562 = vmatprep.subr.bf16.mxu1 %v7745_v9  ;;  %7003 = vmatprep.mubr.bf16.mxu1 %v9029_v59  ;;  %v7779_v8 = vld [vmem:[#allocation2 + $0x198] ss:$12 sps:$4 sm:$0xff]   ;;  %v7784_v9 = vld [vmem:[#allocation4 + $0x1a0] ss:$12 sps:$4 sm:$0xff]  }
 0x154   : > { %2563 = vmatpush1.bf16.msra.mxu1 %v7743_v11  ;;  %v7787_v11 = vld [vmem:[#allocation2 + $0x1b4] ss:$12 sps:$4 sm:$0xff]  }
 0x155   : > { %2564 = vmatprep.subr.bf16.mxu1 %v7751_v16  ;;  %v612_v16 = vrot.slane %v610_v10, 7  ;;  %v7817_v10 = vld [vmem:[#allocation2 + $0x25c] ss:$12 sps:$4 sm:$0xff]  }
 0x157   : > { %1740 = vmatmul.mubr.bf16.gmra.mrb[20].mxu0 %v8984_v30  ;;  %7004 = vmatmul.mubr.bf16.gmra.mrb[4].mxu1 %v9042_v19  ;;  %v7758_v30 = vld [vmem:[#allocation4 + $0x1e0] ss:$12 sps:$4 sm:$0xff]  }
 0x158   : > { %2565 = vmatpush1.bf16.msra.mxu1 %v7749_v20  ;;  %1749 = vmatprep.mubr.bf16.mxu0 %v8919_v18  ;;  %v7761_v18 = vld [vmem:[#allocation4 + $0x1f8] ss:$12 sps:$4 sm:$0xff]   ;;  %v615_v20 = vor.u32 %v613_v17, %v612_v16  ;;  %v7838_v16 = vld [vmem:[#allocation4 + $0x230] ss:$12 sps:$4 sm:$0xff]   ;;  %v7823_v17 = vld [vmem:[#allocation2 + $0x274] ss:$12 sps:$4 sm:$0xff]  }
 0x159   : > { %2566 = vmatprep.subr.bf16.mxu1 %v7754_v62  ;;  %7007 = vmatprep.mubr.bf16.mxu1 %v9048_v32  ;;  %v7802_v62 = vld [vmem:[#allocation4 + $0x1d0] ss:$12 sps:$4 sm:$0xff]  }
 0x15a   : > { %v9117_v21 = vsel %vm8868_vm2, 0, %v615_v20 }
 0x15c   : > { %2567 = vmatpush1.bf16.msra.mxu1 %v7752_v31  ;;  %v9111_v31 = vld [vmem:[%s8857_s9 + $0xac] ss:$16 sps:$4 sm:$0xff]  }
 0x15d   : > { %2568 = vmatprep.subr.bf16.mxu1 %v7760_v34  ;;  %v7794_v34 = vld [vmem:[#allocation2 + $0x1e0] ss:$12 sps:$4 sm:$0xff]   ;;  %v638_v39 = vshrl.u32 %v9111_v31, 16 }
 0x15f   : > { %1750 = vmatmul.mubr.bf16.gmra.mrb[24].mxu0 %v8992_v36  ;;  %7008 = vmatmul.mubr.bf16.gmra.mrb[8].mxu1 %v9057_v42  ;;  %v585_v36 = vshll.u32 %v9060_v43, 16  ;;  %v640_v49 = vrot.slane %v638_v39, 7  ;;  %v7830_v39 = vld [vmem:[#allocation2 + $0x2a0] ss:$12 sps:$4 sm:$0xff]  }
 0x160   : > { %2569 = vmatpush1.bf16.msra.mxu1 %v7758_v30  ;;  %1759 = vmatprep.mubr.bf16.mxu0 %v8922_v22  ;;  %v7770_v22 = vld [vmem:[#allocation4 + $0x228] ss:$12 sps:$4 sm:$0xff]  }
 0x161   : > { %2570 = vmatprep.subr.bf16.mxu1 %v7763_v46  ;;  %7011 = vmatprep.mubr.bf16.mxu1 %v9064_v47  ;;  %v587_v60 = vor.u32 %v585_v36, %v584_v54  ;;  %v7811_v30 = vld [vmem:[#allocation4 + $0x1e8] ss:$12 sps:$4 sm:$0xff]   ;;  %v9124_v46 = vsel %vm8868_vm2, 0, %v629_v37  ;;  %v7803_v54 = vld [vmem:[#allocation2 + $0x210] ss:$12 sps:$4 sm:$0xff]  }
 0x162   : > { %v9130_v36 = vld [vmem:[%s8857_s9 + $0xcc] ss:$16 sps:$4 sm:$0xff]  }
 0x163   : > { %v652_v61 = vshrl.u32 %v9130_v36, 16 }
 0x164   : > { %2571 = vmatpush1.bf16.msra.mxu1 %v7761_v18  ;;  %v7805_v18 = vld [vmem:[#allocation2 + $0x214] ss:$12 sps:$4 sm:$0xff]  }
 0x165   : > { %2572 = vmatprep.subr.bf16.mxu1 %v7769_v52  ;;  %v641_v52 = vshll.u32 %v9111_v31, 16 }
 0x167   : > { %1760 = vmatmul.mubr.bf16.gmra.mrb[28].mxu0 %v9006_v51  ;;  %7012 = vmatmul.mubr.bf16.gmra.mrb[12].mxu1 %v9072_v50  ;;  %v9090_v51 = vsel %vm8868_vm2, 0, %v587_v60  ;;  %v643_v60 = vor.u32 %v641_v52, %v640_v49  ;;  %v7833_v52 = vld [vmem:[#allocation2 + $0x2b8] ss:$12 sps:$4 sm:$0xff]  }
 0x168   : > { %2573 = vmatpush1.bf16.msra.mxu1 %v7767_v53  ;;  %2060 = vmatprep.mubr.bf16.mxu0 %v10007_v0  ;;  %v7820_v53 = vld [vmem:[#allocation4 + $0x200] ss:$12 sps:$4 sm:$0xff]  }
 0x169   : > { %2574 = vmatprep.subr.bf16.mxu1 %v7772_v57  ;;  %2592 = vmatprep.mubr.bf16.mxu1 %v10007_v0  ;;  %v7808_v57 = vld [vmem:[#allocation2 + $0x22c] ss:$12 sps:$4 sm:$0xff]  }
 0x16c   : > { %2575 = vmatpush1.bf16.msra.mxu1 %v7770_v22  ;;  %v7806_v22 = vld [vmem:[#allocation2 + $0x228] ss:$12 sps:$4 sm:$0xff]  }
 0x16d   : > { %3042 = vmatprep.subr.bf16.mxu1 %v7778_v63  ;;  %v7814_v63 = vld [vmem:[#allocation2 + $0x244] ss:$12 sps:$4 sm:$0xff]  }
 0x16f   : > { %2061 = vmatmul.mubr.bf16.vlgmr.msra.gmra.mrb[0].mxu0 %v9011_v40  ;;  %2593 = vmatmul.mubr.bf16.vlgmr.msra.gmra.mrb[48].mxu1 %v9090_v51  ;;  %v7785_v40 = vld [vmem:[#allocation2 + $0x1b0] ss:$12 sps:$4 sm:$0xff]  }
 0x170   : > { %7016 = vmatpush3.bf16.msra.mxu0 %v9020_v4  ;;  %3043 = vmatpush1.bf16.msra.mxu1 %v7776_v1  ;;  %v9105_v4 = vsel %vm8868_vm2, 0, %v601_v13  ;;  %v655_v1 = vshll.u32 %v9130_v36, 16  ;;  %v666_v13 = vshrl.u32 %v9138_v6, 16 }
 0x171   : > { %3044 = vmatprep.subr.bf16.mxu1 %v7781_v7  ;;  %2070 = vmatprep.mubr.bf16.mxu0 %v10007_v0  ;;  %v9143_v7 = vsel %vm8868_vm2, 0, %v643_v60  ;;  %v7842_v60 = vld [vmem:[#allocation2 + $0x2e8] ss:$12 sps:$4 sm:$0xff]  }
 0x172   : > { %2602 = vmatprep.mubr.bf16.mxu1 %v10007_v0  ;;  %7017 = vmatprep.subr.bf16.mxu0 %v7784_v9  ;;  %v668_v20 = vrot.slane %v666_v13, 7  ;;  %v7851_v13 = vld [vmem:[#allocation2 + $0x278] ss:$12 sps:$4 sm:$0xff]  }
 0x174   : > { %3045 = vmatpush1.bf16.msra.mxu1 %v7779_v8  ;;  %7018 = vmatpush3.bf16.msra.mxu0 %v7784_v9  ;;  %v7812_v8 = vld [vmem:[#allocation2 + $0x240] ss:$12 sps:$4 sm:$0xff]   ;;  %v654_v9 = vrot.slane %v652_v61, 7  ;;  %v671_v29 = vor.u32 %v669_v24, %v668_v20  ;;  %v9181_v61 = vld [vmem:[%s8857_s9 + $0x28] ss:$16 sps:$4 sm:$0xff]  }
 0x175   : > { %3046 = vmatprep.subr.bf16.mxu1 %v7787_v11  ;;  %7019 = vmatprep.subr.bf16.mxu0 %v7793_v14  ;;  %v7815_v11 = vld [vmem:[#allocation2 + $0x258] ss:$12 sps:$4 sm:$0xff]   ;;  %v7876_v24 = vld [vmem:[#allocation4 + $0x274] ss:$12 sps:$4 sm:$0xff]  }
 0x176   : > { %v9165_v37 = vsel %vm8868_vm2, 0, %v671_v29  ;;  %v7880_v20 = vld [vmem:[#allocation4 + $0x28c] ss:$12 sps:$4 sm:$0xff]   ;;  %v7856_v29 = vld [vmem:[#allocation2 + $0x2a8] ss:$12 sps:$4 sm:$0xff]  }
 0x177   : > { %2071 = vmatmul.mubr.bf16.gmra.mrb[4].mxu0 %v9024_v5  ;;  %2603 = vmatmul.mubr.bf16.gmra.mrb[52].mxu1 %v9105_v4 }
 0x178   : > { %3047 = vmatpush1.bf16.msra.mxu1 %v7785_v40  ;;  %2080 = vmatprep.mubr.bf16.mxu0 %v10007_v0  ;;  %v7846_v40 = vld [vmem:[#allocation2 + $0x248] ss:$12 sps:$4 sm:$0xff]  }
 0x179   : > { %3048 = vmatprep.subr.bf16.mxu1 %v7790_v25  ;;  %2612 = vmatprep.mubr.bf16.mxu1 %v10007_v0 }
 0x17a   : > { %7020 = vmatpush3.bf16.msra.mxu0 %v7793_v14  ;;  %v657_v14 = vor.u32 %v655_v1, %v654_v9  ;;  %v7847_v1 = vld [vmem:[#allocation2 + $0x188] ss:$12 sps:$4 sm:$0xff]  }
 0x17b   : > { %7021 = vmatprep.subr.bf16.mxu0 %v7802_v62  ;;  %v7872_v9 = vld [vmem:[#allocation4 + $0x25c] ss:$12 sps:$4 sm:$0xff]  }
 0x17c   : > { %3049 = vmatpush1.bf16.msra.mxu1 %v7788_v26  ;;  %v9153_v25 = vsel %vm8868_vm2, 0, %v657_v14  ;;  %v7821_v26 = vld [vmem:[#allocation2 + $0x270] ss:$12 sps:$4 sm:$0xff]   ;;  %v7870_v14 = vld [vmem:[#allocation4 + $0x258] ss:$12 sps:$4 sm:$0xff]  }
 0x17d   : > { %3050 = vmatprep.subr.bf16.mxu1 %v7796_v33  ;;  %v680_v33 = vshrl.u32 %v9156_v27, 16 }
 0x17e   : > { %7022 = vmatpush3.bf16.msra.mxu0 %v7802_v62  ;;  %v7826_v62 = vld [vmem:[#allocation2 + $0x28c] ss:$12 sps:$4 sm:$0xff]  }
 0x17f   : > { %2081 = vmatmul.mubr.bf16.gmra.mrb[8].mxu0 %v9029_v59  ;;  %2613 = vmatmul.mubr.bf16.gmra.mrb[56].mxu1 %v9117_v21 }
 0x180   : > { %3051 = vmatpush1.bf16.msra.mxu1 %v7794_v34  ;;  %2090 = vmatprep.mubr.bf16.mxu0 %v10007_v0  ;;  %v7824_v34 = vld [vmem:[#allocation2 + $0x288] ss:$12 sps:$4 sm:$0xff]  }
 0x181   : > { %3052 = vmatprep.subr.bf16.mxu1 %v7799_v35  ;;  %2622 = vmatprep.mubr.bf16.mxu1 %v10007_v0  ;;  %v7832_v35 = vld [vmem:[#allocation2 + $0x2a4] ss:$12 sps:$4 sm:$0xff]  }
 0x182   : > { %7023 = vmatprep.subr.bf16.mxu0 %v7811_v30 }
 0x183   : > { %7024 = vmatpush3.bf16.msra.mxu0 %v7811_v30  ;;  %v682_v30 = vrot.slane %v680_v33, 7  ;;  %v7857_v33 = vld [vmem:[#allocation2 + $0x1e8] ss:$12 sps:$4 sm:$0xff]  }
 0x184   : > { %3053 = vmatpush1.bf16.msra.mxu1 %v7797_v44  ;;  %7025 = vmatprep.subr.bf16.mxu0 %v7820_v53  ;;  %v683_v44 = vshll.u32 %v9156_v27, 16 }
 0x185   : > { %3054 = vmatprep.subr.bf16.mxu1 %v7805_v18  ;;  %v7835_v18 = vld [vmem:[#allocation2 + $0x2bc] ss:$12 sps:$4 sm:$0xff]  }
 0x186   : > { %v685_v49 = vor.u32 %v683_v44, %v682_v30  ;;  %v7859_v30 = vld [vmem:[#allocation2 + $0x200] ss:$12 sps:$4 sm:$0xff]   ;;  %v7861_v44 = vld [vmem:[#allocation2 + $0x2d8] ss:$12 sps:$4 sm:$0xff]  }
 0x187   : > { %2091 = vmatmul.mubr.bf16.gmra.mrb[12].mxu0 %v9042_v19  ;;  %2623 = vmatmul.mubr.bf16.gmra.mrb[60].mxu1 %v9124_v46 }
 0x188   : > { %3055 = vmatpush1.bf16.msra.mxu1 %v7803_v54  ;;  %2100 = vmatprep.mubr.bf16.mxu0 %v10007_v0  ;;  %v9174_v54 = vsel %vm8868_vm2, 0, %v685_v49  ;;  %v7882_v49 = vld [vmem:[#allocation4 + $0x2a0] ss:$12 sps:$4 sm:$0xff]  }
 0x189   : > { %3056 = vmatprep.subr.bf16.mxu1 %v7808_v57  ;;  %2632 = vmatprep.mubr.bf16.mxu1 %v10007_v0  ;;  %v7839_v57 = vld [vmem:[#allocation2 + $0x2d0] ss:$12 sps:$4 sm:$0xff]  }
 0x18a   : > { %7026 = vmatpush3.bf16.msra.mxu0 %v7820_v53  ;;  %v7841_v53 = vld [vmem:[#allocation2 + $0x2d4] ss:$12 sps:$4 sm:$0xff]  }
 0x18b   : > { %7027 = vmatprep.subr.bf16.mxu0 %v7829_v2 }
 0x18c   : > { %3057 = vmatpush1.bf16.msra.mxu1 %v7806_v22  ;;  %v7844_v22 = vld [vmem:[#allocation2 + $0x2ec] ss:$12 sps:$4 sm:$0xff]  }
 0x18d   : > { %3058 = vmatprep.subr.bf16.mxu1 %v7814_v63  ;;  %v7866_v63 = vld [vmem:[#allocation4 + $0x244] ss:$12 sps:$4 sm:$0xff]  }
 0x18e   : > { %7028 = vmatpush3.bf16.msra.mxu0 %v7829_v2  ;;  %v7848_v2 = vld [vmem:[#allocation2 + $0x260] ss:$12 sps:$4 sm:$0xff]  }
 0x18f   : > { %2101 = vmatmul.mubr.bf16.gmra.mrb[16].mxu0 %v9048_v32  ;;  %2633 = vmatmul.mubr.bf16.gmra.mrb[64].mxu1 %v9143_v7 }
 0x190   : > { %3059 = vmatpush1.bf16.msra.mxu1 %v7812_v8  ;;  %2110 = vmatprep.mubr.bf16.mxu0 %v10007_v0  ;;  %v7864_v8 = vld [vmem:[#allocation4 + $0x240] ss:$12 sps:$4 sm:$0xff]  }
 0x191   : > { %3060 = vmatprep.subr.bf16.mxu1 %v7817_v10  ;;  %2642 = vmatprep.mubr.bf16.mxu1 %v10007_v0  ;;  %v7849_v10 = vld [vmem:[#allocation2 + $0x1a0] ss:$12 sps:$4 sm:$0xff]  }
 0x192   : > { %7029 = vmatprep.subr.bf16.mxu0 %v7838_v16 }
 0x193   : > { %7030 = vmatpush3.bf16.msra.mxu0 %v7838_v16  ;;  %v7852_v16 = vld [vmem:[#allocation2 + $0x1b8] ss:$12 sps:$4 sm:$0xff]  }
 0x194   : > { %3061 = vmatpush1.bf16.msra.mxu1 %v7815_v11  ;;  %6551 = vmatprep.subr.bf16.mxu0 %v7846_v40  ;;  %v9188_v11 = vld [vmem:[%s8857_s9 + $0x48] ss:$16 sps:$4 sm:$0xff]   ;;  %v7874_v40 = vld [vmem:[#allocation4 + $0x270] ss:$12 sps:$4 sm:$0xff]  }
 0x195   : > { %3062 = vmatprep.subr.bf16.mxu1 %v7823_v17  ;;  %v7853_v17 = vld [vmem:[#allocation2 + $0x290] ss:$12 sps:$4 sm:$0xff]  }
 0x197   : > { %2111 = vmatmul.mubr.bf16.gmra.mrb[20].mxu0 %v9057_v42  ;;  %2643 = vmatmul.mubr.bf16.gmra.mrb[68].mxu1 %v9153_v25 }
 0x198   : > { %3063 = vmatpush1.bf16.msra.mxu1 %v7821_v26  ;;  %2120 = vmatprep.mubr.bf16.mxu0 %v10007_v0  ;;  %v7854_v26 = vld [vmem:[#allocation2 + $0x1d0] ss:$12 sps:$4 sm:$0xff]  }
 0x199   : > { %3064 = vmatprep.subr.bf16.mxu1 %v7826_v62  ;;  %2652 = vmatprep.mubr.bf16.mxu1 %v10007_v0  ;;  %v9195_v62 = vld [vmem:[%s8857_s9 + $0x68] ss:$16 sps:$4 sm:$0xff]  }
 0x19c   : > { %3065 = vmatpush1.bf16.msra.mxu1 %v7824_v34  ;;  %v7858_v34 = vld [vmem:[#allocation2 + $0x2c0] ss:$12 sps:$4 sm:$0xff]  }
 0x19d   : > { %3066 = vmatprep.subr.bf16.mxu1 %v7832_v35  ;;  %v7878_v35 = vld [vmem:[#allocation4 + $0x288] ss:$12 sps:$4 sm:$0xff]  }
 0x19f   : > { %2121 = vmatmul.mubr.bf16.gmra.mrb[24].mxu0 %v9064_v47  ;;  %2653 = vmatmul.mubr.bf16.gmra.mrb[72].mxu1 %v9165_v37  ;;  %v7916_v47 = vld [vmem:[#allocation7 + $0x28] sm:$0xff]  }
 0x1a0   : > { %3067 = vmatpush1.bf16.msra.mxu1 %v7830_v39  ;;  %2130 = vmatprep.mubr.bf16.mxu0 %v10007_v0  ;;  %v7884_v39 = vld [vmem:[#allocation4 + $0x2a4] ss:$12 sps:$4 sm:$0xff]  }
 0x1a1   : > { %3068 = vmatprep.subr.bf16.mxu1 %v7835_v18  ;;  %2662 = vmatprep.mubr.bf16.mxu1 %v10007_v0  ;;  %v9202_v18 = vld [vmem:[%s8857_s9 + $0x88] ss:$16 sps:$4 sm:$0xff]  }
 0x1a4   : > { %3069 = vmatpush1.bf16.msra.mxu1 %v7833_v52  ;;  %v7862_v52 = vld [vmem:[#allocation2 + $0x218] ss:$12 sps:$4 sm:$0xff]  }
 0x1a5   : > { %3070 = vmatprep.subr.bf16.mxu1 %v7841_v53  ;;  %v7863_v53 = vld [vmem:[#allocation2 + $0x2f0] ss:$12 sps:$4 sm:$0xff]  }
 0x1a7   : > { %2131 = vmatmul.mubr.bf16.gmra.mrb[28].mxu0 %v9072_v50  ;;  %2663 = vmatmul.mubr.bf16.gmra.mrb[76].mxu1 %v9174_v54 }
 0x1a8   : > { %3071 = vmatpush1.bf16.msra.mxu1 %v7839_v57  ;;  %7031 = vmatprep.mubr.bf16.mxu0 %v9090_v51  ;;  %v7886_v57 = vld [vmem:[#allocation4 + $0x2b8] ss:$12 sps:$4 sm:$0xff]  }
 0x1a9   : > { %3072 = vmatprep.subr.bf16.mxu1 %v7844_v22  ;;  %3074 = vmatprep.mubr.bf16.mxu1 %v9060_v43  ;;  %v7888_v22 = vld [vmem:[#allocation4 + $0x2bc] ss:$12 sps:$4 sm:$0xff]  }
 0x1ac   : > { %3073 = vmatpush1.bf16.msra.mxu1 %v7842_v60  ;;  %v7867_v60 = vld [vmem:[#allocation2 + $0x230] ss:$12 sps:$4 sm:$0xff]  }
 0x1ad   : > { %3413 = vmatprep.subr.bf16.mxu1 %v7866_v63  ;;  %v7892_v63 = vld [vmem:[#allocation4 + $0x2d4] ss:$12 sps:$4 sm:$0xff]  }
 0x1af   : > { %7032 = vmatmul.mubr.bf16.vlgmr.msra.gmra.mrb[32].mxu0 %v9105_v4  ;;  %3075 = vmatmul.mubr.bf16.vlgmr.msra.gmra.mrb[48].mxu1 %v9181_v61 }
 0x1b0   : > { %6552 = vmatpush3.bf16.msra.mxu0 %v7847_v1  ;;  %7035 = vmatprep.mubr.bf16.mxu0 %v9117_v21  ;;  %v7869_v1 = vld [vmem:[#allocation4 + $0x248] ss:$12 sps:$4 sm:$0xff]  }
 0x1b1   : > { %6553 = vmatprep.subr.bf16.mxu0 %v7848_v2  ;;  %3084 = vmatprep.mubr.bf16.mxu1 %v9077_v55  ;;  %v9209_v2 = vld [vmem:[%s8857_s9 + $0xa8] ss:$16 sps:$4 sm:$0xff]  }
 0x1b2   : > { %3414 = vmatpush1.bf16.msra.mxu1 %v7864_v8  ;;  %v7877_v8 = vld [vmem:[#allocation4 + $0x260] ss:$12 sps:$4 sm:$0xff]  }
 0x1b3   : > { %3415 = vmatprep.subr.bf16.mxu1 %v7872_v9  ;;  %v7896_v9 = vld [vmem:[#allocation4 + $0x2ec] ss:$12 sps:$4 sm:$0xff]  }
 0x1b4   : > { %6554 = vmatpush3.bf16.msra.mxu0 %v7849_v10  ;;  %v7894_v10 = vld [vmem:[#allocation4 + $0x2e8] ss:$12 sps:$4 sm:$0xff]  }
 0x1b5   : > { %6555 = vmatprep.subr.bf16.mxu0 %v7851_v13  ;;  %v9216_v13 = vld [vmem:[%s8857_s9 + $0xc8] ss:$16 sps:$4 sm:$0xff]  }
 0x1b6   : > { %3416 = vmatpush1.bf16.msra.mxu1 %v7870_v14  ;;  %v7901_v14 = vld [vmem:[#allocation6 + $0x40] sm:$0xff]  }
 0x1b7   : > { %7036 = vmatmul.mubr.bf16.gmra.mrb[36].mxu0 %v9124_v46  ;;  %3085 = vmatmul.mubr.bf16.gmra.mrb[52].mxu1 %v9188_v11 }
 0x1b8   : > { %6556 = vmatpush3.bf16.msra.mxu0 %v7852_v16  ;;  %7039 = vmatprep.mubr.bf16.mxu0 %v9143_v7  ;;  %v7893_v16 = vld [vmem:[#allocation4 + $0x290] ss:$12 sps:$4 sm:$0xff]  }
 0x1b9   : > { %6557 = vmatprep.subr.bf16.mxu0 %v7853_v17  ;;  %3094 = vmatprep.mubr.bf16.mxu1 %v9085_v58  ;;  %v9223_v17 = vld [vmem:[%s8857_s9 + $0xe8] ss:$16 sps:$4 sm:$0xff]  }
 0x1ba   : > { %3417 = vmatprep.subr.bf16.mxu1 %v7876_v24 }
 0x1bb   : > { %3418 = vmatpush1.bf16.msra.mxu1 %v7874_v40  ;;  %v7898_v40 = vld [vmem:[#allocation4 + $0x2c0] ss:$12 sps:$4 sm:$0xff]  }
 0x1bc   : > { %6558 = vmatpush3.bf16.msra.mxu0 %v7854_v26  ;;  %3419 = vmatprep.subr.bf16.mxu1 %v7880_v20  ;;  %v7899_v26 = vld [vmem:[#allocation4 + $0x2d8] ss:$12 sps:$4 sm:$0xff]  }
 0x1bd   : > { %6559 = vmatprep.subr.bf16.mxu0 %v7856_v29  ;;  %v9231_v20 = vld [vmem:[%s8857_s9 + $0x108] ss:$16 sps:$4 sm:$0xff]  }
 0x1bf   : > { %7040 = vmatmul.mubr.bf16.gmra.mrb[40].mxu0 %v9153_v25  ;;  %3095 = vmatmul.mubr.bf16.gmra.mrb[56].mxu1 %v9195_v62 }
 0x1c0   : > { %6560 = vmatpush3.bf16.msra.mxu0 %v7857_v33  ;;  %7043 = vmatprep.mubr.bf16.mxu0 %v9165_v37  ;;  %v801_v33 = vshrl.u32 %v9181_v61, 16 }
 0x1c1   : > { %6561 = vmatprep.subr.bf16.mxu0 %v7858_v34  ;;  %3104 = vmatprep.mubr.bf16.mxu1 %v9096_v12 }
 0x1c2   : > { %3420 = vmatpush1.bf16.msra.mxu1 %v7878_v35 }
 0x1c3   : > { %3421 = vmatprep.subr.bf16.mxu1 %v7884_v39 }
 0x1c4   : > { %6562 = vmatpush3.bf16.msra.mxu0 %v7859_v30 }
 0x1c5   : > { %6563 = vmatprep.subr.bf16.mxu0 %v7861_v44 }
 0x1c6   : > { %3422 = vmatpush1.bf16.msra.mxu1 %v7882_v49 }
 0x1c7   : > { %7044 = vmatmul.mubr.bf16.gmra.mrb[44].mxu0 %v9174_v54  ;;  %3105 = vmatmul.mubr.bf16.gmra.mrb[60].mxu1 %v9202_v18  ;;  %v7890_v54 = vld [vmem:[#allocation4 + $0x2d0] ss:$12 sps:$4 sm:$0xff]  }
 0x1c8   : > { %6564 = vmatpush3.bf16.msra.mxu0 %v7862_v52  ;;  %3114 = vmatprep.mubr.bf16.mxu1 %v9111_v31  ;;  %v817_v52 = vshll.u32 %v9188_v11, 16 }
 0x1c9   : > { %6565 = vmatprep.subr.bf16.mxu0 %v7863_v53  ;;  %3187 = vmatprep.mubr.bf16.mxu0 %v9060_v43  ;;  %v7885_v43 = vld [vmem:[#allocation4 + $0x278] ss:$12 sps:$4 sm:$0xff]  }
 0x1ca   : > { %3423 = vmatprep.subr.bf16.mxu1 %v7888_v22 }
 0x1cb   : > { %3424 = vmatpush1.bf16.msra.mxu1 %v7886_v57  ;;  %v9243_v57 = vld [vmem:[#allocation7] sm:$0xff]  }
 0x1cc   : > { %6566 = vmatpush3.bf16.msra.mxu0 %v7867_v60  ;;  %3425 = vmatprep.subr.bf16.mxu1 %v7892_v63  ;;  %v815_v63 = vshrl.u32 %v9188_v11, 16 }
 0x1cd   : > { %7047 = vmatprep.subr.bf16.mxu0 %v7869_v1 }
 0x1cf   : > { %3115 = vmatmul.mubr.bf16.gmra.mrb[64].mxu1 %v9209_v2  ;;  %3188 = vmatmul.mubr.bf16.vlgmr.msra.gmra.mrb[48].mxu0 %v9181_v61 }
 0x1d0   : > { %7048 = vmatpush3.bf16.msra.mxu0 %v7869_v1  ;;  %3124 = vmatprep.mubr.bf16.mxu1 %v9130_v36  ;;  %v819_v1 = vrot.slane %v817_v52, 1 }
 0x1d1   : > { %3195 = vmatprep.mubr.bf16.mxu0 %v9077_v55  ;;  %7049 = vmatprep.subr.bf16.mxu0 %v7877_v8  ;;  %v7897_v55 = vld [vmem:[#allocation4 + $0x2a8] ss:$12 sps:$4 sm:$0xff]  }
 0x1d2   : > { %3426 = vmatpush1.bf16.msra.mxu1 %v7890_v54 }
 0x1d3   : > { %3427 = vmatprep.subr.bf16.mxu1 %v7896_v9  ;;  %v7902_v9 = vld [vmem:[#allocation6] sm:$0xff]  }
 0x1d4   : > { %7050 = vmatpush3.bf16.msra.mxu0 %v7877_v8 }
 0x1d5   : > { %7051 = vmatprep.subr.bf16.mxu0 %v7885_v43 }
 0x1d6   : > { %3428 = vmatpush1.bf16.msra.mxu1 %v7894_v10  ;;  %v7905_v10 = vld [vmem:[#allocation6 + $0x48] sm:$0xff]  }
 0x1d7   : > { %3125 = vmatmul.mubr.bf16.gmra.mrb[68].mxu1 %v9216_v13  ;;  %3196 = vmatmul.mubr.bf16.gmra.mrb[52].mxu0 %v9188_v11 }
 0x1d8   : > { %3134 = vmatprep.mubr.bf16.mxu1 %v9138_v6  ;;  %3203 = vmatprep.mubr.bf16.mxu0 %v9085_v58  ;;  %v803_v58 = vshll.u32 %v9181_v61, 16 }
 0x1d9   : > { %7052 = vmatpush3.bf16.msra.mxu0 %v7885_v43  ;;  %6647 = vmatprep.subr.bf16.mxu1 %v7901_v14  ;;  %v820_v14 = vor.u32 %v819_v1, %v815_v63  ;;  %v7914_v1 = vld [vmem:[#allocation6 + $0x60] sm:$0xff]  }
 0x1da   : > { %7053 = vmatprep.subr.bf16.mxu0 %v7893_v16  ;;  %v805_v34 = vrot.slane %v803_v58, 1  ;;  %v7908_v58 = vld [vmem:[#allocation6 + $0x50] sm:$0xff]  }
 0x1dc   : > { %v806_v49 = vor.u32 %v805_v34, %v801_v33 }
 0x1dd   : > { %7054 = vmatpush3.bf16.msra.mxu0 %v7893_v16  ;;  %v831_v16 = vshll.u32 %v9195_v62, 16 }
 0x1de   : > { %7055 = vmatprep.subr.bf16.mxu0 %v7897_v55  ;;  %v9247_v60 = vsel %vm9000_vm5, %v806_v49, 0  ;;  %v7911_v49 = vld [vmem:[#allocation6 + $0x58] sm:$0xff]  }
 0x1df   : > { %3135 = vmatmul.mubr.bf16.gmra.mrb[72].mxu1 %v9223_v17  ;;  %3204 = vmatmul.mubr.bf16.gmra.mrb[56].mxu0 %v9195_v62  ;;  %v833_v33 = vrot.slane %v831_v16, 1 }
 0x1e0   : > { %3144 = vmatprep.mubr.bf16.mxu1 %v9156_v27  ;;  %3211 = vmatprep.mubr.bf16.mxu0 %v9096_v12  ;;  %v7900_v12 = vld [vmem:[#allocation4 + $0x2f0] ss:$12 sps:$4 sm:$0xff]  }
 0x1e1   : > { %7056 = vmatpush3.bf16.msra.mxu0 %v7897_v55  ;;  %v7906_v55 = vld [vmem:[#allocation6 + $0x8] sm:$0xff]  }
 0x1e2   : > { %7057 = vmatprep.subr.bf16.mxu0 %v7898_v40  ;;  %v6471_v24 = vpop.f32.mrb[16].mxu1 }
 0x1e3   : > { %v6472_v29 = vpop.f32.mrb[17].mxu1 }
 0x1e4   : > { %v9234_v35 = vadd.f32 %v6472_v29, %v6471_v24  ;;  %v6474_v39 = vpop.f32.mrb[18].mxu1  ;;  %v829_v29 = vshrl.u32 %v9195_v62, 16 }
 0x1e5   : > { %7058 = vmatpush3.bf16.msra.mxu0 %v7898_v40  ;;  %v6475_v30 = vpop.f32.mrb[19].mxu1 }
 0x1e6   : > { %v9236_v44 = vadd.f32 %v6475_v30, %v6474_v39  ;;  %7059 = vmatprep.subr.bf16.mxu0 %v7899_v26  ;;  %v7909_v30 = vld [vmem:[#allocation6 + $0x10] sm:$0xff]   ;;  %v834_v52 = vor.u32 %v833_v33, %v829_v29  ;;  %v859_v29 = vshll.u32 %v9209_v2, 16  ;;  %v7918_v33 = vld [vmem:[#allocation6 + $0x28] sm:$0xff]  }
 0x1e7   : > { %3145 = vmatmul.mubr.bf16.gmra.mrb[76].mxu1 %v9231_v20  ;;  %3212 = vmatmul.mubr.bf16.gmra.mrb[60].mxu0 %v9202_v18 }
 0x1e8   : > { %3219 = vmatprep.mubr.bf16.mxu0 %v9111_v31  ;;  %3445 = vmatprep.mubr.bf16.mxu1 %v10007_v0 }
 0x1e9   : > { %7060 = vmatpush3.bf16.msra.mxu0 %v7899_v26  ;;  %v9262_v26 = vsel %vm9000_vm5, %v820_v14, 0 }
 0x1ea   : > { %v6477_v53 = vpop.f32.mrb[20].mxu1  ;;  %7061 = vmatprep.subr.bf16.mxu0 %v7900_v12 }
 0x1eb   : > { %v6478_v22 = vpop.f32.mrb[21].mxu1 }
 0x1ec   : > { %v9250_v8 = vadd.f32 %v6478_v22, %v6477_v53  ;;  %v6480_v31 = vpop.f32.mrb[22].mxu1  ;;  %v845_v53 = vshll.u32 %v9202_v18, 16  ;;  %v7912_v22 = vld [vmem:[#allocation6 + $0x18] sm:$0xff]  }
 0x1ed   : > { %v6481_v54 = vpop.f32.mrb[23].mxu1  ;;  %7062 = vmatpush3.bf16.msra.mxu0 %v7900_v12 }
 0x1ee   : > { %v9252_v43 = vadd.f32 %v6481_v54, %v6480_v31  ;;  %7079 = vmatprep.subr.bf16.mxu0 %v9243_v57  ;;  %v9276_v54 = vsel %vm9000_vm5, %v834_v52, 0  ;;  %v857_v52 = vshrl.u32 %v9209_v2, 16 }
 0x1ef   : > { %3220 = vmatmul.mubr.bf16.gmra.mrb[64].mxu0 %v9209_v2  ;;  %3446 = vmatmul.mubr.bf16.vlgmr.msra.gmra.mrb[48].mxu1 %v9247_v60 }
 0x1f0   : > { %3227 = vmatprep.mubr.bf16.mxu0 %v9130_v36  ;;  %3455 = vmatprep.mubr.bf16.mxu1 %v10007_v0 }
 0x1f1   : > { %6648 = vmatpush3.bf16.msra.mxu1 %v7902_v9  ;;  %v843_v9 = vshrl.u32 %v9202_v18, 16 }
 0x1f2   : > { %v6483_v40 = vpop.f32.mrb[24].mxu1  ;;  %6649 = vmatprep.subr.bf16.mxu1 %v7905_v10  ;;  %v847_v10 = vrot.slane %v845_v53, 1  ;;  %v861_v53 = vrot.slane %v859_v29, 1 }
 0x1f3   : > { %v6484_v24 = vpop.f32.mrb[25].mxu1 }
 0x1f4   : > { %v9265_v34 = vadd.f32 %v6484_v24, %v6483_v40  ;;  %v6486_v36 = vpop.f32.mrb[26].mxu1  ;;  %v848_v24 = vor.u32 %v847_v10, %v843_v9  ;;  %v7923_v9 = vld [vmem:[#allocation6 + $0x78] sm:$0xff]   ;;  %v862_v10 = vor.u32 %v861_v53, %v857_v52 }
 0x1f5   : > { %v6487_v39 = vpop.f32.mrb[27].mxu1  ;;  %6650 = vmatpush3.bf16.msra.mxu1 %v7906_v55  ;;  %v7915_v55 = vld [vmem:[#allocation6 + $0x20] sm:$0xff]  }
 0x1f6   : > { %v9267_v12 = vadd.f32 %v6487_v39, %v6486_v36  ;;  %6651 = vmatprep.subr.bf16.mxu1 %v7908_v58  ;;  %v7917_v58 = vld [vmem:[#allocation6 + $0x68] sm:$0xff]   ;;  %v7920_v39 = vld [vmem:[#allocation6 + $0x70] sm:$0xff]   ;;  %v9304_v29 = vsel %vm9000_vm5, %v862_v10, 0 }
 0x1f7   : > { %3228 = vmatmul.mubr.bf16.gmra.mrb[68].mxu0 %v9216_v13  ;;  %3456 = vmatmul.mubr.bf16.gmra.mrb[52].mxu1 %v9262_v26 }
 0x1f8   : > { %3235 = vmatprep.mubr.bf16.mxu0 %v9138_v6  ;;  %3465 = vmatprep.mubr.bf16.mxu1 %v10007_v0 }
 0x1f9   : > { %6652 = vmatpush3.bf16.msra.mxu1 %v7909_v30 }
 0x1fa   : > { %v6489_v63 = vpop.f32.mrb[28].mxu1  ;;  %6653 = vmatprep.subr.bf16.mxu1 %v7911_v49  ;;  %v9290_v49 = vsel %vm9000_vm5, %v848_v24, 0 }
 0x1fb   : > { %v6490_v31 = vpop.f32.mrb[29].mxu1 }
 0x1fc   : > { %v9279_v14 = vadd.f32 %v6490_v31, %v6489_v63  ;;  %v6492_v6 = vpop.f32.mrb[30].mxu1 }
 0x1fd   : > { %v6493_v16 = vpop.f32.mrb[31].mxu1  ;;  %6654 = vmatpush3.bf16.msra.mxu1 %v7912_v22 }
 0x1fe   : > { %v9281_v40 = vadd.f32 %v6493_v16, %v6492_v6  ;;  %6655 = vmatprep.subr.bf16.mxu1 %v7914_v1  ;;  %v7921_v1 = vld [vmem:[#allocation6 + $0x30] sm:$0xff]   ;;  %v873_v6 = vshll.u32 %v9216_v13, 16  ;;  %v7924_v16 = vld [vmem:[#allocation6 + $0x38] sm:$0xff]  }
 0x1ff   : > { %3236 = vmatmul.mubr.bf16.gmra.mrb[72].mxu0 %v9223_v17  ;;  %3466 = vmatmul.mubr.bf16.gmra.mrb[56].mxu1 %v9276_v54 }
 0x200   : > { %3243 = vmatprep.mubr.bf16.mxu0 %v9156_v27  ;;  %3475 = vmatprep.mubr.bf16.mxu1 %v10007_v0 }
 0x201   : > { %6656 = vmatpush3.bf16.msra.mxu1 %v7915_v55 }
 0x202   : > { %v6495_v36 = vpop.f32.mrb[32].mxu1  ;;  %6657 = vmatprep.subr.bf16.mxu1 %v7917_v58  ;;  %v7936_v58 = vld [vmem:[#allocation6 + $0xc0] sm:$0xff]  }
 0x203   : > { %v6496_v30 = vpop.f32.mrb[33].mxu1 }
 0x204   : > { %v9293_v22 = vadd.f32 %v6496_v30, %v6495_v36  ;;  %v6498_v27 = vpop.f32.mrb[34].mxu1  ;;  %v871_v36 = vshrl.u32 %v9216_v13, 16 }
 0x205   : > { %v6499_v63 = vpop.f32.mrb[35].mxu1  ;;  %6658 = vmatpush3.bf16.msra.mxu1 %v7918_v33 }
 0x206   : > { %v9295_v31 = vadd.f32 %v6499_v63, %v6498_v27  ;;  %6659 = vmatprep.subr.bf16.mxu1 %v7920_v39  ;;  %v875_v39 = vrot.slane %v873_v6, 1  ;;  %v7904_v27 = vld [vmem:[#allocation7 + $0x8] sm:$0xff]  }
 0x207   : > { %3244 = vmatmul.mubr.bf16.gmra.mrb[76].mxu0 %v9231_v20  ;;  %3476 = vmatmul.mubr.bf16.gmra.mrb[60].mxu1 %v9290_v49 }
 0x208   : > { %3485 = vmatprep.mubr.bf16.mxu1 %v10007_v0  ;;  %7063 = vmatprep.mubr.bf16.mxu0 %v9247_v60  ;;  %v876_v63 = vor.u32 %v875_v39, %v871_v36  ;;  %v7910_v36 = vld [vmem:[#allocation7 + $0x18] sm:$0xff]  }
 0x209   : > { %6660 = vmatpush3.bf16.msra.mxu1 %v7921_v1  ;;  %v887_v1 = vshll.u32 %v9223_v17, 16 }
 0x20a   : > { %v6501_v55 = vpop.f32.mrb[36].mxu1  ;;  %6661 = vmatprep.subr.bf16.mxu1 %v7923_v9  ;;  %v7907_v9 = vld [vmem:[#allocation7 + $0x10] sm:$0xff]  }
 0x20b   : > { %v6502_v24 = vpop.f32.mrb[37].mxu1 }
 0x20c   : > { %v9306_v33 = vadd.f32 %v6502_v24, %v6501_v55  ;;  %v6504_v30 = vpop.f32.mrb[38].mxu1  ;;  %v889_v24 = vrot.slane %v887_v1, 1  ;;  %v7913_v1 = vld [vmem:[#allocation7 + $0x20] sm:$0xff]  }
 0x20d   : > { %v6505_v52 = vpop.f32.mrb[39].mxu1  ;;  %6662 = vmatpush3.bf16.msra.mxu1 %v7924_v16  ;;  %v9319_v16 = vsel %vm9000_vm5, %v876_v63, 0  ;;  %v901_v63 = vshll.u32 %v9231_v20, 16 }
 0x20e   : > { %v9309_v53 = vadd.f32 %v6505_v52, %v6504_v30  ;;  %6743 = vmatprep.subr.bf16.mxu1 %v7936_v58  ;;  %v885_v58 = vshrl.u32 %v9223_v17, 16  ;;  %v7925_v30 = vld [vmem:[%s8857_s9 + $0xc] ss:$16 sps:$4 sm:$0xff]  }
 0x20f   : > { %3486 = vmatmul.mubr.bf16.gmra.mrb[64].mxu1 %v9304_v29  ;;  %7064 = vmatmul.mubr.bf16.vlgmr.msra.gmra.mrb[32].mxu0 %v9262_v26  ;;  %v571_v32 = vshll.u32 %v7925_v30, 16 }
 0x210   : > { %7080 = vmatpush3.bf16.msra.mxu0 %v9243_v57  ;;  %3495 = vmatprep.mubr.bf16.mxu1 %v10007_v0 }
 0x211   : > { %7081 = vmatprep.subr.bf16.mxu0 %v7904_v27  ;;  %7067 = vmatprep.mubr.bf16.mxu0 %v9276_v54 }
 0x212   : > { %v6507_v10 = vpop.f32.mrb[40].mxu1 }
 0x213   : > { %v6508_v6 = vpop.f32.mrb[41].mxu1 }
 0x214   : > { %7082 = vmatpush3.bf16.msra.mxu0 %v7904_v27  ;;  %v9321_v55 = vadd.f32 %v6508_v6, %v6507_v10  ;;  %v6510_v57 = vpop.f32.mrb[42].mxu1  ;;  %v890_v27 = vor.u32 %v889_v24, %v885_v58  ;;  %v568_v10 = vshrl.u32 %v7925_v30, 16  ;;  %v903_v58 = vrot.slane %v901_v63, 1 }
 0x215   : > { %7083 = vmatprep.subr.bf16.mxu0 %v7907_v9  ;;  %v6511_v39 = vpop.f32.mrb[43].mxu1 }
 0x216   : > { %v9325_v52 = vadd.f32 %v6511_v39, %v6510_v57  ;;  %v9336_v39 = vsel %vm9000_vm5, %v890_v27, 0  ;;  %v570_v42 = vrot.slane %v568_v10, 7 }
 0x217   : > { %3496 = vmatmul.mubr.bf16.gmra.mrb[68].mxu1 %v9319_v16  ;;  %7068 = vmatmul.mubr.bf16.gmra.mrb[36].mxu0 %v9290_v49 }
 0x218   : > { %7084 = vmatpush3.bf16.msra.mxu0 %v7907_v9  ;;  %3505 = vmatprep.mubr.bf16.mxu1 %v10007_v0  ;;  %v899_v0 = vshrl.u32 %v9231_v20, 16  ;;  %v7919_v20 = vld [vmem:[#allocation7 + $0x30] sm:$0xff]   ;;  %v573_v27 = vor.u32 %v571_v32, %v570_v42  ;;  %v7922_v32 = vld [vmem:[#allocation7 + $0x38] sm:$0xff]  }
 0x219   : > { %7085 = vmatprep.subr.bf16.mxu0 %v7910_v36  ;;  %7071 = vmatprep.mubr.bf16.mxu0 %v9304_v29 }
 0x21a   : > { %v6513_v6 = vpop.f32.mrb[44].mxu1  ;;  %v714_v42 = vsel %vm8868_vm2, 0, %v573_v27 }
 0x21b   : > { %v6514_v50 = vpop.f32.mrb[45].mxu1 }
 0x21c   : > { %7086 = vmatpush3.bf16.msra.mxu0 %v7910_v36  ;;  %v9332_v57 = vadd.f32 %v6514_v50, %v6513_v6  ;;  %v6516_v9 = vpop.f32.mrb[46].mxu1  ;;  %v10048_v50 = vmov 0   ;;  %v904_v36 = vor.u32 %v903_v58, %v899_v0 }
 0x21d   : > { %7087 = vmatprep.subr.bf16.mxu0 %v7913_v1  ;;  %v6517_v24 = vpop.f32.mrb[47].mxu1 }
 0x21e   : > { %v9339_v19 = vadd.f32 %v6517_v24, %v6516_v9 }
 0x21f   : > { %3506 = vmatmul.mubr.bf16.gmra.mrb[72].mxu1 %v9336_v39  ;;  %7072 = vmatmul.mubr.bf16.gmra.mrb[40].mxu0 %v9319_v16 }
 0x220   : > { %7088 = vmatpush3.bf16.msra.mxu0 %v7913_v1  ;;  %3515 = vmatprep.mubr.bf16.mxu1 %v10048_v50  ;;  %v949_v1 = vsel %vm9000_vm5, %v904_v36, 0  ;;  %v9365_v36 = vld [vmem:[%s8857_s9 + $0x8] ss:$16 sps:$4 sm:$0xff]  }
 0x221   : > { %7089 = vmatprep.subr.bf16.mxu0 %v7916_v47  ;;  %7075 = vmatprep.mubr.bf16.mxu0 %v9336_v39 }
 0x222   : > { %v7001_v63 = vpop.f32.mrb[0].mxu1 }
 0x223   : > { %v9346_v6 = vadd.f32 %v7001_v63, %v9250_v8  ;;  %v2175_v10 = vpop.f32.mrb[1].mxu1 }
 0x224   : > { %v9349_v9 = vadd.f32 %v9234_v35, %v2175_v10  ;;  %v7002_v24 = vpop.f32.mrb[2].mxu1  ;;  %7090 = vmatpush3.bf16.msra.mxu0 %v7916_v47  ;;  %v7928_v47 = vld [vmem:[#allocation7 + $0x40] sm:$0xff]  }
 0x225   : > { %v9354_v0 = vadd.f32 %v7002_v24, %v9252_v43  ;;  %v2178_v58 = vpop.f32.mrb[3].mxu1  ;;  %7091 = vmatprep.subr.bf16.mxu0 %v7919_v20  ;;  %v7940_v24 = vld [vmem:[#allocation6 + $0xc8] sm:$0xff]  }
 0x226   : > { %v9359_v8 = vadd.f32 %v9236_v44, %v2178_v58  ;;  %v7941_v58 = vld [vmem:[#allocation6 + $0x88] sm:$0xff]  }
 0x227   : > { %3516 = vmatmul.mubr.bf16.gmra.mrb[76].mxu1 %v949_v1  ;;  %7076 = vmatmul.mubr.bf16.gmra.mrb[44].mxu0 %v949_v1 }
 0x228   : > { %7092 = vmatpush3.bf16.msra.mxu0 %v7919_v20  ;;  %7095 = vmatprep.mubr.bf16.mxu0 %v714_v42 }
 0x229   : > { %7093 = vmatprep.subr.bf16.mxu0 %v7922_v32  ;;  %4042 = vmatprep.mubr.bf16.mxu1 %v7925_v30  ;;  %v7929_v30 = vld [vmem:[#allocation7 + $0x48] sm:$0xff]  }
 0x22a   : > { %v7005_v35 = vpop.f32.mrb[4].mxu1 }
 0x22b   : > { %v9362_v43 = vadd.f32 %v7005_v35, %v9279_v14  ;;  %v2191_v50 = vpop.f32.mrb[5].mxu1  ;;  %v7937_v14 = vld [vmem:[#allocation6 + $0x80] sm:$0xff]   ;;  %v7931_v35 = vld [vmem:[#allocation7 + $0x58] sm:$0xff]  }
 0x22c   : > { %v9368_v27 = vadd.f32 %v9265_v34, %v2191_v50  ;;  %v7006_v44 = vpop.f32.mrb[6].mxu1  ;;  %7094 = vmatpush3.bf16.msra.mxu0 %v7922_v32  ;;  %v8259_v34 = vld [vmem:[%s8857_s9 + $0x2c] ss:$16 sps:$4 sm:$0xff]  }
 0x22d   : > { %v9371_v63 = vadd.f32 %v7006_v44, %v9281_v40  ;;  %v2194_v20 = vpop.f32.mrb[7].mxu1  ;;  %7111 = vmatprep.subr.bf16.mxu0 %v7928_v47  ;;  %v7930_v40 = vld [vmem:[#allocation7 + $0x50] sm:$0xff]   ;;  %v7946_v44 = vld [vmem:[#allocation6 + $0xd8] sm:$0xff]  }
 0x22e   : > { %v9374_v10 = vadd.f32 %v9267_v12, %v2194_v20  ;;  %v7932_v20 = vld [vmem:[#allocation7 + $0x60] sm:$0xff]  }
 0x22f   : > { %7096 = vmatmul.mubr.bf16.vlgmr.msra.gmra.mrb[80].mxu0 %v9090_v51  ;;  %4043 = vmatmul.mubr.bf16.vlgmr.msra.gmra.mrb[80].mxu1 %v9365_v36 }
 0x230   : > { %7112 = vmatpush3.bf16.msra.mxu0 %v7928_v47  ;;  %7099 = vmatprep.mubr.bf16.mxu0 %v9105_v4 }
 0x231   : > { %7113 = vmatprep.subr.bf16.mxu0 %v7929_v30  ;;  %4050 = vmatprep.mubr.bf16.mxu1 %v8259_v34 }
 0x232   : > { %v7009_v1 = vpop.f32.mrb[8].mxu1  ;;  %6744 = vmatpush3.bf16.msra.mxu1 %v7937_v14  ;;  %v789_v14 = vshll.u32 %v9365_v36, 16 }
 0x233   : > { %v9381_v32 = vadd.f32 %v7009_v1, %v9306_v33  ;;  %v2207_v12 = vpop.f32.mrb[9].mxu1  ;;  %6745 = vmatprep.subr.bf16.mxu1 %v7940_v24  ;;  %v7943_v33 = vld [vmem:[#allocation6 + $0xd0] sm:$0xff]  }
 0x234   : > { %v9384_v51 = vadd.f32 %v9293_v22, %v2207_v12  ;;  %v7010_v42 = vpop.f32.mrb[10].mxu1  ;;  %7114 = vmatpush3.bf16.msra.mxu0 %v7929_v30  ;;  %v7944_v22 = vld [vmem:[#allocation6 + $0x90] sm:$0xff]   ;;  %v7947_v12 = vld [vmem:[#allocation6 + $0x98] sm:$0xff]  }
 0x235   : > { %v9387_v4 = vadd.f32 %v7010_v42, %v9309_v53  ;;  %v2210_v47 = vpop.f32.mrb[11].mxu1  ;;  %7115 = vmatprep.subr.bf16.mxu0 %v7930_v40  ;;  %v8260_v53 = vld [vmem:[%s8857_s9 + $0x4c] ss:$16 sps:$4 sm:$0xff]   ;;  %v7934_v42 = vld [vmem:[#allocation7 + $0x70] sm:$0xff]  }
 0x236   : > { %v9390_v50 = vadd.f32 %v9295_v31, %v2210_v47  ;;  %6746 = vmatpush3.bf16.msra.mxu1 %v7941_v58  ;;  %v791_v58 = vrot.slane %v789_v14, 1 }
 0x237   : > { %7100 = vmatmul.mubr.bf16.gmra.mrb[84].mxu0 %v9117_v21  ;;  %4051 = vmatmul.mubr.bf16.gmra.mrb[84].mxu1 %v9181_v61 }
 0x238   : > { %7116 = vmatpush3.bf16.msra.mxu0 %v7930_v40  ;;  %7103 = vmatprep.mubr.bf16.mxu0 %v9124_v46  ;;  %v7933_v40 = vld [vmem:[#allocation7 + $0x68] sm:$0xff]  }
 0x239   : > { %7117 = vmatprep.subr.bf16.mxu0 %v7931_v35  ;;  %4058 = vmatprep.mubr.bf16.mxu1 %v8260_v53  ;;  %v8262_v53 = vld [vmem:[%s8857_s9 + $0x8c] ss:$16 sps:$4 sm:$0xff]  }
 0x23a   : > { %v7013_v30 = vpop.f32.mrb[12].mxu1  ;;  %6747 = vmatprep.subr.bf16.mxu1 %v7943_v33 }
 0x23b   : > { %v9398_v31 = vadd.f32 %v7013_v30, %v9332_v57  ;;  %v2223_v24 = vpop.f32.mrb[13].mxu1  ;;  %6748 = vmatpush3.bf16.msra.mxu1 %v7944_v22  ;;  %v787_v57 = vshrl.u32 %v9365_v36, 16  ;;  %v7950_v36 = vld [vmem:[#allocation6 + $0xa0] sm:$0xff]   ;;  %v7952_v22 = vld [vmem:[#allocation6 + $0xe8] sm:$0xff]  }
 0x23c   : > { %v9401_v21 = vadd.f32 %v9321_v55, %v2223_v24  ;;  %v7014_v61 = vpop.f32.mrb[14].mxu1  ;;  %7118 = vmatpush3.bf16.msra.mxu0 %v7931_v35  ;;  %6749 = vmatprep.subr.bf16.mxu1 %v7946_v44  ;;  %v7949_v55 = vld [vmem:[#allocation6 + $0xe0] sm:$0xff]   ;;  %v7953_v44 = vld [vmem:[#allocation6 + $0xa8] sm:$0xff]  }
 0x23d   : > { %v9404_v46 = vadd.f32 %v7014_v61, %v9339_v19  ;;  %v2226_v34 = vpop.f32.mrb[15].mxu1  ;;  %7119 = vmatprep.subr.bf16.mxu0 %v7932_v20  ;;  %v8261_v19 = vld [vmem:[%s8857_s9 + $0x6c] ss:$16 sps:$4 sm:$0xff]   ;;  %v7938_v30 = vld [vmem:[#allocation7 + $0x80] sm:$0xff]  }
 0x23e   : > { %v9407_v1 = vadd.f32 %v9325_v52, %v2226_v34  ;;  %v792_v52 = vor.u32 %v791_v58, %v787_v57  ;;  %v7956_v34 = vld [vmem:[#allocation6 + $0xb0] sm:$0xff]   ;;  %v8263_v57 = vld [vmem:[%s8857_s9 + $0xac] ss:$16 sps:$4 sm:$0xff]  }
 0x23f   : > { %7104 = vmatmul.mubr.bf16.gmra.mrb[88].mxu0 %v9143_v7  ;;  %4059 = vmatmul.mubr.bf16.gmra.mrb[88].mxu1 %v9188_v11  ;;  %v7942_v58 = vld [vmem:[#allocation7 + $0x90] sm:$0xff]  }
 0x240   : > { %7120 = vmatpush3.bf16.msra.mxu0 %v7932_v20  ;;  %7107 = vmatprep.mubr.bf16.mxu0 %v9153_v25  ;;  %v7935_v25 = vld [vmem:[#allocation7 + $0x78] sm:$0xff]   ;;  %v933_v33 = vsel %vm9000_vm5, %v792_v52, 0  ;;  %v7955_v20 = vld [vmem:[#allocation6 + $0xf0] sm:$0xff]   ;;  %v7948_v52 = vld [vmem:[#allocation7 + $0xa0] sm:$0xff]  }
 0x241   : > { %7121 = vmatprep.subr.bf16.mxu0 %v7933_v40  ;;  %4066 = vmatprep.mubr.bf16.mxu1 %v8261_v19 }
 0x242   : > { %v9414_v47 = vpop.f32.mrb[0].mxu0  ;;  %6750 = vmatpush3.bf16.msra.mxu1 %v7947_v12 }
 0x243   : > { %v9416_v35 = vpop.f32.mrb[1].mxu0  ;;  %6751 = vmatprep.subr.bf16.mxu1 %v7949_v55  ;;  %v7959_v55 = vld [vmem:[#allocation6 + $0xb8] sm:$0xff]  }
 0x244   : > { %v9418_v7 = vpop.f32.mrb[2].mxu0  ;;  %7122 = vmatpush3.bf16.msra.mxu0 %v7933_v40  ;;  %v7958_v40 = vld [vmem:[#allocation6 + $0xf8] sm:$0xff]  }
 0x245   : > { %v9420_v11 = vpop.f32.mrb[3].mxu0  ;;  %7123 = vmatprep.subr.bf16.mxu0 %v7934_v42 }
 0x246   : > { %6752 = vmatpush3.bf16.msra.mxu1 %v7950_v36 }
 0x247   : > { %7108 = vmatmul.mubr.bf16.gmra.mrb[92].mxu0 %v9165_v37  ;;  %4067 = vmatmul.mubr.bf16.gmra.mrb[92].mxu1 %v9195_v62  ;;  %v7939_v62 = vld [vmem:[#allocation7 + $0x88] sm:$0xff]  }
 0x248   : > { %7124 = vmatpush3.bf16.msra.mxu0 %v7934_v42  ;;  %4074 = vmatprep.mubr.bf16.mxu1 %v8262_v53 }
 0x249   : > { %7125 = vmatprep.subr.bf16.mxu0 %v7935_v25  ;;  %7127 = vmatprep.mubr.bf16.mxu0 %v933_v33 }
 0x24a   : > { %v9427_v14 = vpop.f32.mrb[4].mxu0  ;;  %6753 = vmatprep.subr.bf16.mxu1 %v7952_v22 }
 0x24b   : > { %v9429_v24 = vpop.f32.mrb[5].mxu0  ;;  %6754 = vmatpush3.bf16.msra.mxu1 %v7953_v44 }
 0x24c   : > { %v9431_v61 = vpop.f32.mrb[6].mxu0  ;;  %7126 = vmatpush3.bf16.msra.mxu0 %v7935_v25  ;;  %6755 = vmatprep.subr.bf16.mxu1 %v7955_v20 }
 0x24d   : > { %v9433_v37 = vpop.f32.mrb[7].mxu0  ;;  %7143 = vmatprep.subr.bf16.mxu0 %v7938_v30 }
 0x24f   : > { %4075 = vmatmul.mubr.bf16.gmra.mrb[96].mxu1 %v9202_v18  ;;  %7128 = vmatmul.mubr.bf16.vlgmr.msra.gmra.mrb[80].mxu0 %v9247_v60  ;;  %v7945_v60 = vld [vmem:[#allocation7 + $0x98] sm:$0xff]  }
 0x250   : > { %7144 = vmatpush3.bf16.msra.mxu0 %v7938_v30  ;;  %4082 = vmatprep.mubr.bf16.mxu1 %v8263_v57 }
 0x251   : > { %7145 = vmatprep.subr.bf16.mxu0 %v7939_v62  ;;  %7131 = vmatprep.mubr.bf16.mxu0 %v9262_v26  ;;  %v8264_v26 = vld [vmem:[%s8857_s9 + $0xcc] ss:$16 sps:$4 sm:$0xff]  }
 0x252   : > { %v9439_v12 = vpop.f32.mrb[8].mxu0  ;;  %6756 = vmatpush3.bf16.msra.mxu1 %v7956_v34 }
 0x253   : > { %v9441_v19 = vpop.f32.mrb[9].mxu0  ;;  %6757 = vmatprep.subr.bf16.mxu1 %v7958_v40 }
 0x254   : > { %v9443_v42 = vpop.f32.mrb[10].mxu0  ;;  %7146 = vmatpush3.bf16.msra.mxu0 %v7939_v62 }
 0x255   : > { %v9445_v18 = vpop.f32.mrb[11].mxu0  ;;  %7147 = vmatprep.subr.bf16.mxu0 %v7942_v58 }
 0x256   : > { %6758 = vmatpush3.bf16.msra.mxu1 %v7959_v55 }
 0x257   : > { %4083 = vmatmul.mubr.bf16.gmra.mrb[100].mxu1 %v9209_v2  ;;  %7132 = vmatmul.mubr.bf16.gmra.mrb[84].mxu0 %v9276_v54  ;;  %v7951_v2 = vld [vmem:[#allocation7 + $0xa8] sm:$0xff]  }
 0x258   : > { %7148 = vmatpush3.bf16.msra.mxu0 %v7942_v58  ;;  %4090 = vmatprep.mubr.bf16.mxu1 %v8264_v26  ;;  %v8265_v54 = vld [vmem:[%s8857_s9 + $0xec] ss:$16 sps:$4 sm:$0xff]   ;;  %v7962_v58 = vld [vmem:[#allocation7 + $0xd0] sm:$0xff]  }
 0x259   : > { %7149 = vmatprep.subr.bf16.mxu0 %v7945_v60  ;;  %7135 = vmatprep.mubr.bf16.mxu0 %v9290_v49  ;;  %v7954_v49 = vld [vmem:[#allocation7 + $0xb0] sm:$0xff]  }
 0x25a   : > { %v9451_v36 = vpop.f32.mrb[12].mxu0 }
 0x25b   : > { %v9453_v25 = vpop.f32.mrb[13].mxu0 }
 0x25c   : > { %v9455_v33 = vpop.f32.mrb[14].mxu0  ;;  %7150 = vmatpush3.bf16.msra.mxu0 %v7945_v60 }
 0x25d   : > { %v9457_v22 = vpop.f32.mrb[15].mxu0  ;;  %7151 = vmatprep.subr.bf16.mxu0 %v7948_v52 }
 0x25f   : > { %4091 = vmatmul.mubr.bf16.gmra.mrb[104].mxu1 %v9216_v13  ;;  %7136 = vmatmul.mubr.bf16.gmra.mrb[88].mxu0 %v9304_v29  ;;  %v7957_v13 = vld [vmem:[#allocation7 + $0xb8] sm:$0xff]   ;;  %v8266_v29 = vld [vmem:[%s8857_s9 + $0x44] ss:$16 sps:$4 sm:$0xff]  }
 0x260   : > { %7152 = vmatpush3.bf16.msra.mxu0 %v7948_v52  ;;  %4098 = vmatprep.mubr.bf16.mxu1 %v8265_v54  ;;  %v9494_v52 = vld [vmem:[%s8857_s9 + $0x124] ss:$16 sps:$4 sm:$0xff]  }
 0x261   : > { %7153 = vmatprep.subr.bf16.mxu0 %v7951_v2  ;;  %7139 = vmatprep.mubr.bf16.mxu0 %v9319_v16  ;;  %v7960_v16 = vld [vmem:[#allocation7 + $0xc0] sm:$0xff]   ;;  %v687_v54 = vshrl.u32 %v9494_v52, 16 }
 0x262   : > { %v9463_v44 = vpop.f32.mrb[16].mxu0 }
 0x263   : > { %v9465_v53 = vpop.f32.mrb[17].mxu0 }
 0x264   : > { %v9467_v20 = vpop.f32.mrb[18].mxu0  ;;  %7154 = vmatpush3.bf16.msra.mxu0 %v7951_v2  ;;  %v7963_v2 = vld [vmem:[#allocation7 + $0xd8] sm:$0xff]  }
 0x265   : > { %10049 = vst [vmem:[#allocation23_spill] sm:$0xff] %v9467_v20  ;;  %v9469_v30 = vpop.f32.mrb[19].mxu0  ;;  %7155 = vmatprep.subr.bf16.mxu0 %v7954_v49 }
 0x267   : > { %4099 = vmatmul.mubr.bf16.gmra.mrb[108].mxu1 %v9223_v17  ;;  %7140 = vmatmul.mubr.bf16.gmra.mrb[92].mxu0 %v9336_v39  ;;  %v7961_v17 = vld [vmem:[#allocation7 + $0xc8] sm:$0xff]   ;;  %v8268_v39 = vld [vmem:[%s8857_s9 + $0x64] ss:$16 sps:$4 sm:$0xff]  }
 0x268   : > { %7156 = vmatpush3.bf16.msra.mxu0 %v7954_v49  ;;  %7159 = vmatprep.mubr.bf16.mxu0 %v8886_v48  ;;  %v8267_v48 = vld [vmem:[%s8857_s9 + $0x40] ss:$16 sps:$4 sm:$0xff]   ;;  %v8270_v49 = vld [vmem:[%s8857_s9 + $0x84] ss:$16 sps:$4 sm:$0xff]  }
 0x269   : > { %7157 = vmatprep.subr.bf16.mxu0 %v7957_v13  ;;  %4626 = vmatprep.mubr.bf16.mxu1 %v8266_v29 }
 0x26a   : > { %v9475_v62 = vpop.f32.mrb[20].mxu0 }
 0x26b   : > { %v9477_v34 = vpop.f32.mrb[21].mxu0 }
 0x26c   : > { %v9479_v40 = vpop.f32.mrb[22].mxu0  ;;  %7158 = vmatpush3.bf16.msra.mxu0 %v7957_v13  ;;  %v7964_v13 = vld [vmem:[#allocation7 + $0xe0] sm:$0xff]  }
 0x26d   : > { %v9481_v57 = vpop.f32.mrb[23].mxu0  ;;  %7175 = vmatprep.subr.bf16.mxu0 %v7960_v16 }
 0x26f   : > { %7160 = vmatmul.mubr.bf16.vlgmr.msra.gmra.mrb[32].mxu0 %v8892_v56  ;;  %4627 = vmatmul.mubr.bf16.vlgmr.msra.gmra.mrb[112].mxu1 %v8267_v48  ;;  %v690_v48 = vshll.u32 %v9494_v52, 16 }
 0x270   : > { %7176 = vmatpush3.bf16.msra.mxu0 %v7960_v16  ;;  %7163 = vmatprep.mubr.bf16.mxu0 %v8906_v3  ;;  %v8269_v3 = vld [vmem:[%s8857_s9 + $0x60] ss:$16 sps:$4 sm:$0xff]  }
 0x271   : > { %7177 = vmatprep.subr.bf16.mxu0 %v7961_v17  ;;  %4634 = vmatprep.mubr.bf16.mxu1 %v8268_v39 }
 0x272   : > { %v9487_v55 = vpop.f32.mrb[24].mxu0 }
 0x273   : > { %10050 = vst [vmem:[#allocation24_spill] sm:$0xff] %v9487_v55  ;;  %v9489_v60 = vpop.f32.mrb[25].mxu0  ;;  %v7983_v55 = vld [vmem:[#allocation10 + $0x70] sm:$0xff]  }
 0x274   : > { %v9491_v26 = vpop.f32.mrb[26].mxu0  ;;  %7178 = vmatpush3.bf16.msra.mxu0 %v7961_v17 }
 0x275   : > { %10051 = vst [vmem:[#allocation25_spill] sm:$0xff] %v9491_v26  ;;  %v9496_v56 = vpop.f32.mrb[27].mxu0  ;;  %7179 = vmatprep.subr.bf16.mxu0 %v7962_v58 }
 0x277   : > { %7164 = vmatmul.mubr.bf16.gmra.mrb[36].mxu0 %v8914_v15  ;;  %4635 = vmatmul.mubr.bf16.gmra.mrb[116].mxu1 %v8269_v3  ;;  %v689_v15 = vrot.slane %v687_v54, 7 }
 0x278   : > { %7180 = vmatpush3.bf16.msra.mxu0 %v7962_v58  ;;  %7167 = vmatprep.mubr.bf16.mxu0 %v8926_v23  ;;  %v7965_v23 = vld [vmem:[#allocation7 + $0xe8] sm:$0xff]   ;;  %v8271_v58 = vld [vmem:[%s8857_s9 + $0x80] ss:$16 sps:$4 sm:$0xff]  }
 0x279   : > { %7181 = vmatprep.subr.bf16.mxu0 %v7963_v2  ;;  %4642 = vmatprep.mubr.bf16.mxu1 %v8270_v49  ;;  %v692_v3 = vor.u32 %v690_v48, %v689_v15  ;;  %v8272_v49 = vld [vmem:[%s8857_s9 + $0xa4] ss:$16 sps:$4 sm:$0xff]   ;;  %v7970_v48 = vld [vmem:[%s8857_s9 + $0x120] ss:$16 sps:$4 sm:$0xff]  }
 0x27a   : > { %v9503_v29 = vpop.f32.mrb[28].mxu0  ;;  %v10054_v15 = vld [vmem:[#allocation18_spill] sm:$0xff] }
 0x27b   : > { %10052 = vst [vmem:[#allocation26_spill] sm:$0xff] %v9503_v29  ;;  %v9505_v16 = vpop.f32.mrb[29].mxu0  ;;  %v731_v54 = vsel %vm8868_vm2, 0, %v692_v3  ;;  %v8278_v3 = vld [vmem:[%s8857_s9 + $0x104] ss:$16 sps:$4 sm:$0xff]  }
 0x27c   : > { %v9507_v17 = vpop.f32.mrb[30].mxu0  ;;  %7182 = vmatpush3.bf16.msra.mxu0 %v7963_v2  ;;  %v7968_v2 = vld [vmem:[#allocation7 + $0xf0] sm:$0xff]  }
 0x27d   : > { %10053 = vst [vmem:[#allocation27_spill] sm:$0xff] %v9507_v17  ;;  %v9510_v39 = vpop.f32.mrb[31].mxu0  ;;  %7183 = vmatprep.subr.bf16.mxu0 %v7964_v13  ;;  %v7969_v17 = vld [vmem:[#allocation7 + $0xf8] sm:$0xff]  }
 0x27f   : > { %7168 = vmatmul.mubr.bf16.gmra.mrb[40].mxu0 %v8937_v38  ;;  %4643 = vmatmul.mubr.bf16.gmra.mrb[120].mxu1 %v8271_v58  ;;  %v8273_v38 = vld [vmem:[%s8857_s9 + $0xa0] ss:$16 sps:$4 sm:$0xff]  }
 0x280   : > { %7184 = vmatpush3.bf16.msra.mxu0 %v7964_v13  ;;  %7171 = vmatprep.mubr.bf16.mxu0 %v8942_v41  ;;  %v8274_v41 = vld [vmem:[%s8857_s9 + $0xc4] ss:$16 sps:$4 sm:$0xff]   ;;  %v8275_v13 = vld [vmem:[%s8857_s9 + $0xc0] ss:$16 sps:$4 sm:$0xff]  }
 0x281   : > { %7185 = vmatprep.subr.bf16.mxu0 %v7965_v23  ;;  %4650 = vmatprep.mubr.bf16.mxu1 %v8272_v49  ;;  %v10055_v58 = vld [vmem:[#allocation19_spill] sm:$0xff]  ;;  %v10056_v49 = vld [vmem:[#allocation20_spill] sm:$0xff] }
 0x284   : > { %7186 = vmatpush3.bf16.msra.mxu0 %v7965_v23  ;;  %v8277_v23 = vld [vmem:[%s8857_s9 + $0xe0] ss:$16 sps:$4 sm:$0xff]  }
 0x285   : > { %7187 = vmatprep.subr.bf16.mxu0 %v7968_v2 }
 0x287   : > { %7172 = vmatmul.mubr.bf16.gmra.mrb[44].mxu0 %v731_v54  ;;  %4651 = vmatmul.mubr.bf16.gmra.mrb[124].mxu1 %v8273_v38  ;;  %v8279_v54 = vld [vmem:[%s8857_s9 + $0x100] ss:$16 sps:$4 sm:$0xff]  }
 0x288   : > { %7188 = vmatpush3.bf16.msra.mxu0 %v7968_v2  ;;  %4658 = vmatprep.mubr.bf16.mxu1 %v8274_v41  ;;  %v10057_v38 = vld [vmem:[#allocation21_spill] sm:$0xff] }
 0x289   : > { %7189 = vmatprep.subr.bf16.mxu0 %v7969_v17  ;;  %7191 = vmatprep.mubr.bf16.mxu0 %v9024_v5  ;;  %v908_v5 = vshll.u32 %v7970_v48, 16 }
 0x28b   : > { %v910_v2 = vrot.slane %v908_v5, 1 }
 0x28c   : > { %7190 = vmatpush3.bf16.msra.mxu0 %v7969_v17  ;;  %v906_v17 = vshrl.u32 %v7970_v48, 16 }
 0x28e   : > { %v911_v41 = vor.u32 %v910_v2, %v906_v17  ;;  %v7971_v17 = vld [vmem:[#allocation10 + $0x40] sm:$0xff]  }
 0x28f   : > { %4659 = vmatmul.mubr.bf16.gmra.mrb[128].mxu1 %v8275_v13  ;;  %7192 = vmatmul.mubr.bf16.vlgmr.msra.gmra.mrb[32].mxu0 %v9029_v59  ;;  %v10058_v59 = vld [vmem:[#allocation22_spill] sm:$0xff] }
 0x290   : > { %4666 = vmatprep.mubr.bf16.mxu1 %v8276_v28  ;;  %7195 = vmatprep.mubr.bf16.mxu0 %v10054_v15 }
 0x291   : > { %6823 = vmatprep.subr.bf16.mxu0 %v7971_v17 }
 0x297   : > { %4667 = vmatmul.mubr.bf16.gmra.mrb[132].mxu1 %v8277_v23  ;;  %7196 = vmatmul.mubr.bf16.gmra.mrb[36].mxu0 %v10055_v58  ;;  %v950_v58 = vsel %vm9000_vm5, %v911_v41, 0  ;;  %v7974_v41 = vld [vmem:[#allocation10 + $0x8] sm:$0xff]  }
 0x298   : > { %4674 = vmatprep.mubr.bf16.mxu1 %v8278_v3  ;;  %7199 = vmatprep.mubr.bf16.mxu0 %v10056_v49 }
 0x29f   : > { %4675 = vmatmul.mubr.bf16.gmra.mrb[136].mxu1 %v8279_v54  ;;  %7200 = vmatmul.mubr.bf16.gmra.mrb[40].mxu0 %v10057_v38 }
 0x2a0   : > { %4682 = vmatprep.mubr.bf16.mxu1 %v9494_v52  ;;  %7203 = vmatprep.mubr.bf16.mxu0 %v10058_v59 }
 0x2a2   : > { %v6567_v13 = vpop.f32.mrb[48].mxu0 }
 0x2a3   : > { %v6568_v28 = vpop.f32.mrb[49].mxu0 }
 0x2a4   : > { %v9534_v15 = vadd.f32 %v6568_v28, %v6567_v13  ;;  %v6570_v23 = vpop.f32.mrb[50].mxu0  ;;  %v7972_v13 = vld [vmem:[#allocation10] sm:$0xff]   ;;  %v7973_v28 = vld [vmem:[#allocation10 + $0x48] sm:$0xff]  }
 0x2a5   : > { %v6571_v3 = vpop.f32.mrb[51].mxu0  ;;  %6824 = vmatpush3.bf16.msra.mxu0 %v7972_v13  ;;  %v7978_v13 = vld [vmem:[#allocation10 + $0x18] sm:$0xff]  }
 0x2a6   : > { %10059 = vst [vmem:[#allocation18_spill] sm:$0xff] %v9534_v15  ;;  %v9538_v49 = vadd.f32 %v6571_v3, %v6570_v23  ;;  %6825 = vmatprep.subr.bf16.mxu0 %v7973_v28  ;;  %v4887_v3 = vlaneseq }
 0x2a7   : > { %4683 = vmatmul.mubr.bf16.gmra.mrb[140].mxu1 %v7970_v48  ;;  %7204 = vmatmul.mubr.bf16.gmra.mrb[44].mxu0 %v950_v58 }
 0x2a8   : > { %10060 = vst [vmem:[#allocation19_spill] sm:$0xff] %v9538_v49 }
 0x2a9   : > { %6826 = vmatpush3.bf16.msra.mxu0 %v7974_v41 }
 0x2aa   : > { %v6573_v5 = vpop.f32.mrb[52].mxu0 }
 0x2ab   : > { %v6574_v54 = vpop.f32.mrb[53].mxu0 }
 0x2ac   : > { %v9540_v38 = vadd.f32 %v6574_v54, %v6573_v5  ;;  %v6576_v52 = vpop.f32.mrb[54].mxu0  ;;  %v7975_v5 = vld [vmem:[#allocation10 + $0x50] sm:$0xff]  }
 0x2ad   : > { %v6577_v59 = vpop.f32.mrb[55].mxu0  ;;  %6827 = vmatprep.subr.bf16.mxu0 %v7975_v5 }
 0x2ae   : > { %10061 = vst [vmem:[#allocation20_spill] sm:$0xff] %v9540_v38  ;;  %v9542_v2 = vadd.f32 %v6577_v59, %v6576_v52  ;;  %v7976_v38 = vld [vmem:[#allocation10 + $0x10] sm:$0xff]   ;;  %v9548_v52 = vshrl.u32 %v4887_v3, 7  ;;  %v7977_v59 = vld [vmem:[#allocation10 + $0x58] sm:$0xff]   ;;  %v7980_v3 = vld [vmem:[#allocation10 + $0x20] sm:$0xff]  }
 0x2af   : > { %6828 = vmatpush3.bf16.msra.mxu0 %v7976_v38 }
 0x2b0   : > { %10062 = vst [vmem:[#allocation21_spill] sm:$0xff] %v9542_v2  ;;  %6829 = vmatprep.subr.bf16.mxu0 %v7977_v59  ;;  %v4893_v41 = vsub.s32 1, %v9548_v52  ;;  %v4897_v38 = vsub.s32 2, %v9548_v52 }
 0x2b2   : > { %v6579_v45 = vpop.f32.mrb[56].mxu0 }
 0x2b3   : > { %v6580_v15 = vpop.f32.mrb[57].mxu0  ;;  %6830 = vmatpush3.bf16.msra.mxu0 %v7978_v13 }
 0x2b4   : > { %v9544_v23 = vadd.f32 %v6580_v15, %v6579_v45  ;;  %v6582_v48 = vpop.f32.mrb[58].mxu0 }
 0x2b5   : > { %v6583_v58 = vpop.f32.mrb[59].mxu0 }
 0x2b6   : > { %10063 = vst [vmem:[#allocation22_spill] sm:$0xff] %v9544_v23  ;;  %v9546_v54 = vadd.f32 %v6583_v58, %v6582_v48  ;;  %v7979_v23 = vld [vmem:[#allocation10 + $0x60] sm:$0xff]   ;;  %v9555_v58 = vld [vmem:[#allocation9] sm:$0xf] }
 0x2b7   : > { %6831 = vmatprep.subr.bf16.mxu0 %v7979_v23  ;;  %v9559_v5 = vrot.slane %v9555_v58, %v4893_v41  ;;  %v9562_v13 = vrot.slane %v9555_v58, %v4897_v38 }
 0x2b8   : > { %10064 = vst [vmem:[#allocation28_spill] sm:$0xff] %v9546_v54  ;;  %6832 = vmatpush3.bf16.msra.mxu0 %v7980_v3 }
 0x2ba   : > { %v6585_v17 = vpop.f32.mrb[60].mxu0 }
 0x2bb   : > { %v6586_v2 = vpop.f32.mrb[61].mxu0 }
 0x2bc   : > { %v9550_v28 = vadd.f32 %v6586_v2, %v6585_v17  ;;  %v6588_v15 = vpop.f32.mrb[62].mxu0  ;;  %v7981_v2 = vld [vmem:[#allocation10 + $0x68] sm:$0xff]  }
 0x2bd   : > { %v6589_v45 = vpop.f32.mrb[63].mxu0  ;;  %6833 = vmatprep.subr.bf16.mxu0 %v7981_v2 }
 0x2be   : > { %10065 = vst [vmem:[#allocation29_spill] sm:$0xff] %v9550_v28  ;;  %v9553_v48 = vadd.f32 %v6589_v45, %v6588_v15  ;;  %v7982_v28 = vld [vmem:[#allocation10 + $0x28] sm:$0xff]  }
 0x2bf   : > { %6834 = vmatpush3.bf16.msra.mxu0 %v7982_v28 }
 0x2c0   : > { %10066 = vst [vmem:[#allocation30_spill] sm:$0xff] %v9553_v48  ;;  %6835 = vmatprep.subr.bf16.mxu0 %v7983_v55 }
 0x2c2   : > { %v6591_v59 = vpop.f32.mrb[64].mxu0  ;;  %v3447_v17 = vpop.f32.mrb[48].mxu1 }
 0x2c3   : > { %v3671_v15 = vadd.f32 %v3447_v17, %v9416_v35  ;;  %v6592_v45 = vpop.f32.mrb[65].mxu0  ;;  %v3449_v48 = vpop.f32.mrb[49].mxu1 }
 0x2c4   : > { %v9565_v54 = vadd.f32 %v6592_v45, %v6591_v59  ;;  %v3687_v23 = vadd.f32 %v9349_v9, %v3449_v48  ;;  %v6594_v3 = vpop.f32.mrb[66].mxu0  ;;  %v3451_v49 = vpop.f32.mrb[50].mxu1  ;;  %v7984_v59 = vld [vmem:[#allocation10 + $0x30] sm:$0xff]  }
 0x2c5   : > { %v4908_v41 = vadd.f32 %v9559_v5, %v3671_v15  ;;  %v3672_v26 = vadd.f32 %v3451_v49, %v9420_v11  ;;  %v6595_v29 = vpop.f32.mrb[67].mxu0  ;;  %v3453_v38 = vpop.f32.mrb[51].mxu1  ;;  %6836 = vmatpush3.bf16.msra.mxu0 %v7984_v59  ;;  %v7985_v49 = vld [vmem:[#allocation10 + $0x78] sm:$0xff]  }
 0x2c6   : > { %v4909_v20 = vadd.f32 %v9562_v13, %v3687_v23  ;;  %v9571_v35 = vadd.f32 %v6595_v29, %v6594_v3  ;;  %v3688_v2 = vadd.f32 %v9359_v8, %v3453_v38  ;;  %v7986_v29 = vld [vmem:[#allocation10 + $0x38] sm:$0xff]   ;;  %6837 = vmatprep.subr.bf16.mxu0 %v7985_v49 }
 0x2c7   : > { %v6341_v17 = vmul.f32 -1.442695, %v4908_v41  ;;  %v4912_v9 = vadd.f32 %v9559_v5, %v3672_v26 }
 0x2c8   : > { %v6342_v48 = vmul.f32 -1.442695, %v4909_v20  ;;  %v4913_v28 = vadd.f32 %v9562_v13, %v3688_v2 }
 0x2c9   : > { %8003 = vpow2.f32 %v6341_v17  ;;  %v6345_v11 = vmul.f32 -1.442695, %v4912_v9  ;;  %6838 = vmatpush3.bf16.msra.mxu0 %v7986_v29 }
 0x2ca   : > { %8005 = vpow2.f32 %v6342_v48  ;;  %v6346_v15 = vmul.f32 -1.442695, %v4913_v28  ;;  %v6597_v45 = vpop.f32.mrb[68].mxu0  ;;  %v3457_v23 = vpop.f32.mrb[52].mxu1 }
 0x2cb   : > { %8007 = vpow2.f32 %v6345_v11  ;;  %v3673_v8 = vadd.f32 %v3457_v23, %v9429_v24  ;;  %v6598_v3 = vpop.f32.mrb[69].mxu0  ;;  %v3459_v41 = vpop.f32.mrb[53].mxu1 }
 0x2cc   : > { %8009 = vpow2.f32 %v6346_v15  ;;  %v9577_v55 = vadd.f32 %v6598_v3, %v6597_v45  ;;  %v3689_v20 = vadd.f32 %v9346_v6, %v3459_v41  ;;  %v6600_v26 = vpop.f32.mrb[70].mxu0  ;;  %v3461_v38 = vpop.f32.mrb[54].mxu1 }
 0x2cd   : > { %v4916_v2 = vadd.f32 %v9559_v5, %v3673_v8  ;;  %v3674_v59 = vadd.f32 %v3461_v38, %v9433_v37  ;;  %v6601_v17 = vpop.f32.mrb[71].mxu0  ;;  %v3463_v9 = vpop.f32.mrb[55].mxu1 }
 0x2ce   : > { %v4917_v48 = vadd.f32 %v9562_v13, %v3689_v20  ;;  %v9583_v24 = vadd.f32 %v6601_v17, %v6600_v26  ;;  %v3690_v28 = vadd.f32 %v9354_v0, %v3463_v9 }
 0x2cf   : > { %v6349_v11 = vmul.f32 -1.442695, %v4916_v2  ;;  %v4920_v49 = vadd.f32 %v9559_v5, %v3674_v59 }
 0x2d0   : > { %v6350_v15 = vmul.f32 -1.442695, %v4917_v48  ;;  %v4921_v6 = vadd.f32 %v9562_v13, %v3690_v28 }
 0x2d1   : > { %8011 = vpow2.f32 %v6349_v11  ;;  %v6353_v45 = vmul.f32 -1.442695, %v4920_v49 }
 0x2d2   : > { %8013 = vpow2.f32 %v6350_v15  ;;  %v6354_v23 = vmul.f32 -1.442695, %v4921_v6  ;;  %v6603_v29 = vpop.f32.mrb[72].mxu0  ;;  %v3467_v37 = vpop.f32.mrb[56].mxu1 }
 0x2d3   : > { %v8004_v8 = vpop.eup %8003  ;;  %8015 = vpow2.f32 %v6353_v45  ;;  %v3675_v3 = vadd.f32 %v3467_v37, %v9441_v19  ;;  %v6604_v41 = vpop.f32.mrb[73].mxu0 }
 0x2d4   : > { %v3469_v20 = vpop.f32.mrb[57].mxu1  ;;  %v8006_v26 = vpop.eup %8005  ;;  %v5164_v0 = vadd.f32 1.0, %v8004_v8  ;;  %8017 = vpow2.f32 %v6354_v23  ;;  %v9589_v38 = vadd.f32 %v6604_v41, %v6603_v29 }
 0x2d5   : > { %v3691_v2 = vadd.f32 %v9368_v27, %v3469_v20  ;;  %v6606_v59 = vpop.f32.mrb[74].mxu0  ;;  %v3471_v17 = vpop.f32.mrb[58].mxu1  ;;  %v5165_v48 = vadd.f32 1.0, %v8006_v26  ;;  %v4924_v28 = vadd.f32 %v9559_v5, %v3675_v3 }
 0x2d6   : > { %v8008_v9 = vpop.eup %8007  ;;  %v3676_v11 = vadd.f32 %v3471_v17, %v9445_v18  ;;  %v6607_v49 = vpop.f32.mrb[75].mxu0  ;;  %8019 = vrcp.f32 %v5164_v0  ;;  %v7987_v0 = vld [vmem:[#allocation10 + $0xc0] sm:$0xff]  }
 0x2d7   : > { %v3473_v15 = vpop.f32.mrb[59].mxu1  ;;  %v8010_v19 = vpop.eup %8009  ;;  %v5168_v6 = vadd.f32 1.0, %v8008_v9  ;;  %v4925_v45 = vadd.f32 %v9562_v13, %v3691_v2  ;;  %v9595_v23 = vadd.f32 %v6607_v49, %v6606_v59  ;;  %8021 = vrcp.f32 %v5165_v48  ;;  %v7988_v2 = vld [vmem:[#allocation10 + $0x80] sm:$0xff]   ;;  %v7989_v59 = vld [vmem:[#allocation10 + $0xc8] sm:$0xff]   ;;  %6887 = vmatprep.subr.bf16.mxu1 %v7987_v0  ;;  %v7991_v0 = vld [vmem:[#allocation10 + $0xd0] sm:$0xff]  }
 0x2d8   : > { %v5169_v29 = vadd.f32 1.0, %v8010_v19  ;;  %v6357_v27 = vmul.f32 -1.442695, %v4924_v28  ;;  %v4928_v37 = vadd.f32 %v9559_v5, %v3676_v11  ;;  %v3692_v3 = vadd.f32 %v9374_v10, %v3473_v15  ;;  %6888 = vmatpush3.bf16.msra.mxu1 %v7988_v2 }
 0x2d9   : > { %8023 = vrcp.f32 %v5168_v6  ;;  %v6358_v8 = vmul.f32 -1.442695, %v4925_v45  ;;  %6889 = vmatprep.subr.bf16.mxu1 %v7989_v59 }
 0x2da   : > { %8025 = vrcp.f32 %v5169_v29  ;;  %v6361_v18 = vmul.f32 -1.442695, %v4928_v37  ;;  %v4929_v41 = vadd.f32 %v9562_v13, %v3692_v3  ;;  %v6609_v20 = vpop.f32.mrb[76].mxu0  ;;  %v3477_v26 = vpop.f32.mrb[60].mxu1 }
 0x2db   : > { %8027 = vpow2.f32 %v6357_v27  ;;  %v8012_v17 = vpop.eup %8011  ;;  %v3677_v9 = vadd.f32 %v3477_v26, %v9453_v25  ;;  %v6610_v48 = vpop.f32.mrb[77].mxu0  ;;  %v7990_v26 = vld [vmem:[#allocation10 + $0x88] sm:$0xff]  }
 0x2dc   : > { %8029 = vpow2.f32 %v6358_v8  ;;  %v3479_v28 = vpop.f32.mrb[61].mxu1  ;;  %v8014_v11 = vpop.eup %8013  ;;  %v5172_v49 = vadd.f32 1.0, %v8012_v17  ;;  %v6362_v10 = vmul.f32 -1.442695, %v4929_v41  ;;  %v9601_v15 = vadd.f32 %v6610_v48, %v6609_v20  ;;  %6890 = vmatpush3.bf16.msra.mxu1 %v7990_v26 }
 0x2dd   : > { %8031 = vpow2.f32 %v6361_v18  ;;  %v6612_v19 = vpop.f32.mrb[78].mxu0  ;;  %v3481_v6 = vpop.f32.mrb[62].mxu1  ;;  %v5173_v29 = vadd.f32 1.0, %v8014_v11  ;;  %v4932_v27 = vadd.f32 %v9559_v5, %v3677_v9  ;;  %v3693_v37 = vadd.f32 %v9362_v43, %v3479_v28  ;;  %6891 = vmatprep.subr.bf16.mxu1 %v7991_v0 }
 0x2de   : > { %v8016_v45 = vpop.eup %8015  ;;  %v3678_v8 = vadd.f32 %v3481_v6, %v9457_v22  ;;  %v6613_v25 = vpop.f32.mrb[79].mxu0  ;;  %8033 = vrcp.f32 %v5172_v49 }
 0x2df   : > { %v3483_v3 = vpop.f32.mrb[63].mxu1  ;;  %v8018_v17 = vpop.eup %8017  ;;  %v5176_v18 = vadd.f32 1.0, %v8016_v45  ;;  %v9606_v41 = vadd.f32 %v6613_v25, %v6612_v19  ;;  %8035 = vrcp.f32 %v5173_v29  ;;  %v6365_v9 = vmul.f32 -1.442695, %v4932_v27  ;;  %v7992_v19 = vld [vmem:[#allocation10 + $0x90] sm:$0xff]   ;;  %v7993_v29 = vld [vmem:[#allocation10 + $0xd8] sm:$0xff]  }
 0x2e0   : > { %v3694_v20 = vadd.f32 %v9371_v63, %v3483_v3  ;;  %v5177_v48 = vadd.f32 1.0, %v8018_v17  ;;  %v4933_v43 = vadd.f32 %v9562_v13, %v3693_v37  ;;  %v8020_v28 = vpop.eup %8019  ;;  %v4936_v22 = vadd.f32 %v9559_v5, %v3678_v8  ;;  %6892 = vmatpush3.bf16.msra.mxu1 %v7992_v19 }
 0x2e1   : > { %8037 = vrcp.f32 %v5176_v18  ;;  %v9612_v11 = vpop.eup %8021  ;;  %6893 = vmatprep.subr.bf16.mxu1 %v7993_v29 }
 0x2e2   : > { %v4937_v2 = vadd.f32 %v9562_v13, %v3694_v20  ;;  %8039 = vrcp.f32 %v5177_v48  ;;  %v6366_v49 = vmul.f32 -1.442695, %v4933_v43  ;;  %v6369_v59 = vmul.f32 -1.442695, %v4936_v22  ;;  %v3487_v45 = vpop.f32.mrb[64].mxu1 }
 0x2e3   : > { %v8024_v63 = vpop.eup %8023  ;;  %8041 = vpow2.f32 %v6362_v10  ;;  %v3679_v37 = vadd.f32 %v3487_v45, %v9465_v53  ;;  %v3489_v8 = vpop.f32.mrb[65].mxu1  ;;  %v7994_v53 = vld [vmem:[#allocation10 + $0x98] sm:$0xff]  }
 0x2e4   : > { %v6370_v6 = vmul.f32 -1.442695, %v4937_v2  ;;  %v9614_v27 = vpop.eup %8025  ;;  %8043 = vpow2.f32 %v6365_v9  ;;  %v5356_v25 = vpack.c.bf16 %v8024_v63, %v8020_v28  ;;  %v3695_v17 = vadd.f32 %v9384_v51, %v3489_v8  ;;  %v3491_v26 = vpop.f32.mrb[66].mxu1  ;;  %6894 = vmatpush3.bf16.msra.mxu1 %v7994_v53 }
 0x2e5   : > { %v8028_v3 = vpop.eup %8027  ;;  %8045 = vpow2.f32 %v6366_v49  ;;  %v4940_v0 = vadd.f32 %v9559_v5, %v3679_v37  ;;  %v3680_v48 = vadd.f32 %v3491_v26, %v9469_v30  ;;  %v3493_v9 = vpop.f32.mrb[67].mxu1 }
 0x2e6   : > { %v8030_v18 = vpop.eup %8029  ;;  %v5180_v20 = vadd.f32 1.0, %v8028_v3  ;;  %8047 = vpow2.f32 %v6369_v59  ;;  %5682 = vmatprep.mubr.bf16.mxu0 %v5356_v25  ;;  %v4941_v28 = vadd.f32 %v9562_v13, %v3695_v17  ;;  %v3696_v51 = vadd.f32 %v9390_v50, %v3493_v9 }
 0x2e7   : > { %v8032_v43 = vpop.eup %8031  ;;  %8049 = vpow2.f32 %v6370_v6  ;;  %v6373_v2 = vmul.f32 -1.442695, %v4940_v0  ;;  %v4944_v49 = vadd.f32 %v9559_v5, %v3680_v48  ;;  %v5181_v37 = vadd.f32 1.0, %v8030_v18  ;;  %v8002_v18 = vld [vmem:[#allocation10 + $0xb8] sm:$0xff]  }
 0x2e8   : > { %v5184_v22 = vadd.f32 1.0, %v8032_v43  ;;  %v9625_v63 = vpop.eup %8033  ;;  %8051 = vrcp.f32 %v5180_v20  ;;  %v6374_v59 = vmul.f32 -1.442695, %v4941_v28  ;;  %v4945_v30 = vadd.f32 %v9562_v13, %v3696_v51 }
 0x2e9   : > { %v9628_v45 = vpop.eup %8035  ;;  %v6377_v19 = vmul.f32 -1.442695, %v4944_v49 }
 0x2ea   : > { %10067 = vst [vmem:[#allocation31_spill] sm:$0xff] %v9628_v45  ;;  %8053 = vrcp.f32 %v5184_v22  ;;  %v6378_v50 = vmul.f32 -1.442695, %v4945_v30  ;;  %v3497_v29 = vpop.f32.mrb[68].mxu1 }
 0x2eb   : > { %v9630_v6 = vpop.eup %8037  ;;  %8055 = vpow2.f32 %v6373_v2  ;;  %v3681_v25 = vadd.f32 %v3497_v29, %v9477_v34  ;;  %v3499_v3 = vpop.f32.mrb[69].mxu1 }
 0x2ec   : > { %v9632_v8 = vpop.eup %8039  ;;  %8057 = vpow2.f32 %v6374_v59  ;;  %v3697_v20 = vadd.f32 %v9381_v32, %v3499_v3  ;;  %v3501_v0 = vpop.f32.mrb[70].mxu1 }
 0x2ed   : > { %v8042_v26 = vpop.eup %8041  ;;  %8059 = vpow2.f32 %v6377_v19  ;;  %v4948_v53 = vadd.f32 %v9559_v5, %v3681_v25  ;;  %v3682_v43 = vadd.f32 %v3501_v0, %v9481_v57  ;;  %v3503_v34 = vpop.f32.mrb[71].mxu1 }
 0x2ee   : > { %v8044_v48 = vpop.eup %8043  ;;  %v5185_v9 = vadd.f32 1.0, %v8042_v26  ;;  %8061 = vpow2.f32 %v6378_v50  ;;  %v4949_v22 = vadd.f32 %v9562_v13, %v3697_v20  ;;  %v3698_v2 = vadd.f32 %v9387_v4, %v3503_v34 }
 0x2ef   : > { %v8046_v28 = vpop.eup %8045  ;;  %8063 = vrcp.f32 %v5181_v37  ;;  %v5188_v51 = vadd.f32 1.0, %v8044_v48  ;;  %v4952_v59 = vadd.f32 %v9559_v5, %v3682_v43  ;;  %v6381_v50 = vmul.f32 -1.442695, %v4948_v53 }
 0x2f0   : > { %v8048_v32 = vpop.eup %8047  ;;  %8065 = vrcp.f32 %v5185_v9  ;;  %v5189_v49 = vadd.f32 1.0, %v8046_v28  ;;  %v6382_v57 = vmul.f32 -1.442695, %v4949_v22  ;;  %v4953_v4 = vadd.f32 %v9562_v13, %v3698_v2 }
 0x2f1   : > { %v8050_v30 = vpop.eup %8049  ;;  %8067 = vrcp.f32 %v5188_v51  ;;  %v5192_v19 = vadd.f32 1.0, %v8048_v32  ;;  %v6385_v37 = vmul.f32 -1.442695, %v4952_v59 }
 0x2f2   : > { %8069 = vrcp.f32 %v5189_v49  ;;  %v5193_v29 = vadd.f32 1.0, %v8050_v30  ;;  %v9645_v25 = vpop.eup %8051  ;;  %v3507_v3 = vpop.f32.mrb[72].mxu1 }
 0x2f3   : > { %8071 = vrcp.f32 %v5192_v19  ;;  %v3683_v20 = vadd.f32 %v3507_v3, %v9489_v60  ;;  %v3509_v0 = vpop.f32.mrb[73].mxu1  ;;  %v6386_v19 = vmul.f32 -1.442695, %v4953_v4 }
 0x2f4   : > { %v9647_v26 = vpop.eup %8053  ;;  %8073 = vrcp.f32 %v5193_v29  ;;  %v3699_v9 = vadd.f32 %v9401_v21, %v3509_v0  ;;  %v3511_v53 = vpop.f32.mrb[74].mxu1  ;;  %v7995_v0 = vld [vmem:[#allocation10 + $0xe0] sm:$0xff]  }
 0x2f5   : > { %v8056_v48 = vpop.eup %8055  ;;  %8075 = vpow2.f32 %v6381_v50  ;;  %v4956_v51 = vadd.f32 %v9559_v5, %v3683_v20  ;;  %v3684_v22 = vadd.f32 %v3511_v53, %v9496_v56  ;;  %v3513_v32 = vpop.f32.mrb[75].mxu1  ;;  %6895 = vmatprep.subr.bf16.mxu1 %v7995_v0 }
 0x2f6   : > { %v8058_v34 = vpop.eup %8057  ;;  %v5196_v28 = vadd.f32 1.0, %v8056_v48  ;;  %8077 = vpow2.f32 %v6382_v57  ;;  %v4957_v60 = vadd.f32 %v9562_v13, %v3699_v9  ;;  %v3700_v59 = vadd.f32 %v9407_v1, %v3513_v32  ;;  %v7996_v48 = vld [vmem:[#allocation10 + $0xa0] sm:$0xff]  }
 0x2f7   : > { %v8060_v2 = vpop.eup %8059  ;;  %v5197_v49 = vadd.f32 1.0, %v8058_v34  ;;  %8079 = vpow2.f32 %v6385_v37  ;;  %v4960_v50 = vadd.f32 %v9559_v5, %v3684_v22  ;;  %v6389_v3 = vmul.f32 -1.442695, %v4956_v51  ;;  %6896 = vmatpush3.bf16.msra.mxu1 %v7996_v48 }
 0x2f8   : > { %v8062_v21 = vpop.eup %8061  ;;  %8081 = vrcp.f32 %v5196_v28  ;;  %v5200_v30 = vadd.f32 1.0, %v8060_v2  ;;  %v4961_v56 = vadd.f32 %v9562_v13, %v3700_v59  ;;  %v6390_v37 = vmul.f32 -1.442695, %v4957_v60 }
 0x2f9   : > { %v9659_v29 = vpop.eup %8063  ;;  %8083 = vrcp.f32 %v5197_v49  ;;  %v5201_v57 = vadd.f32 1.0, %v8062_v21  ;;  %v6393_v9 = vmul.f32 -1.442695, %v4960_v50 }
 0x2fa   : > { %10068 = vst [vmem:[#allocation32_spill] sm:$0xff] %v9659_v29  ;;  %v9662_v20 = vpop.eup %8065  ;;  %8085 = vrcp.f32 %v5200_v30  ;;  %v3517_v4 = vpop.f32.mrb[76].mxu1  ;;  %v6394_v28 = vmul.f32 -1.442695, %v4961_v56 }
 0x2fb   : > { %10069 = vst [vmem:[#allocation33_spill] sm:$0xff] %v9662_v20  ;;  %v9664_v1 = vpop.eup %8067  ;;  %8087 = vrcp.f32 %v5201_v57  ;;  %v3685_v51 = vadd.f32 %v3517_v4, %v9505_v16  ;;  %v3519_v22 = vpop.f32.mrb[77].mxu1 }
 0x2fc   : > { %v9668_v34 = vpop.eup %8069  ;;  %8089 = vpow2.f32 %v6386_v19  ;;  %v3701_v2 = vadd.f32 %v9398_v31, %v3519_v22  ;;  %v3521_v49 = vpop.f32.mrb[78].mxu1  ;;  %v8001_v31 = vld [vmem:[#allocation10 + $0xf8] sm:$0xff]  }
 0x2fd   : > { %10070 = vst [vmem:[#allocation34_spill] sm:$0xff] %v9668_v34  ;;  %v9671_v32 = vpop.eup %8071  ;;  %8091 = vpow2.f32 %v6389_v3  ;;  %v4964_v59 = vadd.f32 %v9559_v5, %v3685_v51  ;;  %v3686_v21 = vadd.f32 %v3521_v49, %v9510_v39  ;;  %v3523_v30 = vpop.f32.mrb[79].mxu1  ;;  %v7997_v51 = vld [vmem:[#allocation10 + $0xe8] sm:$0xff]  }
 0x2fe   : > { %v9674_v60 = vpop.eup %8073  ;;  %8093 = vpow2.f32 %v6390_v37  ;;  %v4965_v50 = vadd.f32 %v9562_v13, %v3701_v2  ;;  %v3702_v57 = vadd.f32 %v9404_v46, %v3523_v30  ;;  %v7998_v46 = vld [vmem:[#allocation10 + $0xa8] sm:$0xff]   ;;  %6897 = vmatprep.subr.bf16.mxu1 %v7997_v51 }
 0x2ff   : > { %10071 = vst [vmem:[#allocation35_spill] sm:$0xff] %v9674_v60  ;;  %v8076_v19 = vpop.eup %8075  ;;  %8095 = vpow2.f32 %v6393_v9  ;;  %v4968_v37 = vadd.f32 %v9559_v5, %v3686_v21  ;;  %v6397_v48 = vmul.f32 -1.442695, %v4964_v59  ;;  %6898 = vmatpush3.bf16.msra.mxu1 %v7998_v46 }
 0x300   : > { %v8078_v3 = vpop.eup %8077  ;;  %v5204_v56 = vadd.f32 1.0, %v8076_v19  ;;  %8097 = vpow2.f32 %v6394_v28  ;;  %v4969_v4 = vadd.f32 %v9562_v13, %v3702_v57  ;;  %v6398_v2 = vmul.f32 -1.442695, %v4965_v50 }
 0x301   : > { %v8080_v0 = vpop.eup %8079  ;;  %v5205_v39 = vadd.f32 1.0, %v8078_v3  ;;  %v6401_v30 = vmul.f32 -1.442695, %v4968_v37  ;;  %v7999_v3 = vld [vmem:[#allocation10 + $0xf0] sm:$0xff]  }
 0x302   : > { %v9686_v22 = vpop.eup %8081  ;;  %8099 = vrcp.f32 %v5204_v56  ;;  %v5208_v9 = vadd.f32 1.0, %v8080_v0  ;;  %v6663_v19 = vpop.f32.mrb[80].mxu1  ;;  %v6402_v5 = vmul.f32 -1.442695, %v4969_v4  ;;  %v8000_v0 = vld [vmem:[#allocation10 + $0xb0] sm:$0xff]   ;;  %6899 = vmatprep.subr.bf16.mxu1 %v7999_v3 }
 0x303   : > { %v9688_v49 = vpop.eup %8083  ;;  %8101 = vrcp.f32 %v5205_v39  ;;  %v6664_v59 = vpop.f32.mrb[81].mxu1  ;;  %6900 = vmatpush3.bf16.msra.mxu1 %v8000_v0 }
 0x304   : > { %10072 = vst [vmem:[#allocation36_spill] sm:$0xff] %v9688_v49  ;;  %v9690_v28 = vpop.eup %8085  ;;  %8103 = vrcp.f32 %v5208_v9  ;;  %v9694_v21 = vadd.f32 %v6664_v59, %v6663_v19  ;;  %v6666_v57 = vpop.f32.mrb[82].mxu1  ;;  %6901 = vmatprep.subr.bf16.mxu1 %v8001_v31 }
 0x305   : > { %v9692_v13 = vpop.eup %8087  ;;  %8105 = vpow2.f32 %v6397_v48  ;;  %v6667_v37 = vpop.f32.mrb[83].mxu1 }
 0x306   : > { %10073 = vst [vmem:[#allocation37_spill] sm:$0xff] %v9692_v13  ;;  %v8090_v56 = vpop.eup %8089  ;;  %8107 = vpow2.f32 %v6398_v2  ;;  %v9700_v9 = vadd.f32 %v6667_v37, %v6666_v57 }
 0x307   : > { %v8092_v4 = vpop.eup %8091  ;;  %v5209_v51 = vadd.f32 1.0, %v8090_v56  ;;  %8109 = vpow2.f32 %v6401_v30  ;;  %6902 = vmatpush3.bf16.msra.mxu1 %v8002_v18 }
 0x308   : > { %v8094_v48 = vpop.eup %8093  ;;  %v5212_v46 = vadd.f32 1.0, %v8092_v4  ;;  %8111 = vpow2.f32 %v6402_v5 }
 0x309   : > { %v8096_v19 = vpop.eup %8095  ;;  %8113 = vrcp.f32 %v5209_v51  ;;  %v5213_v59 = vadd.f32 1.0, %v8094_v48 }
 0x30a   : > { %v8098_v2 = vpop.eup %8097  ;;  %8115 = vrcp.f32 %v5212_v46  ;;  %v5216_v53 = vadd.f32 1.0, %v8096_v19  ;;  %v6669_v10 = vpop.f32.mrb[84].mxu1 }
 0x30b   : > { %8117 = vrcp.f32 %v5213_v59  ;;  %v5217_v39 = vadd.f32 1.0, %v8098_v2  ;;  %v6670_v57 = vpop.f32.mrb[85].mxu1 }
 0x30c   : > { %v9702_v30 = vpop.eup %8099  ;;  %8119 = vrcp.f32 %v5216_v53  ;;  %v6671_v5 = vadd.f32 %v6670_v57, %v6669_v10  ;;  %v6672_v56 = vpop.f32.mrb[86].mxu1 }
 0x30d   : > { %v9704_v3 = vpop.eup %8101  ;;  %8121 = vrcp.f32 %v5217_v39  ;;  %v6673_v0 = vpop.f32.mrb[87].mxu1 }
 0x30e   : > { %10074 = vst [vmem:[#allocation38_spill] sm:$0xff] %v9704_v3  ;;  %v9706_v37 = vpop.eup %8103  ;;  %v6674_v51 = vadd.f32 %v6673_v0, %v6672_v56 }
 0x30f   : > { %v8106_v4 = vpop.eup %8105 }
 0x310   : > { %v8108_v46 = vpop.eup %8107  ;;  %v5220_v31 = vadd.f32 1.0, %v8106_v4 }
 0x311   : > { %v8110_v19 = vpop.eup %8109  ;;  %v5221_v59 = vadd.f32 1.0, %v8108_v46 }
 0x312   : > { %v8112_v53 = vpop.eup %8111  ;;  %8123 = vrcp.f32 %v5220_v31  ;;  %v5224_v18 = vadd.f32 1.0, %v8110_v19  ;;  %v6675_v39 = vpop.f32.mrb[88].mxu1 }
 0x313   : > { %v9710_v2 = vpop.eup %8113  ;;  %8125 = vrcp.f32 %v5221_v59  ;;  %v5225_v10 = vadd.f32 1.0, %v8112_v53  ;;  %v6676_v50 = vpop.f32.mrb[89].mxu1  ;;  %v4889_v53 = vsub.s32 0, %v9548_v52 }
 0x314   : > { %10075 = vst [vmem:[#allocation39_spill] sm:$0xff] %v9710_v2  ;;  %v9712_v57 = vpop.eup %8115  ;;  %8127 = vrcp.f32 %v5224_v18  ;;  %v6677_v4 = vadd.f32 %v6676_v50, %v6675_v39  ;;  %v6678_v46 = vpop.f32.mrb[90].mxu1 }
 0x315   : > { %v9716_v0 = vpop.eup %8117  ;;  %8129 = vrcp.f32 %v5225_v10  ;;  %v6679_v31 = vpop.f32.mrb[91].mxu1 }
 0x316   : > { %10076 = vst [vmem:[#allocation40_spill] sm:$0xff] %v9716_v0  ;;  %v9718_v48 = vpop.eup %8119  ;;  %v6680_v59 = vadd.f32 %v6679_v31, %v6678_v46 }
 0x317   : > { %v9720_v19 = vpop.eup %8121 }
 0x318   : > { %10077 = vst [vmem:[#allocation41_spill] sm:$0xff] %v9720_v19 }
 0x31a   : > { %v6681_v16 = vpop.f32.mrb[92].mxu1 }
 0x31b   : > { %v6682_v56 = vpop.f32.mrb[93].mxu1 }
 0x31c   : > { %v9726_v43 = vpop.eup %8123  ;;  %v6683_v50 = vadd.f32 %v6682_v56, %v6681_v16  ;;  %v6684_v10 = vpop.f32.mrb[94].mxu1  ;;  %v9740_v16 = vrot.slane %v9555_v58, %v4889_v53 }
 0x31d   : > { %v9728_v17 = vpop.eup %8125  ;;  %v6685_v3 = vpop.f32.mrb[95].mxu1 }
 0x31e   : > { %10078 = vst [vmem:[#allocation42_spill] sm:$0xff] %v9728_v17  ;;  %v9730_v39 = vpop.eup %8127  ;;  %v6686_v46 = vadd.f32 %v6685_v3, %v6684_v10 }
 0x31f   : > { %v9732_v2 = vpop.eup %8129 }
 0x322   : > { %v7129_v0 = vpop.f32.mrb[80].mxu0  ;;  %v6687_v19 = vpop.f32.mrb[96].mxu1 }
 0x323   : > { %v7255_v49 = vadd.f32 %v7129_v0, %v6671_v5  ;;  %v4206_v56 = vpop.f32.mrb[81].mxu0  ;;  %v6688_v13 = vpop.f32.mrb[97].mxu1 }
 0x324   : > { %v7256_v34 = vadd.f32 %v9694_v21, %v4206_v56  ;;  %v7130_v60 = vpop.f32.mrb[82].mxu0  ;;  %v6689_v3 = vadd.f32 %v6688_v13, %v6687_v19  ;;  %v6690_v10 = vpop.f32.mrb[98].mxu1 }
 0x325   : > { %v4287_v31 = vadd.f32 %v7255_v49, %v9427_v14  ;;  %v7257_v29 = vadd.f32 %v7130_v60, %v6674_v51  ;;  %v4209_v20 = vpop.f32.mrb[83].mxu0  ;;  %v6691_v45 = vpop.f32.mrb[99].mxu1 }
 0x326   : > { %v4285_v18 = vadd.f32 %v7256_v34, %v9414_v47  ;;  %v7258_v17 = vadd.f32 %v9700_v9, %v4209_v20  ;;  %v6692_v5 = vadd.f32 %v6691_v45, %v6690_v10 }
 0x327   : > { %v4915_v58 = vadd.f32 %v9740_v16, %v4287_v31  ;;  %v4288_v0 = vadd.f32 %v7257_v29, %v9431_v61 }
 0x328   : > { %v4907_v53 = vadd.f32 %v9740_v16, %v4285_v18  ;;  %v4286_v21 = vadd.f32 %v7258_v17, %v9418_v7 }
 0x329   : > { %v6348_v13 = vmul.f32 -1.442695, %v4915_v58  ;;  %v4919_v19 = vadd.f32 %v9740_v16, %v4288_v0 }
 0x32a   : > { %v6340_v14 = vmul.f32 -1.442695, %v4907_v53  ;;  %v4911_v60 = vadd.f32 %v9740_v16, %v4286_v21  ;;  %v7133_v49 = vpop.f32.mrb[84].mxu0  ;;  %v6693_v51 = vpop.f32.mrb[100].mxu1 }
 0x32b   : > { %8131 = vpow2.f32 %v6348_v13  ;;  %v6352_v47 = vmul.f32 -1.442695, %v4919_v19  ;;  %v7259_v20 = vadd.f32 %v7133_v49, %v6683_v50  ;;  %v4222_v45 = vpop.f32.mrb[85].mxu0  ;;  %v6694_v34 = vpop.f32.mrb[101].mxu1 }
 0x32c   : > { %8133 = vpow2.f32 %v6340_v14  ;;  %v6344_v9 = vmul.f32 -1.442695, %v4911_v60  ;;  %v7260_v61 = vadd.f32 %v6677_v4, %v4222_v45  ;;  %v7134_v29 = vpop.f32.mrb[86].mxu0  ;;  %v6695_v18 = vadd.f32 %v6694_v34, %v6693_v51  ;;  %v6696_v31 = vpop.f32.mrb[102].mxu1 }
 0x32d   : > { %8135 = vpow2.f32 %v6352_v47  ;;  %v4291_v7 = vadd.f32 %v7259_v20, %v9451_v36  ;;  %v7261_v17 = vadd.f32 %v7134_v29, %v6686_v46  ;;  %v4225_v56 = vpop.f32.mrb[87].mxu0  ;;  %v6697_v10 = vpop.f32.mrb[103].mxu1 }
 0x32e   : > { %8137 = vpow2.f32 %v6344_v9  ;;  %v4289_v58 = vadd.f32 %v7260_v61, %v9439_v12  ;;  %v7262_v0 = vadd.f32 %v6680_v59, %v4225_v56  ;;  %v6698_v53 = vadd.f32 %v6697_v10, %v6696_v31 }
 0x32f   : > { %v4931_v50 = vadd.f32 %v9740_v16, %v4291_v7  ;;  %v4292_v21 = vadd.f32 %v7261_v17, %v9455_v33 }
 0x330   : > { %v4923_v4 = vadd.f32 %v9740_v16, %v4289_v58  ;;  %v4290_v13 = vadd.f32 %v7262_v0, %v9443_v42 }
 0x331   : > { %v6364_v19 = vmul.f32 -1.442695, %v4931_v50  ;;  %v4935_v14 = vadd.f32 %v9740_v16, %v4292_v21 }
 0x332   : > { %v6356_v36 = vmul.f32 -1.442695, %v4923_v4  ;;  %v4927_v46 = vadd.f32 %v9740_v16, %v4290_v13  ;;  %v7137_v60 = vpop.f32.mrb[88].mxu0  ;;  %v6699_v49 = vpop.f32.mrb[104].mxu1 }
 0x333   : > { %8139 = vpow2.f32 %v6364_v19  ;;  %v6368_v12 = vmul.f32 -1.442695, %v4935_v14  ;;  %v7263_v59 = vadd.f32 %v7137_v60, %v6695_v18  ;;  %v4238_v51 = vpop.f32.mrb[89].mxu0  ;;  %v6700_v47 = vpop.f32.mrb[105].mxu1 }
 0x334   : > { %8141 = vpow2.f32 %v6356_v36  ;;  %v6360_v20 = vmul.f32 -1.442695, %v4927_v46  ;;  %v7264_v33 = vadd.f32 %v6689_v3, %v4238_v51  ;;  %v7138_v45 = vpop.f32.mrb[90].mxu0  ;;  %v6701_v34 = vadd.f32 %v6700_v47, %v6699_v49  ;;  %v6702_v9 = vpop.f32.mrb[106].mxu1 }
 0x335   : > { %v8132_v42 = vpop.eup %8131  ;;  %8143 = vpow2.f32 %v6368_v12  ;;  %v4295_v61 = vadd.f32 %v7263_v59, %v9475_v62  ;;  %v7265_v29 = vadd.f32 %v7138_v45, %v6698_v53  ;;  %v4241_v31 = vpop.f32.mrb[91].mxu0  ;;  %v10079_v53 = vld [vmem:[#allocation23_spill] sm:$0xff] }
 0x336   : > { %v6703_v7 = vpop.f32.mrb[107].mxu1  ;;  %v8134_v17 = vpop.eup %8133  ;;  %v5171_v56 = vadd.f32 1.0, %v8132_v42  ;;  %8145 = vpow2.f32 %v6360_v20  ;;  %v4293_v18 = vadd.f32 %v7264_v33, %v9463_v44  ;;  %v7266_v10 = vadd.f32 %v6692_v5, %v4241_v31 }
 0x337   : > { %v8136_v58 = vpop.eup %8135  ;;  %v5163_v0 = vadd.f32 1.0, %v8134_v17  ;;  %v4947_v3 = vadd.f32 %v9740_v16, %v4295_v61  ;;  %v4296_v50 = vadd.f32 %v7265_v29, %v9479_v40  ;;  %v6704_v21 = vadd.f32 %v6703_v7, %v6702_v9  ;;  %v10080_v17 = vld [vmem:[#allocation24_spill] sm:$0xff] }
 0x338   : > { %v8138_v4 = vpop.eup %8137  ;;  %8147 = vrcp.f32 %v5171_v56  ;;  %v5175_v13 = vadd.f32 1.0, %v8136_v58  ;;  %v4939_v62 = vadd.f32 %v9740_v16, %v4293_v18  ;;  %v4294_v19 = vadd.f32 %v7266_v10, %v10079_v53 }
 0x339   : > { %8149 = vrcp.f32 %v5163_v0  ;;  %v5167_v14 = vadd.f32 1.0, %v8138_v4  ;;  %v6380_v36 = vmul.f32 -1.442695, %v4947_v3  ;;  %v4951_v44 = vadd.f32 %v9740_v16, %v4296_v50  ;;  %v10081_v50 = vld [vmem:[#allocation26_spill] sm:$0xff] }
 0x33a   : > { %8151 = vrcp.f32 %v5175_v13  ;;  %v6372_v5 = vmul.f32 -1.442695, %v4939_v62  ;;  %v4943_v46 = vadd.f32 %v9740_v16, %v4294_v19  ;;  %v6705_v60 = vpop.f32.mrb[108].mxu1  ;;  %v7141_v49 = vpop.f32.mrb[92].mxu0  ;;  %v10082_v19 = vld [vmem:[#allocation25_spill] sm:$0xff] }
 0x33b   : > { %8153 = vrcp.f32 %v5167_v14  ;;  %v6384_v40 = vmul.f32 -1.442695, %v4951_v44  ;;  %v6706_v12 = vpop.f32.mrb[109].mxu1  ;;  %v4254_v59 = vpop.f32.mrb[93].mxu0 }
 0x33c   : > { %8155 = vpow2.f32 %v6380_v36  ;;  %v6376_v51 = vmul.f32 -1.442695, %v4943_v46  ;;  %v6707_v47 = vadd.f32 %v6706_v12, %v6705_v60  ;;  %v7268_v20 = vadd.f32 %v6701_v34, %v4254_v59  ;;  %v6708_v33 = vpop.f32.mrb[110].mxu1  ;;  %v7142_v45 = vpop.f32.mrb[94].mxu0 }
 0x33d   : > { %v8140_v9 = vpop.eup %8139  ;;  %8157 = vpow2.f32 %v6372_v5  ;;  %v6709_v42 = vpop.f32.mrb[111].mxu1 }
 0x33e   : > { %v4257_v61 = vpop.f32.mrb[95].mxu0  ;;  %v8142_v29 = vpop.eup %8141  ;;  %v5187_v31 = vadd.f32 1.0, %v8140_v9  ;;  %8159 = vpow2.f32 %v6384_v40  ;;  %v7267_v7 = vadd.f32 %v7141_v49, %v6707_v47  ;;  %v4297_v56 = vadd.f32 %v7268_v20, %v10080_v17  ;;  %v10084_v17 = vld [vmem:[#allocation18_spill] sm:$0xff] }
 0x33f   : > { %v8144_v18 = vpop.eup %8143  ;;  %v5179_v10 = vadd.f32 1.0, %v8142_v29  ;;  %8161 = vpow2.f32 %v6376_v51  ;;  %v6710_v58 = vadd.f32 %v6709_v42, %v6708_v33  ;;  %v7270_v0 = vadd.f32 %v6704_v21, %v4257_v61  ;;  %v10083_v21 = vld [vmem:[#allocation27_spill] sm:$0xff] }
 0x340   : > { %v8146_v3 = vpop.eup %8145  ;;  %8163 = vrcp.f32 %v5187_v31  ;;  %v5191_v34 = vadd.f32 1.0, %v8144_v18  ;;  %v4299_v4 = vadd.f32 %v7267_v7, %v10081_v50  ;;  %v4955_v13 = vadd.f32 %v9740_v16, %v4297_v56 }
 0x341   : > { %8165 = vrcp.f32 %v5179_v10  ;;  %v5183_v62 = vadd.f32 1.0, %v8146_v3  ;;  %v7269_v53 = vadd.f32 %v7142_v45, %v6710_v58  ;;  %v4298_v14 = vadd.f32 %v7270_v0, %v10082_v19  ;;  %v10085_v3 = vld [vmem:[#allocation19_spill] sm:$0xff] }
 0x342   : > { %v8148_v36 = vpop.eup %8147  ;;  %8167 = vrcp.f32 %v5191_v34  ;;  %v4963_v44 = vadd.f32 %v9740_v16, %v4299_v4  ;;  %v6388_v5 = vmul.f32 -1.442695, %v4955_v13  ;;  %v6759_v46 = vpop.f32.mrb[112].mxu1  ;;  %v10086_v13 = vpack.c.bf16 %v9630_v6, %v9625_v63  ;;  %v10087_v63 = vld [vmem:[#allocation20_spill] sm:$0xff] }
 0x343   : > { %v8150_v60 = vpop.eup %8149  ;;  %8169 = vrcp.f32 %v5183_v62  ;;  %v4300_v49 = vadd.f32 %v7269_v53, %v10083_v21  ;;  %v4959_v40 = vadd.f32 %v9740_v16, %v4298_v14  ;;  %v6760_v12 = vpop.f32.mrb[113].mxu1 }
 0x344   : > { %v8152_v59 = vpop.eup %8151  ;;  %v6396_v51 = vmul.f32 -1.442695, %v4963_v44  ;;  %8171 = vpow2.f32 %v6388_v5  ;;  %v6761_v47 = vadd.f32 %v6760_v12, %v6759_v46  ;;  %v6762_v20 = vpop.f32.mrb[114].mxu1 }
 0x345   : > { %v8154_v33 = vpop.eup %8153  ;;  %v4967_v45 = vadd.f32 %v9740_v16, %v4300_v49  ;;  %v6392_v9 = vmul.f32 -1.442695, %v4959_v40  ;;  %v6763_v42 = vpop.f32.mrb[115].mxu1  ;;  %v5359_v61 = vpack.c.bf16 %v8152_v59, %v8148_v36 }
 0x346   : > { %v8156_v29 = vpop.eup %8155  ;;  %v6764_v31 = vadd.f32 %v6763_v42, %v6762_v20  ;;  %v5355_v7 = vpack.c.bf16 %v8154_v33, %v8150_v60  ;;  %v9777_v56 = vadd.f32 %v6761_v47, %v10084_v17  ;;  %v10088_v47 = vld [vmem:[#allocation21_spill] sm:$0xff] }
 0x347   : > { %v8158_v18 = vpop.eup %8157  ;;  %v5203_v10 = vadd.f32 1.0, %v8156_v29  ;;  %8173 = vpow2.f32 %v6392_v9  ;;  %v6400_v4 = vmul.f32 -1.442695, %v4967_v45  ;;  %v10089_v45 = vpack.c.bf16 %v9647_v26, %v9645_v25 }
 0x348   : > { %v8160_v58 = vpop.eup %8159  ;;  %v5195_v0 = vadd.f32 1.0, %v8158_v18  ;;  %8175 = vpow2.f32 %v6396_v51  ;;  %5683 = vmatmul.mubr.bf16.vlgmr.msra.gmra.mrb[96].mxu0 %v5355_v7  ;;  %v9780_v34 = vadd.f32 %v6764_v31, %v10085_v3 }
 0x349   : > { %v8162_v16 = vpop.eup %8161  ;;  %8177 = vrcp.f32 %v5203_v10  ;;  %v5207_v50 = vadd.f32 1.0, %v8160_v58  ;;  %5690 = vmatprep.mubr.bf16.mxu0 %v10086_v13 }
 0x34a   : > { %v8164_v62 = vpop.eup %8163  ;;  %8179 = vrcp.f32 %v5195_v0  ;;  %v5199_v53 = vadd.f32 1.0, %v8162_v16  ;;  %v6765_v19 = vpop.f32.mrb[116].mxu1 }
 0x34b   : > { %v8166_v14 = vpop.eup %8165  ;;  %8181 = vrcp.f32 %v5207_v50  ;;  %v6766_v36 = vpop.f32.mrb[117].mxu1  ;;  %v10090_v50 = vld [vmem:[#allocation22_spill] sm:$0xff] }
 0x34c   : > { %v8168_v44 = vpop.eup %8167  ;;  %8183 = vrcp.f32 %v5199_v53  ;;  %v6767_v5 = vadd.f32 %v6766_v36, %v6765_v19  ;;  %v6768_v46 = vpop.f32.mrb[118].mxu1  ;;  %v10091_v53 = vld [vmem:[#allocation28_spill] sm:$0xff] }
 0x34d   : > { %v8170_v60 = vpop.eup %8169  ;;  %8185 = vpow2.f32 %v6400_v4  ;;  %v6769_v21 = vpop.f32.mrb[119].mxu1  ;;  %v5367_v49 = vpack.c.bf16 %v8168_v44, %v8164_v62 }
 0x34e   : > { %v8172_v40 = vpop.eup %8171  ;;  %v6770_v12 = vadd.f32 %v6769_v21, %v6768_v46  ;;  %v5363_v59 = vpack.c.bf16 %v8170_v60, %v8166_v14  ;;  %v7223_v6 = vadd.f32 %v6767_v5, %v10087_v63  ;;  %v10092_v14 = vpack.c.bf16 %v9671_v32, %v9664_v1  ;;  %v10093_v63 = vld [vmem:[#allocation29_spill] sm:$0xff]  ;;  %v10094_v1 = vld [vmem:[#allocation30_spill] sm:$0xff] }
 0x34f   : > { %v5211_v51 = vadd.f32 1.0, %v8172_v40  ;;  %v4901_v40 = vsub.s32 3, %v9548_v52 }
 0x350   : > { %5691 = vmatmul.mubr.bf16.gmra.mrb[100].mxu0 %v5359_v61  ;;  %v7227_v20 = vadd.f32 %v6770_v12, %v10088_v47 }
 0x351   : > { %v8174_v33 = vpop.eup %8173  ;;  %5698 = vmatprep.mubr.bf16.mxu0 %v10089_v45  ;;  %8187 = vrcp.f32 %v5211_v51  ;;  %v8280_v45 = vld [vmem:[#allocation9] sm:$0xf] }
 0x352   : > { %v8176_v9 = vpop.eup %8175  ;;  %v5215_v42 = vadd.f32 1.0, %v8174_v33  ;;  %v6771_v29 = vpop.f32.mrb[120].mxu1  ;;  %v10095_v33 = vpack.c.bf16 %v9690_v28, %v9686_v22 }
 0x353   : > { %v9790_v31 = vpop.eup %8177  ;;  %v6772_v7 = vpop.f32.mrb[121].mxu1  ;;  %v5219_v61 = vadd.f32 1.0, %v8176_v9  ;;  %v9817_v9 = vrot.slane %v8280_v45, %v4901_v40 }
 0x354   : > { %v8180_v17 = vpop.eup %8179  ;;  %8189 = vrcp.f32 %v5215_v42  ;;  %v6773_v18 = vadd.f32 %v6772_v7, %v6771_v29  ;;  %v6774_v10 = vpop.f32.mrb[122].mxu1 }
 0x355   : > { %v9792_v58 = vpop.eup %8181  ;;  %v6775_v0 = vpop.f32.mrb[123].mxu1  ;;  %8191 = vrcp.f32 %v5219_v61 }
 0x356   : > { %v8184_v3 = vpop.eup %8183  ;;  %v6776_v16 = vadd.f32 %v6775_v0, %v6774_v10  ;;  %v9795_v25 = vadd.f32 %v6773_v18, %v10090_v50  ;;  %v5375_v26 = vpack.c.bf16 %v9792_v58, %v9790_v31 }
 0x357   : > { %v8186_v4 = vpop.eup %8185  ;;  %v5371_v13 = vpack.c.bf16 %v8184_v3, %v8180_v17 }
 0x358   : > { %v5223_v62 = vadd.f32 1.0, %v8186_v4  ;;  %5699 = vmatmul.mubr.bf16.gmra.mrb[104].mxu0 %v5363_v59  ;;  %v9800_v19 = vadd.f32 %v6776_v16, %v10091_v53 }
 0x359   : > { %5706 = vmatprep.mubr.bf16.mxu0 %v10092_v14 }
 0x35a   : > { %8193 = vrcp.f32 %v5223_v62  ;;  %v6777_v36 = vpop.f32.mrb[124].mxu1 }
 0x35b   : > { %v6778_v44 = vpop.f32.mrb[125].mxu1  ;;  %v9805_v60 = vpop.eup %8187 }
 0x35c   : > { %v6779_v5 = vadd.f32 %v6778_v44, %v6777_v36  ;;  %v6780_v46 = vpop.f32.mrb[126].mxu1 }
 0x35d   : > { %v6781_v21 = vpop.f32.mrb[127].mxu1 }
 0x35e   : > { %v9808_v12 = vpop.eup %8189  ;;  %v6782_v59 = vadd.f32 %v6781_v21, %v6780_v46  ;;  %v7231_v51 = vadd.f32 %v6779_v5, %v10093_v63  ;;  %v10096_v21 = vpack.c.bf16 %v9706_v37, %v9702_v30 }
 0x35f   : > { %v5379_v47 = vpack.c.bf16 %v9808_v12, %v9805_v60  ;;  %v9819_v29 = vpop.eup %8191 }
 0x360   : > { %5707 = vmatmul.mubr.bf16.gmra.mrb[108].mxu0 %v5367_v49  ;;  %v7235_v32 = vadd.f32 %v6782_v59, %v10094_v1 }
 0x361   : > { %5714 = vmatprep.mubr.bf16.mxu0 %v10095_v33 }
 0x362   : > { %v6783_v42 = vpop.f32.mrb[128].mxu1  ;;  %v7193_v52 = vpop.f32.mrb[32].mxu0 }
 0x363   : > { %v7224_v7 = vadd.f32 %v7223_v6, %v7193_v52  ;;  %v6784_v17 = vpop.f32.mrb[129].mxu1  ;;  %v4790_v18 = vpop.f32.mrb[33].mxu0 }
 0x364   : > { %v9821_v10 = vpop.eup %8193  ;;  %v6785_v61 = vadd.f32 %v6784_v17, %v6783_v42  ;;  %v7226_v49 = vadd.f32 %v9777_v56, %v4790_v18  ;;  %v6786_v0 = vpop.f32.mrb[130].mxu1 }
 0x365   : > { %v7194_v3 = vpop.f32.mrb[34].mxu0  ;;  %v4918_v22 = vadd.f32 %v7224_v7, %v9817_v9  ;;  %v6787_v16 = vpop.f32.mrb[131].mxu1  ;;  %v5383_v4 = vpack.c.bf16 %v9821_v10, %v9819_v29 }
 0x366   : > { %v7228_v28 = vadd.f32 %v7227_v20, %v7194_v3  ;;  %v4793_v50 = vpop.f32.mrb[35].mxu0  ;;  %v4910_v62 = vadd.f32 %v7226_v49, %v9817_v9  ;;  %v6788_v6 = vadd.f32 %v6787_v16, %v6786_v0  ;;  %v7241_v14 = vadd.f32 %v6785_v61, %v9565_v54 }
 0x367   : > { %v7230_v53 = vadd.f32 %v9780_v34, %v4793_v50  ;;  %v6351_v36 = vmul.f32 -1.442695, %v4918_v22  ;;  %v10097_v22 = vpack.c.bf16 %v9718_v48, %v9712_v57 }
 0x368   : > { %v4922_v56 = vadd.f32 %v7228_v28, %v9817_v9  ;;  %v6343_v44 = vmul.f32 -1.442695, %v4910_v62  ;;  %5715 = vmatmul.mubr.bf16.gmra.mrb[112].mxu0 %v5371_v13  ;;  %v9833_v20 = vadd.f32 %v6788_v6, %v9571_v35 }
 0x369   : > { %v4914_v5 = vadd.f32 %v7230_v53, %v9817_v9  ;;  %8195 = vpow2.f32 %v6351_v36  ;;  %5722 = vmatprep.mubr.bf16.mxu0 %v10096_v21 }
 0x36a   : > { %v6355_v46 = vmul.f32 -1.442695, %v4922_v56  ;;  %8197 = vpow2.f32 %v6343_v44  ;;  %v6789_v40 = vpop.f32.mrb[132].mxu1  ;;  %v7197_v54 = vpop.f32.mrb[36].mxu0 }
 0x36b   : > { %v6347_v34 = vmul.f32 -1.442695, %v4914_v5  ;;  %v7232_v59 = vadd.f32 %v7231_v51, %v7197_v54  ;;  %v6790_v63 = vpop.f32.mrb[133].mxu1  ;;  %v4806_v1 = vpop.f32.mrb[37].mxu0 }
 0x36c   : > { %8199 = vpow2.f32 %v6355_v46  ;;  %v6791_v33 = vadd.f32 %v6790_v63, %v6789_v40  ;;  %v7234_v13 = vadd.f32 %v9795_v25, %v4806_v1  ;;  %v6792_v35 = vpop.f32.mrb[134].mxu1  ;;  %v7198_v45 = vpop.f32.mrb[38].mxu0 }
 0x36d   : > { %8201 = vpow2.f32 %v6347_v34  ;;  %v4934_v42 = vadd.f32 %v7232_v59, %v9817_v9  ;;  %v7236_v52 = vadd.f32 %v7235_v32, %v7198_v45  ;;  %v6793_v7 = vpop.f32.mrb[135].mxu1  ;;  %v4809_v30 = vpop.f32.mrb[39].mxu0  ;;  %v10098_v45 = vpack.c.bf16 %v9730_v39, %v9726_v43 }
 0x36e   : > { %v4926_v37 = vadd.f32 %v7234_v13, %v9817_v9  ;;  %v6794_v17 = vadd.f32 %v6793_v7, %v6792_v35  ;;  %v7238_v18 = vadd.f32 %v9800_v19, %v4809_v30  ;;  %v7239_v51 = vadd.f32 %v6791_v33, %v9577_v55 }
 0x36f   : > { %v6367_v61 = vmul.f32 -1.442695, %v4934_v42  ;;  %v4938_v49 = vadd.f32 %v7236_v52, %v9817_v9 }
 0x370   : > { %v6359_v0 = vmul.f32 -1.442695, %v4926_v37  ;;  %v4930_v25 = vadd.f32 %v7238_v18, %v9817_v9  ;;  %5723 = vmatmul.mubr.bf16.gmra.mrb[116].mxu0 %v5375_v26  ;;  %v7243_v32 = vadd.f32 %v6794_v17, %v9583_v24 }
 0x371   : > { %8203 = vpow2.f32 %v6367_v61  ;;  %v6371_v3 = vmul.f32 -1.442695, %v4938_v49  ;;  %5730 = vmatprep.mubr.bf16.mxu0 %v10097_v22 }
 0x372   : > { %8205 = vpow2.f32 %v6359_v0  ;;  %v6363_v55 = vmul.f32 -1.442695, %v4930_v25  ;;  %v6795_v19 = vpop.f32.mrb[136].mxu1  ;;  %v7201_v28 = vpop.f32.mrb[40].mxu0 }
 0x373   : > { %v8196_v16 = vpop.eup %8195  ;;  %8207 = vpow2.f32 %v6371_v3  ;;  %v7240_v50 = vadd.f32 %v7239_v51, %v7201_v28  ;;  %v6796_v62 = vpop.f32.mrb[137].mxu1 }
 0x374   : > { %v4822_v6 = vpop.f32.mrb[41].mxu0  ;;  %v8198_v53 = vpop.eup %8197  ;;  %v5174_v31 = vadd.f32 1.0, %v8196_v16  ;;  %8209 = vpow2.f32 %v6363_v55  ;;  %v6797_v58 = vadd.f32 %v6796_v62, %v6795_v19 }
 0x375   : > { %v7242_v24 = vadd.f32 %v7241_v14, %v4822_v6  ;;  %v6798_v26 = vpop.f32.mrb[138].mxu1  ;;  %v7202_v36 = vpop.f32.mrb[42].mxu0  ;;  %v5166_v44 = vadd.f32 1.0, %v8198_v53  ;;  %v4950_v48 = vadd.f32 %v7240_v50, %v9817_v9 }
 0x376   : > { %v8200_v56 = vpop.eup %8199  ;;  %v7244_v57 = vadd.f32 %v7243_v32, %v7202_v36  ;;  %v6799_v5 = vpop.f32.mrb[139].mxu1  ;;  %8211 = vrcp.f32 %v5174_v31  ;;  %v7249_v33 = vadd.f32 %v6797_v58, %v9589_v38 }
 0x377   : > { %v4825_v46 = vpop.f32.mrb[43].mxu0  ;;  %v8202_v21 = vpop.eup %8201  ;;  %v5178_v34 = vadd.f32 1.0, %v8200_v56  ;;  %v4942_v40 = vadd.f32 %v7242_v24, %v9817_v9  ;;  %v6800_v54 = vadd.f32 %v6799_v5, %v6798_v26  ;;  %8213 = vrcp.f32 %v5166_v44 }
 0x378   : > { %v5170_v59 = vadd.f32 1.0, %v8202_v21  ;;  %v6383_v63 = vmul.f32 -1.442695, %v4950_v48  ;;  %v4954_v14 = vadd.f32 %v7244_v57, %v9817_v9  ;;  %v7246_v1 = vadd.f32 %v9833_v20, %v4825_v46  ;;  %5731 = vmatmul.mubr.bf16.gmra.mrb[120].mxu0 %v5379_v47 }
 0x379   : > { %8215 = vrcp.f32 %v5178_v34  ;;  %v6375_v13 = vmul.f32 -1.442695, %v4942_v40  ;;  %5738 = vmatprep.mubr.bf16.mxu0 %v10098_v45  ;;  %v7253_v42 = vadd.f32 %v6800_v54, %v9595_v23  ;;  %v10099_v46 = vpack.c.bf16 %v9614_v27, %v9612_v11  ;;  %v10100_v11 = vld [vmem:[#allocation31_spill] sm:$0xff] }
 0x37a   : > { %8217 = vrcp.f32 %v5170_v59  ;;  %v6387_v35 = vmul.f32 -1.442695, %v4954_v14  ;;  %v4946_v52 = vadd.f32 %v7246_v1, %v9817_v9  ;;  %v6801_v7 = vpop.f32.mrb[140].mxu1  ;;  %v7205_v20 = vpop.f32.mrb[44].mxu0  ;;  %v10101_v27 = vpack.c.bf16 %v9632_v8, %v10100_v11 }
 0x37b   : > { %8219 = vpow2.f32 %v6383_v63  ;;  %v8204_v30 = vpop.eup %8203  ;;  %v6802_v37 = vpop.f32.mrb[141].mxu1 }
 0x37c   : > { %v4838_v60 = vpop.f32.mrb[45].mxu0  ;;  %v8206_v12 = vpop.eup %8205  ;;  %v5190_v47 = vadd.f32 1.0, %v8204_v30  ;;  %8221 = vpow2.f32 %v6387_v35  ;;  %v6803_v38 = vadd.f32 %v6802_v37, %v6801_v7  ;;  %v6379_v43 = vmul.f32 -1.442695, %v4946_v52 }
 0x37d   : > { %v6804_v17 = vpop.f32.mrb[142].mxu1  ;;  %v7206_v18 = vpop.f32.mrb[46].mxu0  ;;  %v5182_v61 = vadd.f32 1.0, %v8206_v12  ;;  %8223 = vpow2.f32 %v6375_v13  ;;  %v7250_v39 = vadd.f32 %v7249_v33, %v4838_v60  ;;  %v10102_v12 = vld [vmem:[#allocation33_spill] sm:$0xff] }
 0x37e   : > { %v8208_v51 = vpop.eup %8207  ;;  %v6805_v23 = vpop.f32.mrb[143].mxu1  ;;  %8225 = vrcp.f32 %v5190_v47  ;;  %v7247_v32 = vadd.f32 %v6803_v38, %v9601_v15  ;;  %v10103_v47 = vld [vmem:[#allocation32_spill] sm:$0xff] }
 0x37f   : > { %v4841_v49 = vpop.f32.mrb[47].mxu0  ;;  %v8210_v0 = vpop.eup %8209  ;;  %v5194_v25 = vadd.f32 1.0, %v8208_v51  ;;  %v6806_v3 = vadd.f32 %v6805_v23, %v6804_v17  ;;  %8227 = vrcp.f32 %v5182_v61  ;;  %v4958_v55 = vadd.f32 %v7250_v39, %v9817_v9  ;;  %v10105_v39 = vld [vmem:[#allocation35_spill] sm:$0xff]  ;;  %v10106_v23 = vld [vmem:[#allocation34_spill] sm:$0xff] }
 0x380   : > { %v5186_v22 = vadd.f32 1.0, %v8210_v0  ;;  %v7254_v19 = vadd.f32 %v7253_v42, %v4841_v49  ;;  %v8212_v28 = vpop.eup %8211  ;;  %v7248_v16 = vadd.f32 %v7247_v32, %v7205_v20  ;;  %5739 = vmatmul.mubr.bf16.gmra.mrb[124].mxu0 %v5383_v4  ;;  %v10104_v38 = vpack.c.bf16 %v10102_v12, %v10103_v47 }
 0x381   : > { %8229 = vrcp.f32 %v5194_v25  ;;  %v7251_v50 = vadd.f32 %v6806_v3, %v9606_v41  ;;  %v8214_v62 = vpop.eup %8213  ;;  %v6391_v6 = vmul.f32 -1.442695, %v4958_v55  ;;  %v10107_v49 = vpack.c.bf16 %v10105_v39, %v10106_v23  ;;  %v10108_v3 = vld [vmem:[#allocation37_spill] sm:$0xff] }
 0x382   : > { %8231 = vrcp.f32 %v5186_v22  ;;  %v4962_v15 = vadd.f32 %v7254_v19, %v9817_v9  ;;  %v4966_v31 = vadd.f32 %v7248_v16, %v9817_v9  ;;  %v10109_v22 = vld [vmem:[#allocation36_spill] sm:$0xff]  ;;  %v10111_v19 = vld [vmem:[#allocation39_spill] sm:$0xff]  ;;  %v9924_v23 = vld [vmem:[#allocation12] ss:$0 sm:$0xff] }
 0x383   : > { %v8216_v53 = vpop.eup %8215  ;;  %8233 = vpow2.f32 %v6379_v43  ;;  %v7252_v58 = vadd.f32 %v7251_v50, %v7206_v18  ;;  %v10110_v55 = vpack.c.bf16 %v10108_v3, %v10109_v22  ;;  %v10114_v50 = vld [vmem:[#allocation41_spill] sm:$0xff] }
 0x384   : > { %v8218_v24 = vpop.eup %8217  ;;  %8235 = vpow2.f32 %v6391_v6  ;;  %v6395_v26 = vmul.f32 -1.442695, %v4962_v15  ;;  %v5362_v36 = vpack.c.bf16 %v8216_v53, %v8212_v28  ;;  %v6399_v41 = vmul.f32 -1.442695, %v4966_v31  ;;  %v10112_v28 = vld [vmem:[#allocation38_spill] sm:$0xff] }
 0x385   : > { %v8220_v56 = vpop.eup %8219  ;;  %v4970_v44 = vadd.f32 %v7252_v58, %v9817_v9  ;;  %v5358_v29 = vpack.c.bf16 %v8218_v24, %v8214_v62  ;;  %v10113_v16 = vpack.c.bf16 %v10111_v19, %v10112_v28  ;;  %v10115_v62 = vld [vmem:[#allocation40_spill] sm:$0xff]  ;;  %v10117_v15 = vld [vmem:[#allocation42_spill] sm:$0xff] }
 0x386   : > { %v5206_v10 = vadd.f32 1.0, %v8220_v56  ;;  %8237 = vpow2.f32 %v6395_v26  ;;  %v8222_v4 = vpop.eup %8221  ;;  %v10116_v6 = vpack.c.bf16 %v10114_v50, %v10115_v62  ;;  %v10118_v53 = vpack.c.bf16 %v9732_v2, %v10117_v15 }
 0x387   : > { %8239 = vpow2.f32 %v6399_v41  ;;  %v6403_v48 = vmul.f32 -1.442695, %v4970_v44  ;;  %5779 = vmatprep.mubr.bf16.mxu1 %v5358_v29  ;;  %v8224_v57 = vpop.eup %8223  ;;  %v5210_v5 = vadd.f32 1.0, %v8222_v4 }
 0x388   : > { %5780 = vmatmul.mubr.bf16.vlgmr.msra.gmra.mrb[144].mxu1 %v10099_v46  ;;  %v8226_v21 = vpop.eup %8225  ;;  %8241 = vrcp.f32 %v5206_v10  ;;  %v5198_v9 = vadd.f32 1.0, %v8224_v57 }
 0x389   : > { %5787 = vmatprep.mubr.bf16.mxu1 %v5362_v36  ;;  %v8228_v34 = vpop.eup %8227  ;;  %8243 = vrcp.f32 %v5210_v5 }
 0x38a   : > { %8245 = vpow2.f32 %v6403_v48 }
 0x38b   : > { %v8230_v40 = vpop.eup %8229  ;;  %8247 = vrcp.f32 %v5198_v9 }
 0x38c   : > { %v8232_v54 = vpop.eup %8231  ;;  %v5370_v59 = vpack.c.bf16 %v8230_v40, %v8226_v21 }
 0x38d   : > { %v8234_v63 = vpop.eup %8233  ;;  %v5366_v14 = vpack.c.bf16 %v8232_v54, %v8228_v34 }
 0x38e   : > { %v8236_v1 = vpop.eup %8235  ;;  %v5202_v33 = vadd.f32 1.0, %v8234_v63 }
 0x38f   : > { %v5214_v13 = vadd.f32 1.0, %v8236_v1 }
 0x390   : > { %v8238_v35 = vpop.eup %8237  ;;  %8249 = vrcp.f32 %v5202_v33  ;;  %5788 = vmatmul.mubr.bf16.gmra.mrb[148].mxu1 %v10101_v27 }
 0x391   : > { %v8240_v45 = vpop.eup %8239  ;;  %v5218_v42 = vadd.f32 1.0, %v8238_v35  ;;  %5795 = vmatprep.mubr.bf16.mxu1 %v5366_v14  ;;  %8251 = vrcp.f32 %v5214_v13 }
 0x392   : > { %v8242_v52 = vpop.eup %8241  ;;  %v5222_v7 = vadd.f32 1.0, %v8240_v45 }
 0x393   : > { %8253 = vrcp.f32 %v5218_v42  ;;  %v8244_v20 = vpop.eup %8243 }
 0x394   : > { %v8246_v30 = vpop.eup %8245  ;;  %v5378_v37 = vpack.c.bf16 %v8244_v20, %v8242_v52  ;;  %8255 = vrcp.f32 %v5222_v7 }
 0x395   : > { %v5226_v60 = vadd.f32 1.0, %v8246_v30  ;;  %v8248_v17 = vpop.eup %8247 }
 0x397   : > { %8257 = vrcp.f32 %v5226_v60 }
 0x398   : > { %5796 = vmatmul.mubr.bf16.gmra.mrb[152].mxu1 %v10104_v38 }
 0x399   : > { %5803 = vmatprep.mubr.bf16.mxu1 %v5370_v59 }
 0x39a   : > { %v8250_v8 = vpop.eup %8249 }
 0x39b   : > { %v5374_v18 = vpack.c.bf16 %v8250_v8, %v8248_v17  ;;  %v8252_v51 = vpop.eup %8251 }
 0x39d   : > { %v8254_v61 = vpop.eup %8253 }
 0x39e   : > { %v5382_v43 = vpack.c.bf16 %v8254_v61, %v8252_v51  ;;  %v8256_v0 = vpop.eup %8255 }
 0x3a0   : > { %5804 = vmatmul.mubr.bf16.gmra.mrb[156].mxu1 %v10107_v49 }
 0x3a1   : > { %5811 = vmatprep.mubr.bf16.mxu1 %v5374_v18  ;;  %v8258_v25 = vpop.eup %8257 }
 0x3a2   : > { %v5386_v32 = vpack.c.bf16 %v8258_v25, %v8256_v0 }
 0x3a8   : > { %5812 = vmatmul.mubr.bf16.gmra.mrb[160].mxu1 %v10110_v55 }
 0x3a9   : > { %5819 = vmatprep.mubr.bf16.mxu1 %v5378_v37 }
 0x3b0   : > { %5820 = vmatmul.mubr.bf16.gmra.mrb[164].mxu1 %v10113_v16 }
 0x3b1   : > { %5827 = vmatprep.mubr.bf16.mxu1 %v5382_v43 }
 0x3b8   : > { %5828 = vmatmul.mubr.bf16.gmra.mrb[168].mxu1 %v10116_v6 }
 0x3b9   : > { %5835 = vmatprep.mubr.bf16.mxu1 %v5386_v32 }
 0x3c0   : > { %5836 = vmatmul.mubr.bf16.gmra.mrb[172].mxu1 %v10118_v53 }
 0x41b   : > { %v6839_v31 = vpop.f32.mrb[96].mxu0 }
 0x41c   : > { %v6840_v58 = vpop.f32.mrb[97].mxu0 }
 0x41d   : > { %v6841_v24 = vadd.f32 %v6840_v58, %v6839_v31  ;;  %v6842_v26 = vpop.f32.mrb[98].mxu0 }
 0x41e   : > { %v6843_v36 = vpop.f32.mrb[99].mxu0 }
 0x41f   : > { %v6844_v56 = vadd.f32 %v6843_v36, %v6842_v26  ;;  %v5685_v25 = vadd.f32 %v6841_v24, %v9924_v23 }
 0x421   : > { %v5688_v55 = vadd.f32 %v6844_v56, %v9924_v23 }
 0x423   : > { %v6845_v41 = vpop.f32.mrb[100].mxu0 }
 0x424   : > { %v6846_v44 = vpop.f32.mrb[101].mxu0 }
 0x425   : > { %v6847_v29 = vadd.f32 %v6846_v44, %v6845_v41  ;;  %v6848_v10 = vpop.f32.mrb[102].mxu0 }
 0x426   : > { %v6849_v4 = vpop.f32.mrb[103].mxu0 }
 0x427   : > { %v6850_v48 = vadd.f32 %v6849_v4, %v6848_v10  ;;  %v5693_v6 = vadd.f32 %v6847_v29, %v9924_v23 }
 0x429   : > { %v5696_v58 = vadd.f32 %v6850_v48, %v9924_v23 }
 0x42b   : > { %v6851_v57 = vpop.f32.mrb[104].mxu0 }
 0x42c   : > { %v6852_v5 = vpop.f32.mrb[105].mxu0 }
 0x42d   : > { %v9898_v46 = vadd.f32 %v6852_v5, %v6851_v57  ;;  %v6854_v21 = vpop.f32.mrb[106].mxu0 }
 0x42e   : > { %v6855_v34 = vpop.f32.mrb[107].mxu0 }
 0x42f   : > { %v9900_v2 = vadd.f32 %v6855_v34, %v6854_v21  ;;  %v5701_v44 = vadd.f32 %v9898_v46, %v9924_v23 }
 0x431   : > { %v5704_v57 = vadd.f32 %v9900_v2, %v9924_v23 }
 0x433   : > { %v6857_v40 = vpop.f32.mrb[108].mxu0 }
 0x434   : > { %v6858_v9 = vpop.f32.mrb[109].mxu0 }
 0x435   : > { %v9902_v54 = vadd.f32 %v6858_v9, %v6857_v40  ;;  %v6860_v59 = vpop.f32.mrb[110].mxu0 }
 0x436   : > { %v6861_v63 = vpop.f32.mrb[111].mxu0 }
 0x437   : > { %v9904_v14 = vadd.f32 %v6861_v63, %v6860_v59  ;;  %v5709_v9 = vadd.f32 %v9902_v54, %v9924_v23 }
 0x43b   : > { %v6863_v1 = vpop.f32.mrb[112].mxu0 }
 0x43c   : > { %v6864_v33 = vpop.f32.mrb[113].mxu0 }
 0x43d   : > { %v9906_v13 = vadd.f32 %v6864_v33, %v6863_v1  ;;  %v6866_v35 = vpop.f32.mrb[114].mxu0  ;;  %v5712_v1 = vadd.f32 %v9904_v14, %v9924_v23 }
 0x43e   : > { %v6867_v11 = vpop.f32.mrb[115].mxu0 }
 0x43f   : > { %v9908_v27 = vadd.f32 %v6867_v11, %v6866_v35 }
 0x443   : > { %v6869_v45 = vpop.f32.mrb[116].mxu0 }
 0x444   : > { %v6870_v42 = vpop.f32.mrb[117].mxu0 }
 0x445   : > { %v9910_v52 = vadd.f32 %v6870_v42, %v6869_v45  ;;  %v6872_v7 = vpop.f32.mrb[118].mxu0  ;;  %v5717_v42 = vadd.f32 %v9906_v13, %v9924_v23 }
 0x446   : > { %v6873_v20 = vpop.f32.mrb[119].mxu0 }
 0x447   : > { %v9912_v30 = vadd.f32 %v6873_v20, %v6872_v7 }
 0x44b   : > { %v6875_v37 = vpop.f32.mrb[120].mxu0 }
 0x44c   : > { %v6876_v60 = vpop.f32.mrb[121].mxu0 }
 0x44d   : > { %v9914_v12 = vadd.f32 %v6876_v60, %v6875_v37  ;;  %v6878_v47 = vpop.f32.mrb[122].mxu0  ;;  %v5720_v37 = vadd.f32 %v9908_v27, %v9924_v23 }
 0x44e   : > { %v6879_v38 = vpop.f32.mrb[123].mxu0 }
 0x44f   : > { %v9916_v17 = vadd.f32 %v6879_v38, %v6878_v47 }
 0x453   : > { %v6881_v8 = vpop.f32.mrb[124].mxu0 }
 0x454   : > { %v6882_v18 = vpop.f32.mrb[125].mxu0 }
 0x455   : > { %v9920_v51 = vadd.f32 %v6882_v18, %v6881_v8  ;;  %v6884_v61 = vpop.f32.mrb[126].mxu0  ;;  %v5725_v18 = vadd.f32 %v9910_v52, %v9924_v23 }
 0x456   : > { %v6885_v43 = vpop.f32.mrb[127].mxu0 }
 0x457   : > { %v9922_v39 = vadd.f32 %v6885_v43, %v6884_v61 }
 0x45b   : > { %v6903_v49 = vpop.f32.mrb[144].mxu1 }
 0x45c   : > { %v6904_v0 = vpop.f32.mrb[145].mxu1 }
 0x45d   : > { %v6905_v32 = vadd.f32 %v6904_v0, %v6903_v49  ;;  %v6906_v3 = vpop.f32.mrb[146].mxu1  ;;  %v5728_v49 = vadd.f32 %v9912_v30, %v9924_v23 }
 0x45e   : > { %v6907_v22 = vpop.f32.mrb[147].mxu1 }
 0x45f   : > { %v5782_v19 = vadd.f32 %v6905_v32, %v5685_v25  ;;  %v6908_v28 = vadd.f32 %v6907_v22, %v6906_v3  ;;  %v5733_v22 = vadd.f32 %v9914_v12, %v9924_v23 }
 0x461   : > { %5844 = vst [vmem:[%s9930_s27] sm:$0xff] %v5782_v19  ;;  %v5785_v16 = vadd.f32 %v6908_v28, %v5688_v55  ;;  %v5736_v28 = vadd.f32 %v9916_v17, %v9924_v23 }
 0x463   : > { %5845 = vst [vmem:[%s9930_s27 + $0x8] sm:$0xff] %v5785_v16  ;;  %v6909_v50 = vpop.f32.mrb[148].mxu1 }
 0x464   : > { %v6910_v62 = vpop.f32.mrb[149].mxu1 }
 0x465   : > { %v6911_v15 = vadd.f32 %v6910_v62, %v6909_v50  ;;  %v6912_v53 = vpop.f32.mrb[150].mxu1 }
 0x466   : > { %v6913_v31 = vpop.f32.mrb[151].mxu1 }
 0x467   : > { %v5790_v24 = vadd.f32 %v6911_v15, %v5693_v6  ;;  %v6914_v26 = vadd.f32 %v6913_v31, %v6912_v53  ;;  %v5741_v15 = vadd.f32 %v9920_v51, %v9924_v23 }
 0x469   : > { %5846 = vst [vmem:[%s9930_s27 + $0x10] sm:$0xff] %v5790_v24  ;;  %v5793_v36 = vadd.f32 %v6914_v26, %v5696_v58  ;;  %v5744_v58 = vadd.f32 %v9922_v39, %v9924_v23 }
 0x46b   : > { %5847 = vst [vmem:[%s9930_s27 + $0x18] sm:$0xff] %v5793_v36  ;;  %v6915_v56 = vpop.f32.mrb[152].mxu1 }
 0x46c   : > { %v6916_v41 = vpop.f32.mrb[153].mxu1 }
 0x46d   : > { %v6917_v10 = vadd.f32 %v6916_v41, %v6915_v56  ;;  %v6918_v4 = vpop.f32.mrb[154].mxu1 }
 0x46e   : > { %v6919_v29 = vpop.f32.mrb[155].mxu1 }
 0x46f   : > { %v5798_v5 = vadd.f32 %v6917_v10, %v5701_v44  ;;  %v6920_v48 = vadd.f32 %v6919_v29, %v6918_v4 }
 0x471   : > { %5848 = vst [vmem:[%s9930_s27 + $0x20] sm:$0xff] %v5798_v5  ;;  %v5801_v21 = vadd.f32 %v6920_v48, %v5704_v57 }
 0x473   : > { %5849 = vst [vmem:[%s9930_s27 + $0x28] sm:$0xff] %v5801_v21  ;;  %v6921_v34 = vpop.f32.mrb[156].mxu1 }
 0x474   : > { %v6922_v40 = vpop.f32.mrb[157].mxu1 }
 0x475   : > { %v6923_v59 = vadd.f32 %v6922_v40, %v6921_v34  ;;  %v6924_v46 = vpop.f32.mrb[158].mxu1 }
 0x476   : > { %v6925_v63 = vpop.f32.mrb[159].mxu1 }
 0x477   : > { %v5806_v33 = vadd.f32 %v6923_v59, %v5709_v9  ;;  %v6926_v2 = vadd.f32 %v6925_v63, %v6924_v46 }
 0x479   : > { %5850 = vst [vmem:[%s9930_s27 + $0x30] sm:$0xff] %v5806_v33  ;;  %v5809_v35 = vadd.f32 %v6926_v2, %v5712_v1 }
 0x47b   : > { %5851 = vst [vmem:[%s9930_s27 + $0x38] sm:$0xff] %v5809_v35  ;;  %v6927_v11 = vpop.f32.mrb[160].mxu1 }
 0x47c   : > { %v6928_v45 = vpop.f32.mrb[161].mxu1 }
 0x47d   : > { %v6929_v7 = vadd.f32 %v6928_v45, %v6927_v11  ;;  %v6930_v54 = vpop.f32.mrb[162].mxu1 }
 0x47e   : > { %v6931_v20 = vpop.f32.mrb[163].mxu1 }
 0x47f   : > { %v5814_v60 = vadd.f32 %v6929_v7, %v5717_v42  ;;  %v6932_v14 = vadd.f32 %v6931_v20, %v6930_v54 }
 0x481   : > { %5852 = vst [vmem:[%s9930_s27 + $0x40] sm:$0xff] %v5814_v60  ;;  %v5817_v47 = vadd.f32 %v6932_v14, %v5720_v37 }
 0x483   : > { %5853 = vst [vmem:[%s9930_s27 + $0x48] sm:$0xff] %v5817_v47  ;;  %v6933_v38 = vpop.f32.mrb[164].mxu1 }
 0x484   : > { %v6934_v8 = vpop.f32.mrb[165].mxu1 }
 0x485   : > { %v6935_v61 = vadd.f32 %v6934_v8, %v6933_v38  ;;  %v6936_v13 = vpop.f32.mrb[166].mxu1 }
 0x486   : > { %v6937_v43 = vpop.f32.mrb[167].mxu1 }
 0x487   : > { %v5822_v0 = vadd.f32 %v6935_v61, %v5725_v18  ;;  %v6938_v27 = vadd.f32 %v6937_v43, %v6936_v13 }
 0x489   : > { %5854 = vst [vmem:[%s9930_s27 + $0x50] sm:$0xff] %v5822_v0  ;;  %v5825_v25 = vadd.f32 %v6938_v27, %v5728_v49 }
 0x48b   : > { %5855 = vst [vmem:[%s9930_s27 + $0x58] sm:$0xff] %v5825_v25  ;;  %v6939_v32 = vpop.f32.mrb[168].mxu1 }
 0x48c   : > { %v6940_v3 = vpop.f32.mrb[169].mxu1 }
 0x48d   : > { %v6941_v55 = vadd.f32 %v6940_v3, %v6939_v32  ;;  %v6942_v52 = vpop.f32.mrb[170].mxu1 }
 0x48e   : > { %v6943_v19 = vpop.f32.mrb[171].mxu1 }
 0x48f   : > { %v5830_v16 = vadd.f32 %v6941_v55, %v5733_v22  ;;  %v6944_v30 = vadd.f32 %v6943_v19, %v6942_v52 }
 0x491   : > { %5856 = vst [vmem:[%s9930_s27 + $0x60] sm:$0xff] %v5830_v16  ;;  %v5833_v50 = vadd.f32 %v6944_v30, %v5736_v28 }
 0x493   : > { %5857 = vst [vmem:[%s9930_s27 + $0x68] sm:$0xff] %v5833_v50  ;;  %v6945_v62 = vpop.f32.mrb[172].mxu1 }
 0x494   : > { %v6946_v6 = vpop.f32.mrb[173].mxu1 }
 0x495   : > { %v6947_v53 = vadd.f32 %v6946_v6, %v6945_v62  ;;  %v6948_v12 = vpop.f32.mrb[174].mxu1 }
 0x496   : > { %v6949_v31 = vpop.f32.mrb[175].mxu1 }
 0x497   : > { %v5838_v24 = vadd.f32 %v6947_v53, %v5741_v15  ;;  %v6950_v26 = vadd.f32 %v6949_v31, %v6948_v12 }
 0x499   : > { %5858 = vst [vmem:[%s9930_s27 + $0x70] sm:$0xff] %v5838_v24  ;;  %v5841_v17 = vadd.f32 %v6950_v26, %v5744_v58 }
 0x49b   : > { %5859 = vst [vmem:[%s9930_s27 + $0x78] sm:$0xff] %v5841_v17 }
 0x49c PF: > { %s10119_s28 = sld [smem:[#allocation17_spill]]  ;;  %s10120_s27 = smov %s8523_s29 }
 0x49d   : > { %s10122_s29 = smov %s10125_s22 }
 0x4a2   : > { %s22_s9 = sadd.s32 1, %s10119_s28   ;;  %s10121_s28 = smov %s8527_s30 }
 0x4a3   : > { %p19_p0 = scmp.ge.s32.totalorder %s22_s9, 6   ;;  %s10123_s30 = smov %s10129_s23 }
 0x4a5   :  { %21 = sbr.rel (!%p19_p0) target bundleno = 9 (0x9), region = 119 }
 0x4ac   :  { %5889 = vsyncpa [#allocation3], 1 }
 0x4ad   :  { %5891 = vsyncpa [#allocation3 + $0x1], 1 }
 0x4ae   :  { %5892 = vsyncpa [#allocation5], 1 }
 0x4af   :  { %5893 = vsyncpa [#allocation8], 1 }
 0x4b0   :  { %5894 = vsyncpa [#allocation11], 1 }

</bundles_post_ra>
